<compile_context>
chip_gen: v7x
topology: tpu7x:2x2x1
jax: 0.10.0
libtpu: 0.0.40
codegen_flags: <defaults>
</compile_context>

<pallas_src>
import functools

import jax
import jax.numpy as jnp
from jax.experimental import pallas as pl
from jax.experimental.pallas import tpu as pltpu


def _round_up(x, m):
    return (x + m - 1) // m * m


# ---------------------------------------------------------------------------
# Kernel 1: (optional fused per-channel affine + ReLU on the input)
#           -> 3x3 conv as 9 MXU matmuls + bias
#           -> per-channel sum / sum-of-squares accumulated across the grid.
# ---------------------------------------------------------------------------
def _conv_bn_stats_kernel(x_ref, w_ref, b_ref, scale_ref, shift_ref,
                          y_ref, sum_ref, sumsq_ref, acc_ref,
                          *, H, W, apply_pre_act):
    b = pl.program_id(0)

    x = x_ref[0]                                     # (H+2, W+2, Cin_p) f32
    if apply_pre_act:
        # Fused BN1 + ReLU of the previous conv output (per-channel affine).
        scale = scale_ref[...].reshape(1, 1, -1)
        shift = shift_ref[...].reshape(1, 1, -1)
        x = jnp.maximum(x * scale + shift, 0.0)
        # The 1-pixel zero halo was padded *before* the affine; re-zero it so
        # conv2 sees pad(relu(bn(x))) == 0 at the image border.
        rows = jax.lax.broadcasted_iota(jnp.int32, x.shape, 0)
        cols = jax.lax.broadcasted_iota(jnp.int32, x.shape, 1)
        interior = (rows >= 1) & (rows <= H) & (cols >= 1) & (cols <= W)
        x = jnp.where(interior, x, 0.0)

    # 3x3 conv = 9 shifted (H*W, Cin) @ (Cin, Cout) MXU matmuls, f32 accum.
    acc_ref[...] = jnp.zeros_like(acc_ref)
    for t in range(9):                               # fully unrolled 9-tap loop
        kh, kw = t // 3, t % 3
        patch = x[kh:kh + H, kw:kw + W, :].reshape(H * W, x.shape[-1])
        acc_ref[...] += jnp.dot(patch, w_ref[t],
                                preferred_element_type=jnp.float32)

    y = acc_ref[...] + b_ref[...]                    # (H*W, Cout_p) + (1, Cout_p)
    y_ref[...] = y[None].astype(y_ref.dtype)

    # Per-channel statistics for training-mode BatchNorm, accumulated across
    # the (arbitrary) batch grid axis.
    @pl.when(b == 0)
    def _():
        sum_ref[...] = jnp.zeros_like(sum_ref)
        sumsq_ref[...] = jnp.zeros_like(sumsq_ref)

    sum_ref[...] += jnp.sum(y, axis=0, keepdims=True)
    sumsq_ref[...] += jnp.sum(y * y, axis=0, keepdims=True)


def _conv_bn_stats(x_pad, w, bias, pre_scale, pre_shift, *, H, W,
                   apply_pre_act):
    N, Hp2, Wp2, Cin_p = x_pad.shape
    Cout_p = w.shape[-1]
    HW = H * W

    kernel = functools.partial(_conv_bn_stats_kernel, H=H, W=W,
                               apply_pre_act=apply_pre_act)
    grid_spec = pltpu.PrefetchScalarGridSpec(
        num_scalar_prefetch=0,
        grid=(N,),
        in_specs=[
            # one padded image per grid step (halo fetched with the block)
            pl.BlockSpec((1, Hp2, Wp2, Cin_p), lambda b: (b, 0, 0, 0)),
            # weights / bias / affine params resident in VMEM (constant block)
            pl.BlockSpec((9, Cin_p, Cout_p), lambda b: (0, 0, 0)),
            pl.BlockSpec((1, Cout_p), lambda b: (0, 0)),
            pl.BlockSpec((1, Cin_p), lambda b: (0, 0)),
            pl.BlockSpec((1, Cin_p), lambda b: (0, 0)),
        ],
        out_specs=[
            # lane-dense (multiple of 128) output tile
            pl.BlockSpec((1, HW, Cout_p), lambda b: (b, 0, 0)),
            pl.BlockSpec((1, Cout_p), lambda b: (0, 0)),   # sum accumulator
            pl.BlockSpec((1, Cout_p), lambda b: (0, 0)),   # sumsq accumulator
        ],
        scratch_shapes=[pltpu.VMEM((HW, Cout_p), jnp.float32)],
    )
    out_shape = (
        jax.ShapeDtypeStruct((N, HW, Cout_p), jnp.float32),
        jax.ShapeDtypeStruct((1, Cout_p), jnp.float32),
        jax.ShapeDtypeStruct((1, Cout_p), jnp.float32),
    )
    return pl.pallas_call(
        kernel,
        out_shape=out_shape,
        grid_spec=grid_spec,
        compiler_params=pltpu.CompilerParams(
            # stats accumulate across this axis -> must be "arbitrary"
            dimension_semantics=("arbitrary",)),
    )(x_pad, w, bias, pre_scale, pre_shift)


# ---------------------------------------------------------------------------
# Kernel 2: final BatchNorm (precomputed per-channel scale/shift) + ReLU.
# ---------------------------------------------------------------------------
def _bn_relu_kernel(y_ref, scale_ref, shift_ref, o_ref):
    scale = scale_ref[...].reshape(1, 1, -1)
    shift = shift_ref[...].reshape(1, 1, -1)
    o_ref[...] = jnp.maximum(y_ref[...] * scale + shift, 0.0).astype(o_ref.dtype)


def _bn_relu(y, scale, shift):
    N, HW, Cp = y.shape
    grid_spec = pltpu.PrefetchScalarGridSpec(
        num_scalar_prefetch=0,
        grid=(N,),
        in_specs=[
            pl.BlockSpec((1, HW, Cp), lambda b: (b, 0, 0)),
            pl.BlockSpec((1, Cp), lambda b: (0, 0)),
            pl.BlockSpec((1, Cp), lambda b: (0, 0)),
        ],
        out_specs=pl.BlockSpec((1, HW, Cp), lambda b: (b, 0, 0)),
    )
    return pl.pallas_call(
        _bn_relu_kernel,
        out_shape=jax.ShapeDtypeStruct((N, HW, Cp), jnp.float32),
        grid_spec=grid_spec,
        compiler_params=pltpu.CompilerParams(
            dimension_semantics=("parallel",)),
    )(y, scale, shift)


# ---------------------------------------------------------------------------
# Wrapper: NCHW -> NHWC (lane-padded channels), two conv passes with fused
# BN/ReLU pre-activation, final BN+ReLU, back to NCHW.
# ---------------------------------------------------------------------------
def conv_block_forward(x, w1, b1, g1, be1, w2, b2, g2, be2, eps=1e-5):
    N, Cin, H, W = x.shape
    Cout = w1.shape[0]
    Cin_p = _round_up(Cin, 128)
    Cout_p = _round_up(Cout, 128)
    count = float(N * H * W)

    def prep_w(w, cin_p, cout_p):
        # (Cout, Cin, 3, 3) -> HWIO -> zero-pad channels -> (9, Cin_p, Cout_p)
        hwio = jnp.transpose(w, (2, 3, 1, 0)).astype(jnp.float32)
        hwio = jnp.pad(hwio, ((0, 0), (0, 0),
                              (0, cin_p - hwio.shape[2]),
                              (0, cout_p - hwio.shape[3])))
        return hwio.reshape(9, cin_p, cout_p)

    def prep_vec(v, cp):
        return jnp.pad(v.astype(jnp.float32), (0, cp - v.shape[0])).reshape(1, cp)

    # NCHW -> NHWC, zero-pad channels to lane width, 1-pixel spatial halo.
    x_nhwc = jnp.transpose(x, (0, 2, 3, 1)).astype(jnp.float32)
    x_nhwc = jnp.pad(x_nhwc, ((0, 0), (1, 1), (1, 1), (0, Cin_p - Cin)))

    w1_p = prep_w(w1, Cin_p, Cout_p)
    w2_p = prep_w(w2, Cout_p, Cout_p)
    b1_p, b2_p = prep_vec(b1, Cout_p), prep_vec(b2, Cout_p)
    g1_p, be1_p = prep_vec(g1, Cout_p), prep_vec(be1, Cout_p)
    g2_p, be2_p = prep_vec(g2, Cout_p), prep_vec(be2, Cout_p)

    ones = jnp.ones((1, Cin_p), jnp.float32)
    zeros = jnp.zeros((1, Cin_p), jnp.float32)

    # ---- conv1 + per-channel stats (training-mode BN statistics) ----
    y1, s1, ss1 = _conv_bn_stats(x_nhwc, w1_p, b1_p, ones, zeros,
                                 H=H, W=W, apply_pre_act=False)
    mean1 = s1 / count
    var1 = jnp.maximum(ss1 / count - mean1 * mean1, 0.0)   # biased variance
    scale1 = g1_p * jax.lax.rsqrt(var1 + eps)              # once per channel
    shift1 = be1_p - mean1 * scale1

    # ---- BN1 + ReLU fused as conv2's pre-activation ----
    # TODO(synk): fuse conv1->conv2 per spatial tile with the intermediate held
    # in VMEM (needs 1-pixel border recompute); currently one HBM round-trip.
    y1_pad = jnp.pad(y1.reshape(N, H, W, Cout_p),
                     ((0, 0), (1, 1), (1, 1), (0, 0)))
    y2, s2, ss2 = _conv_bn_stats(y1_pad, w2_p, b2_p, scale1, shift1,
                                 H=H, W=W, apply_pre_act=True)
    mean2 = s2 / count
    var2 = jnp.maximum(ss2 / count - mean2 * mean2, 0.0)
    scale2 = g2_p * jax.lax.rsqrt(var2 + eps)
    shift2 = be2_p - mean2 * scale2

    # ---- final BN2 + ReLU ----
    out = _bn_relu(y2, scale2, shift2)
    out = out.reshape(N, H, W, Cout_p)[:, :, :, :Cout]
    return jnp.transpose(out, (0, 3, 1, 2))


# ---------------------------------------------------------------------------
# Pure-jnp reference (mirrors the PyTorch module in training mode).
# ---------------------------------------------------------------------------
def _reference(x, w1, b1, g1, be1, w2, b2, g2, be2, eps=1e-5):
    def conv(x, w, b):
        y = jax.lax.conv_general_dilated(
            x, w, window_strides=(1, 1), padding=((1, 1), (1, 1)),
            dimension_numbers=("NCHW", "OIHW", "NCHW"))
        return y + b[None, :, None, None]

    def bn_relu(y, g, be):
        mean = jnp.mean(y, axis=(0, 2, 3), keepdims=True)
        var = jnp.mean((y - mean) ** 2, axis=(0, 2, 3), keepdims=True)
        yn = (y - mean) * jax.lax.rsqrt(var + eps)
        return jnp.maximum(yn * g[None, :, None, None]
                           + be[None, :, None, None], 0.0)

    h = bn_relu(conv(x, w1, b1), g1, be1)
    return bn_relu(conv(h, w2, b2), g2, be2)


if __name__ == "__main__":
    key = jax.random.PRNGKey(0)
    ks = jax.random.split(key, 9)
    N, Cin, Cout, H, W = 2, 4, 8, 16, 16

    x = jax.random.normal(ks[0], (N, Cin, H, W), jnp.float32)
    w1 = 0.2 * jax.random.normal(ks[1], (Cout, Cin, 3, 3), jnp.float32)
    b1 = 0.1 * jax.random.normal(ks[2], (Cout,), jnp.float32)
    w2 = 0.2 * jax.random.normal(ks[3], (Cout, Cout, 3, 3), jnp.float32)
    b2 = 0.1 * jax.random.normal(ks[4], (Cout,), jnp.float32)
    g1 = 1.0 + 0.1 * jax.random.normal(ks[5], (Cout,), jnp.float32)
    be1 = 0.1 * jax.random.normal(ks[6], (Cout,), jnp.float32)
    g2 = 1.0 + 0.1 * jax.random.normal(ks[7], (Cout,), jnp.float32)
    be2 = 0.1 * jax.random.normal(ks[8], (Cout,), jnp.float32)

    fwd = jax.jit(conv_block_forward)
    out = jax.block_until_ready(fwd(x, w1, b1, g1, be1, w2, b2, g2, be2))

    ref = _reference(x, w1, b1, g1, be1, w2, b2, g2, be2)
    assert out.shape == (N, Cout, H, W), out.shape
    err = float(jnp.max(jnp.abs(out - ref)))
    assert err < 2e-2, f"max abs error vs reference: {err}"
    print("KERNEL_OK")
</pallas_src>

<mosaic_0001>
module attributes {stable_mosaic.version = 11 : i64} {
  func.func @_conv_bn_stats_kernel(%arg0: i32, %arg1: memref<1x18x18x128xf32, #tpu.memory_space<vmem>>, %arg2: memref<9x128x128xf32, #tpu.memory_space<vmem>>, %arg3: memref<1x128xf32, #tpu.memory_space<vmem>>, %arg4: memref<1x128xf32, #tpu.memory_space<vmem>>, %arg5: memref<1x128xf32, #tpu.memory_space<vmem>>, %arg6: memref<1x256x128xf32, #tpu.memory_space<vmem>>, %arg7: memref<1x128xf32, #tpu.memory_space<vmem>>, %arg8: memref<1x128xf32, #tpu.memory_space<vmem>>, %arg9: memref<256x128xf32, #tpu.memory_space<vmem>>) attributes {dimension_semantics = [#tpu.dimension_semantics<arbitrary>], iteration_bounds = array<i64: 2>, scalar_prefetch = 0 : i64, scratch_operands = 1 : i64, tpu.core_type = #tpu.core_type<tc>, window_params = [{transform_indices = @transform_0, window_bounds = array<i64: 1, 18, 18, 128>}, {pipeline_mode = #tpu.pipeline_mode<synchronous>, transform_indices = @transform_1, window_bounds = array<i64: 9, 128, 128>}, {pipeline_mode = #tpu.pipeline_mode<synchronous>, transform_indices = @transform_2, window_bounds = array<i64: 1, 128>}, {pipeline_mode = #tpu.pipeline_mode<synchronous>, transform_indices = @transform_3, window_bounds = array<i64: 1, 128>}, {pipeline_mode = #tpu.pipeline_mode<synchronous>, transform_indices = @transform_4, window_bounds = array<i64: 1, 128>}, {transform_indices = @transform_5, window_bounds = array<i64: 1, 256, 128>}, {pipeline_mode = #tpu.pipeline_mode<synchronous>, transform_indices = @transform_6, window_bounds = array<i64: 1, 128>}, {pipeline_mode = #tpu.pipeline_mode<synchronous>, transform_indices = @transform_7, window_bounds = array<i64: 1, 128>}]} {
    %c0 = arith.constant 0 : index
    %c0_0 = arith.constant 0 : index
    %c0_1 = arith.constant 0 : index
    %c0_2 = arith.constant 0 : index
    %0 = vector.load %arg1[%c0, %c0_0, %c0_1, %c0_2] : memref<1x18x18x128xf32, #tpu.memory_space<vmem>>, vector<1x18x18x128xf32>
    %1 = vector.shape_cast %0 : vector<1x18x18x128xf32> to vector<18x18x128xf32>
    %cst = arith.constant 0.000000e+00 : f32
    %2 = vector.broadcast %cst : f32 to vector<256x128xf32>
    %c0_3 = arith.constant 0 : index
    %c0_4 = arith.constant 0 : index
    %3 = vector.load %arg9[%c0_3, %c0_4] : memref<256x128xf32, #tpu.memory_space<vmem>>, vector<256x128xf32>
    tpu.vector_store %arg9[%c0_3, %c0_4], %2 {strides = array<i32>} : memref<256x128xf32, #tpu.memory_space<vmem>>, vector<256x128xf32>,
    %4 = vector.extract_strided_slice %1 {offsets = [0, 0, 0], sizes = [16, 16, 128], strides = [1, 1, 1]} : vector<18x18x128xf32> to vector<16x16x128xf32>
    %5 = vector.shape_cast %4 : vector<16x16x128xf32> to vector<256x128xf32>
    %c0_5 = arith.constant 0 : index
    %c0_6 = arith.constant 0 : index
    %6 = vector.load %arg9[%c0_5, %c0_6] : memref<256x128xf32, #tpu.memory_space<vmem>>, vector<256x128xf32>
    %c0_7 = arith.constant 0 : index
    %c0_8 = arith.constant 0 : index
    %c0_9 = arith.constant 0 : index
    %7 = vector.load %arg2[%c0_7, %c0_8, %c0_9] : memref<9x128x128xf32, #tpu.memory_space<vmem>>, vector<1x128x128xf32>
    %8 = vector.shape_cast %7 : vector<1x128x128xf32> to vector<128x128xf32>
    %cst_10 = arith.constant dense<0.000000e+00> : vector<256x128xf32>
    %9 = tpu.matmul %5, %8, %cst_10 {dimension_numbers = #tpu.dot_dimension_numbers<[1], [0], [0], [1], [0, 0, 1, 1], [], []>} : vector<256x128xf32>, vector<128x128xf32>, vector<256x128xf32> -> vector<256x128xf32>
    %10 = arith.addf %6, %9 : vector<256x128xf32>
    %c0_11 = arith.constant 0 : index
    %c0_12 = arith.constant 0 : index
    %11 = vector.load %arg9[%c0_11, %c0_12] : memref<256x128xf32, #tpu.memory_space<vmem>>, vector<256x128xf32>
    tpu.vector_store %arg9[%c0_11, %c0_12], %10 {strides = array<i32>} : memref<256x128xf32, #tpu.memory_space<vmem>>, vector<256x128xf32>,
    %12 = vector.extract_strided_slice %1 {offsets = [0, 1, 0], sizes = [16, 16, 128], strides = [1, 1, 1]} : vector<18x18x128xf32> to vector<16x16x128xf32>
    %13 = vector.shape_cast %12 : vector<16x16x128xf32> to vector<256x128xf32>
    %c0_13 = arith.constant 0 : index
    %c0_14 = arith.constant 0 : index
    %14 = vector.load %arg9[%c0_13, %c0_14] : memref<256x128xf32, #tpu.memory_space<vmem>>, vector<256x128xf32>
    %c1 = arith.constant 1 : index
    %c0_15 = arith.constant 0 : index
    %c0_16 = arith.constant 0 : index
    %15 = vector.load %arg2[%c1, %c0_15, %c0_16] : memref<9x128x128xf32, #tpu.memory_space<vmem>>, vector<1x128x128xf32>
    %16 = vector.shape_cast %15 : vector<1x128x128xf32> to vector<128x128xf32>
    %cst_17 = arith.constant dense<0.000000e+00> : vector<256x128xf32>
    %17 = tpu.matmul %13, %16, %cst_17 {dimension_numbers = #tpu.dot_dimension_numbers<[1], [0], [0], [1], [0, 0, 1, 1], [], []>} : vector<256x128xf32>, vector<128x128xf32>, vector<256x128xf32> -> vector<256x128xf32>
    %18 = arith.addf %14, %17 : vector<256x128xf32>
    %c0_18 = arith.constant 0 : index
    %c0_19 = arith.constant 0 : index
    %19 = vector.load %arg9[%c0_18, %c0_19] : memref<256x128xf32, #tpu.memory_space<vmem>>, vector<256x128xf32>
    tpu.vector_store %arg9[%c0_18, %c0_19], %18 {strides = array<i32>} : memref<256x128xf32, #tpu.memory_space<vmem>>, vector<256x128xf32>,
    %20 = vector.extract_strided_slice %1 {offsets = [0, 2, 0], sizes = [16, 16, 128], strides = [1, 1, 1]} : vector<18x18x128xf32> to vector<16x16x128xf32>
    %21 = vector.shape_cast %20 : vector<16x16x128xf32> to vector<256x128xf32>
    %c0_20 = arith.constant 0 : index
    %c0_21 = arith.constant 0 : index
    %22 = vector.load %arg9[%c0_20, %c0_21] : memref<256x128xf32, #tpu.memory_space<vmem>>, vector<256x128xf32>
    %c2 = arith.constant 2 : index
    %c0_22 = arith.constant 0 : index
    %c0_23 = arith.constant 0 : index
    %23 = vector.load %arg2[%c2, %c0_22, %c0_23] : memref<9x128x128xf32, #tpu.memory_space<vmem>>, vector<1x128x128xf32>
    %24 = vector.shape_cast %23 : vector<1x128x128xf32> to vector<128x128xf32>
    %cst_24 = arith.constant dense<0.000000e+00> : vector<256x128xf32>
    %25 = tpu.matmul %21, %24, %cst_24 {dimension_numbers = #tpu.dot_dimension_numbers<[1], [0], [0], [1], [0, 0, 1, 1], [], []>} : vector<256x128xf32>, vector<128x128xf32>, vector<256x128xf32> -> vector<256x128xf32>
    %26 = arith.addf %22, %25 : vector<256x128xf32>
    %c0_25 = arith.constant 0 : index
    %c0_26 = arith.constant 0 : index
    %27 = vector.load %arg9[%c0_25, %c0_26] : memref<256x128xf32, #tpu.memory_space<vmem>>, vector<256x128xf32>
    tpu.vector_store %arg9[%c0_25, %c0_26], %26 {strides = array<i32>} : memref<256x128xf32, #tpu.memory_space<vmem>>, vector<256x128xf32>,
    %28 = vector.extract_strided_slice %1 {offsets = [1, 0, 0], sizes = [16, 16, 128], strides = [1, 1, 1]} : vector<18x18x128xf32> to vector<16x16x128xf32>
    %29 = vector.shape_cast %28 : vector<16x16x128xf32> to vector<256x128xf32>
    %c0_27 = arith.constant 0 : index
    %c0_28 = arith.constant 0 : index
    %30 = vector.load %arg9[%c0_27, %c0_28] : memref<256x128xf32, #tpu.memory_space<vmem>>, vector<256x128xf32>
    %c3 = arith.constant 3 : index
    %c0_29 = arith.constant 0 : index
    %c0_30 = arith.constant 0 : index
    %31 = vector.load %arg2[%c3, %c0_29, %c0_30] : memref<9x128x128xf32, #tpu.memory_space<vmem>>, vector<1x128x128xf32>
    %32 = vector.shape_cast %31 : vector<1x128x128xf32> to vector<128x128xf32>
    %cst_31 = arith.constant dense<0.000000e+00> : vector<256x128xf32>
    %33 = tpu.matmul %29, %32, %cst_31 {dimension_numbers = #tpu.dot_dimension_numbers<[1], [0], [0], [1], [0, 0, 1, 1], [], []>} : vector<256x128xf32>, vector<128x128xf32>, vector<256x128xf32> -> vector<256x128xf32>
    %34 = arith.addf %30, %33 : vector<256x128xf32>
    %c0_32 = arith.constant 0 : index
    %c0_33 = arith.constant 0 : index
    %35 = vector.load %arg9[%c0_32, %c0_33] : memref<256x128xf32, #tpu.memory_space<vmem>>, vector<256x128xf32>
    tpu.vector_store %arg9[%c0_32, %c0_33], %34 {strides = array<i32>} : memref<256x128xf32, #tpu.memory_space<vmem>>, vector<256x128xf32>,
    %36 = vector.extract_strided_slice %1 {offsets = [1, 1, 0], sizes = [16, 16, 128], strides = [1, 1, 1]} : vector<18x18x128xf32> to vector<16x16x128xf32>
    %37 = vector.shape_cast %36 : vector<16x16x128xf32> to vector<256x128xf32>
    %c0_34 = arith.constant 0 : index
    %c0_35 = arith.constant 0 : index
    %38 = vector.load %arg9[%c0_34, %c0_35] : memref<256x128xf32, #tpu.memory_space<vmem>>, vector<256x128xf32>
    %c4 = arith.constant 4 : index
    %c0_36 = arith.constant 0 : index
    %c0_37 = arith.constant 0 : index
    %39 = vector.load %arg2[%c4, %c0_36, %c0_37] : memref<9x128x128xf32, #tpu.memory_space<vmem>>, vector<1x128x128xf32>
    %40 = vector.shape_cast %39 : vector<1x128x128xf32> to vector<128x128xf32>
    %cst_38 = arith.constant dense<0.000000e+00> : vector<256x128xf32>
    %41 = tpu.matmul %37, %40, %cst_38 {dimension_numbers = #tpu.dot_dimension_numbers<[1], [0], [0], [1], [0, 0, 1, 1], [], []>} : vector<256x128xf32>, vector<128x128xf32>, vector<256x128xf32> -> vector<256x128xf32>
    %42 = arith.addf %38, %41 : vector<256x128xf32>
    %c0_39 = arith.constant 0 : index
    %c0_40 = arith.constant 0 : index
    %43 = vector.load %arg9[%c0_39, %c0_40] : memref<256x128xf32, #tpu.memory_space<vmem>>, vector<256x128xf32>
    tpu.vector_store %arg9[%c0_39, %c0_40], %42 {strides = array<i32>} : memref<256x128xf32, #tpu.memory_space<vmem>>, vector<256x128xf32>,
    %44 = vector.extract_strided_slice %1 {offsets = [1, 2, 0], sizes = [16, 16, 128], strides = [1, 1, 1]} : vector<18x18x128xf32> to vector<16x16x128xf32>
    %45 = vector.shape_cast %44 : vector<16x16x128xf32> to vector<256x128xf32>
    %c0_41 = arith.constant 0 : index
    %c0_42 = arith.constant 0 : index
    %46 = vector.load %arg9[%c0_41, %c0_42] : memref<256x128xf32, #tpu.memory_space<vmem>>, vector<256x128xf32>
    %c5 = arith.constant 5 : index
    %c0_43 = arith.constant 0 : index
    %c0_44 = arith.constant 0 : index
    %47 = vector.load %arg2[%c5, %c0_43, %c0_44] : memref<9x128x128xf32, #tpu.memory_space<vmem>>, vector<1x128x128xf32>
    %48 = vector.shape_cast %47 : vector<1x128x128xf32> to vector<128x128xf32>
    %cst_45 = arith.constant dense<0.000000e+00> : vector<256x128xf32>
    %49 = tpu.matmul %45, %48, %cst_45 {dimension_numbers = #tpu.dot_dimension_numbers<[1], [0], [0], [1], [0, 0, 1, 1], [], []>} : vector<256x128xf32>, vector<128x128xf32>, vector<256x128xf32> -> vector<256x128xf32>
    %50 = arith.addf %46, %49 : vector<256x128xf32>
    %c0_46 = arith.constant 0 : index
    %c0_47 = arith.constant 0 : index
    %51 = vector.load %arg9[%c0_46, %c0_47] : memref<256x128xf32, #tpu.memory_space<vmem>>, vector<256x128xf32>
    tpu.vector_store %arg9[%c0_46, %c0_47], %50 {strides = array<i32>} : memref<256x128xf32, #tpu.memory_space<vmem>>, vector<256x128xf32>,
    %52 = vector.extract_strided_slice %1 {offsets = [2, 0, 0], sizes = [16, 16, 128], strides = [1, 1, 1]} : vector<18x18x128xf32> to vector<16x16x128xf32>
    %53 = vector.shape_cast %52 : vector<16x16x128xf32> to vector<256x128xf32>
    %c0_48 = arith.constant 0 : index
    %c0_49 = arith.constant 0 : index
    %54 = vector.load %arg9[%c0_48, %c0_49] : memref<256x128xf32, #tpu.memory_space<vmem>>, vector<256x128xf32>
    %c6 = arith.constant 6 : index
    %c0_50 = arith.constant 0 : index
    %c0_51 = arith.constant 0 : index
    %55 = vector.load %arg2[%c6, %c0_50, %c0_51] : memref<9x128x128xf32, #tpu.memory_space<vmem>>, vector<1x128x128xf32>
    %56 = vector.shape_cast %55 : vector<1x128x128xf32> to vector<128x128xf32>
    %cst_52 = arith.constant dense<0.000000e+00> : vector<256x128xf32>
    %57 = tpu.matmul %53, %56, %cst_52 {dimension_numbers = #tpu.dot_dimension_numbers<[1], [0], [0], [1], [0, 0, 1, 1], [], []>} : vector<256x128xf32>, vector<128x128xf32>, vector<256x128xf32> -> vector<256x128xf32>
    %58 = arith.addf %54, %57 : vector<256x128xf32>
    %c0_53 = arith.constant 0 : index
    %c0_54 = arith.constant 0 : index
    %59 = vector.load %arg9[%c0_53, %c0_54] : memref<256x128xf32, #tpu.memory_space<vmem>>, vector<256x128xf32>
    tpu.vector_store %arg9[%c0_53, %c0_54], %58 {strides = array<i32>} : memref<256x128xf32, #tpu.memory_space<vmem>>, vector<256x128xf32>,
    %60 = vector.extract_strided_slice %1 {offsets = [2, 1, 0], sizes = [16, 16, 128], strides = [1, 1, 1]} : vector<18x18x128xf32> to vector<16x16x128xf32>
    %61 = vector.shape_cast %60 : vector<16x16x128xf32> to vector<256x128xf32>
    %c0_55 = arith.constant 0 : index
    %c0_56 = arith.constant 0 : index
    %62 = vector.load %arg9[%c0_55, %c0_56] : memref<256x128xf32, #tpu.memory_space<vmem>>, vector<256x128xf32>
    %c7 = arith.constant 7 : index
    %c0_57 = arith.constant 0 : index
    %c0_58 = arith.constant 0 : index
    %63 = vector.load %arg2[%c7, %c0_57, %c0_58] : memref<9x128x128xf32, #tpu.memory_space<vmem>>, vector<1x128x128xf32>
    %64 = vector.shape_cast %63 : vector<1x128x128xf32> to vector<128x128xf32>
    %cst_59 = arith.constant dense<0.000000e+00> : vector<256x128xf32>
    %65 = tpu.matmul %61, %64, %cst_59 {dimension_numbers = #tpu.dot_dimension_numbers<[1], [0], [0], [1], [0, 0, 1, 1], [], []>} : vector<256x128xf32>, vector<128x128xf32>, vector<256x128xf32> -> vector<256x128xf32>
    %66 = arith.addf %62, %65 : vector<256x128xf32>
    %c0_60 = arith.constant 0 : index
    %c0_61 = arith.constant 0 : index
    %67 = vector.load %arg9[%c0_60, %c0_61] : memref<256x128xf32, #tpu.memory_space<vmem>>, vector<256x128xf32>
    tpu.vector_store %arg9[%c0_60, %c0_61], %66 {strides = array<i32>} : memref<256x128xf32, #tpu.memory_space<vmem>>, vector<256x128xf32>,
    %68 = vector.extract_strided_slice %1 {offsets = [2, 2, 0], sizes = [16, 16, 128], strides = [1, 1, 1]} : vector<18x18x128xf32> to vector<16x16x128xf32>
    %69 = vector.shape_cast %68 : vector<16x16x128xf32> to vector<256x128xf32>
    %c0_62 = arith.constant 0 : index
    %c0_63 = arith.constant 0 : index
    %70 = vector.load %arg9[%c0_62, %c0_63] : memref<256x128xf32, #tpu.memory_space<vmem>>, vector<256x128xf32>
    %c8 = arith.constant 8 : index
    %c0_64 = arith.constant 0 : index
    %c0_65 = arith.constant 0 : index
    %71 = vector.load %arg2[%c8, %c0_64, %c0_65] : memref<9x128x128xf32, #tpu.memory_space<vmem>>, vector<1x128x128xf32>
    %72 = vector.shape_cast %71 : vector<1x128x128xf32> to vector<128x128xf32>
    %cst_66 = arith.constant dense<0.000000e+00> : vector<256x128xf32>
    %73 = tpu.matmul %69, %72, %cst_66 {dimension_numbers = #tpu.dot_dimension_numbers<[1], [0], [0], [1], [0, 0, 1, 1], [], []>} : vector<256x128xf32>, vector<128x128xf32>, vector<256x128xf32> -> vector<256x128xf32>
    %74 = arith.addf %70, %73 : vector<256x128xf32>
    %c0_67 = arith.constant 0 : index
    %c0_68 = arith.constant 0 : index
    %75 = vector.load %arg9[%c0_67, %c0_68] : memref<256x128xf32, #tpu.memory_space<vmem>>, vector<256x128xf32>
    tpu.vector_store %arg9[%c0_67, %c0_68], %74 {strides = array<i32>} : memref<256x128xf32, #tpu.memory_space<vmem>>, vector<256x128xf32>,
    %c0_69 = arith.constant 0 : index
    %c0_70 = arith.constant 0 : index
    %76 = vector.load %arg9[%c0_69, %c0_70] : memref<256x128xf32, #tpu.memory_space<vmem>>, vector<256x128xf32>
    %c0_71 = arith.constant 0 : index
    %c0_72 = arith.constant 0 : index
    %77 = vector.load %arg3[%c0_71, %c0_72] : memref<1x128xf32, #tpu.memory_space<vmem>>, vector<1x128xf32>
    %78 = vector.broadcast %77 : vector<1x128xf32> to vector<256x128xf32>
    %79 = arith.addf %76, %78 : vector<256x128xf32>
    %80 = vector.shape_cast %79 : vector<256x128xf32> to vector<1x256x128xf32>
    %c0_73 = arith.constant 0 : index
    %c0_74 = arith.constant 0 : index
    %c0_75 = arith.constant 0 : index
    %81 = vector.load %arg6[%c0_73, %c0_74, %c0_75] : memref<1x256x128xf32, #tpu.memory_space<vmem>>, vector<1x256x128xf32>
    tpu.vector_store %arg6[%c0_73, %c0_74, %c0_75], %80 {strides = array<i32>} : memref<1x256x128xf32, #tpu.memory_space<vmem>>, vector<1x256x128xf32>,
    %c0_i32 = arith.constant 0 : i32
    %82 = arith.cmpi eq, %arg0, %c0_i32 : i32
    %83 = arith.extui %82 : i1 to i32
    %c0_i32_76 = arith.constant 0 : i32
    %84 = arith.cmpi ne, %83, %c0_i32_76 : i32
    scf.if %84 {
      %cst_87 = arith.constant 0.000000e+00 : f32
      %96 = vector.broadcast %cst_87 : f32 to vector<1x128xf32>
      %c0_88 = arith.constant 0 : index
      %c0_89 = arith.constant 0 : index
      %97 = vector.load %arg7[%c0_88, %c0_89] : memref<1x128xf32, #tpu.memory_space<vmem>>, vector<1x128xf32>
      tpu.vector_store %arg7[%c0_88, %c0_89], %96 {strides = array<i32>} : memref<1x128xf32, #tpu.memory_space<vmem>>, vector<1x128xf32>,
      %cst_90 = arith.constant 0.000000e+00 : f32
      %98 = vector.broadcast %cst_90 : f32 to vector<1x128xf32>
      %c0_91 = arith.constant 0 : index
      %c0_92 = arith.constant 0 : index
      %99 = vector.load %arg8[%c0_91, %c0_92] : memref<1x128xf32, #tpu.memory_space<vmem>>, vector<1x128xf32>
      tpu.vector_store %arg8[%c0_91, %c0_92], %98 {strides = array<i32>} : memref<1x128xf32, #tpu.memory_space<vmem>>, vector<1x128xf32>,
    } else {
    }
    %c0_77 = arith.constant 0 : index
    %c0_78 = arith.constant 0 : index
    %85 = vector.load %arg7[%c0_77, %c0_78] : memref<1x128xf32, #tpu.memory_space<vmem>>, vector<1x128xf32>
    %cst_79 = arith.constant dense<0.000000e+00> : vector<128xf32>
    %86 = vector.multi_reduction <add>, %79, %cst_79 [0] : vector<256x128xf32> to vector<128xf32>
    %87 = vector.shape_cast %86 : vector<128xf32> to vector<1x128xf32>
    %88 = arith.addf %85, %87 : vector<1x128xf32>
    %c0_80 = arith.constant 0 : index
    %c0_81 = arith.constant 0 : index
    %89 = vector.load %arg7[%c0_80, %c0_81] : memref<1x128xf32, #tpu.memory_space<vmem>>, vector<1x128xf32>
    tpu.vector_store %arg7[%c0_80, %c0_81], %88 {strides = array<i32>} : memref<1x128xf32, #tpu.memory_space<vmem>>, vector<1x128xf32>,
    %c0_82 = arith.constant 0 : index
    %c0_83 = arith.constant 0 : index
    %90 = vector.load %arg8[%c0_82, %c0_83] : memref<1x128xf32, #tpu.memory_space<vmem>>, vector<1x128xf32>
    %91 = arith.mulf %79, %79 : vector<256x128xf32>
    %cst_84 = arith.constant dense<0.000000e+00> : vector<128xf32>
    %92 = vector.multi_reduction <add>, %91, %cst_84 [0] : vector<256x128xf32> to vector<128xf32>
    %93 = vector.shape_cast %92 : vector<128xf32> to vector<1x128xf32>
    %94 = arith.addf %90, %93 : vector<1x128xf32>
    %c0_85 = arith.constant 0 : index
    %c0_86 = arith.constant 0 : index
    %95 = vector.load %arg8[%c0_85, %c0_86] : memref<1x128xf32, #tpu.memory_space<vmem>>, vector<1x128xf32>
    tpu.vector_store %arg8[%c0_85, %c0_86], %94 {strides = array<i32>} : memref<1x128xf32, #tpu.memory_space<vmem>>, vector<1x128xf32>,
    return
  }
  func.func @transform_0(%arg0: i32) -> (i32, i32, i32, i32) {
    %c0_i32 = arith.constant 0 : i32
    %c0_i32_0 = arith.constant 0 : i32
    %c0_i32_1 = arith.constant 0 : i32
    %c0_i32_2 = arith.constant 0 : i32
    return %arg0, %c0_i32, %c0_i32_0, %c0_i32_1 : i32, i32, i32, i32
  }
  func.func @transform_1(%arg0: i32) -> (i32, i32, i32) {
    %c0_i32 = arith.constant 0 : i32
    %c0_i32_0 = arith.constant 0 : i32
    %c0_i32_1 = arith.constant 0 : i32
    %c0_i32_2 = arith.constant 0 : i32
    return %c0_i32, %c0_i32_0, %c0_i32_1 : i32, i32, i32
  }
  func.func @transform_2(%arg0: i32) -> (i32, i32) {
    %c0_i32 = arith.constant 0 : i32
    %c0_i32_0 = arith.constant 0 : i32
    %c0_i32_1 = arith.constant 0 : i32
    return %c0_i32, %c0_i32_0 : i32, i32
  }
  func.func @transform_3(%arg0: i32) -> (i32, i32) {
    %c0_i32 = arith.constant 0 : i32
    %c0_i32_0 = arith.constant 0 : i32
    %c0_i32_1 = arith.constant 0 : i32
    return %c0_i32, %c0_i32_0 : i32, i32
  }
  func.func @transform_4(%arg0: i32) -> (i32, i32) {
    %c0_i32 = arith.constant 0 : i32
    %c0_i32_0 = arith.constant 0 : i32
    %c0_i32_1 = arith.constant 0 : i32
    return %c0_i32, %c0_i32_0 : i32, i32
  }
  func.func @transform_5(%arg0: i32) -> (i32, i32, i32) {
    %c0_i32 = arith.constant 0 : i32
    %c0_i32_0 = arith.constant 0 : i32
    %c0_i32_1 = arith.constant 0 : i32
    return %arg0, %c0_i32, %c0_i32_0 : i32, i32, i32
  }
  func.func @transform_6(%arg0: i32) -> (i32, i32) {
    %c0_i32 = arith.constant 0 : i32
    %c0_i32_0 = arith.constant 0 : i32
    %c0_i32_1 = arith.constant 0 : i32
    return %c0_i32, %c0_i32_0 : i32, i32
  }
  func.func @transform_7(%arg0: i32) -> (i32, i32) {
    %c0_i32 = arith.constant 0 : i32
    %c0_i32_0 = arith.constant 0 : i32
    %c0_i32_1 = arith.constant 0 : i32
    return %c0_i32, %c0_i32_0 : i32, i32
  }
}

module attributes {stable_mosaic.version = 11 : i64} {
  func.func @_conv_bn_stats_kernel(%arg0: i32, %arg1: memref<1x18x18x128xf32, #tpu.memory_space<vmem>>, %arg2: memref<9x128x128xf32, #tpu.memory_space<vmem>>, %arg3: memref<1x128xf32, #tpu.memory_space<vmem>>, %arg4: memref<1x128xf32, #tpu.memory_space<vmem>>, %arg5: memref<1x128xf32, #tpu.memory_space<vmem>>, %arg6: memref<1x256x128xf32, #tpu.memory_space<vmem>>, %arg7: memref<1x128xf32, #tpu.memory_space<vmem>>, %arg8: memref<1x128xf32, #tpu.memory_space<vmem>>, %arg9: memref<256x128xf32, #tpu.memory_space<vmem>>) attributes {dimension_semantics = [#tpu.dimension_semantics<arbitrary>], iteration_bounds = array<i64: 2>, scalar_prefetch = 0 : i64, scratch_operands = 1 : i64, tpu.core_type = #tpu.core_type<tc>, window_params = [{transform_indices = @transform_0, window_bounds = array<i64: 1, 18, 18, 128>}, {pipeline_mode = #tpu.pipeline_mode<synchronous>, transform_indices = @transform_1, window_bounds = array<i64: 9, 128, 128>}, {pipeline_mode = #tpu.pipeline_mode<synchronous>, transform_indices = @transform_2, window_bounds = array<i64: 1, 128>}, {pipeline_mode = #tpu.pipeline_mode<synchronous>, transform_indices = @transform_3, window_bounds = array<i64: 1, 128>}, {pipeline_mode = #tpu.pipeline_mode<synchronous>, transform_indices = @transform_4, window_bounds = array<i64: 1, 128>}, {transform_indices = @transform_5, window_bounds = array<i64: 1, 256, 128>}, {pipeline_mode = #tpu.pipeline_mode<synchronous>, transform_indices = @transform_6, window_bounds = array<i64: 1, 128>}, {pipeline_mode = #tpu.pipeline_mode<synchronous>, transform_indices = @transform_7, window_bounds = array<i64: 1, 128>}]} {
    %c0 = arith.constant 0 : index
    %c0_0 = arith.constant 0 : index
    %c0_1 = arith.constant 0 : index
    %c0_2 = arith.constant 0 : index
    %0 = vector.load %arg1[%c0, %c0_0, %c0_1, %c0_2] : memref<1x18x18x128xf32, #tpu.memory_space<vmem>>, vector<1x18x18x128xf32>
    %1 = vector.shape_cast %0 : vector<1x18x18x128xf32> to vector<18x18x128xf32>
    %c0_3 = arith.constant 0 : index
    %c0_4 = arith.constant 0 : index
    %2 = vector.load %arg4[%c0_3, %c0_4] : memref<1x128xf32, #tpu.memory_space<vmem>>, vector<1x128xf32>
    %3 = vector.shape_cast %2 : vector<1x128xf32> to vector<1x1x128xf32>
    %c0_5 = arith.constant 0 : index
    %c0_6 = arith.constant 0 : index
    %4 = vector.load %arg5[%c0_5, %c0_6] : memref<1x128xf32, #tpu.memory_space<vmem>>, vector<1x128xf32>
    %5 = vector.shape_cast %4 : vector<1x128xf32> to vector<1x1x128xf32>
    %6 = vector.broadcast %3 : vector<1x1x128xf32> to vector<18x18x128xf32>
    %7 = arith.mulf %1, %6 : vector<18x18x128xf32>
    %8 = vector.broadcast %5 : vector<1x1x128xf32> to vector<18x18x128xf32>
    %9 = arith.addf %7, %8 : vector<18x18x128xf32>
    %cst = arith.constant 0.000000e+00 : f32
    %10 = vector.broadcast %cst : f32 to vector<18x18x128xf32>
    %11 = arith.maximumf %9, %10 : vector<18x18x128xf32>
    %12 = tpu.iota {dimensions = array<i32: 0>} : vector<18x18x128xi32>
    %13 = tpu.iota {dimensions = array<i32: 1>} : vector<18x18x128xi32>
    %c1_i32 = arith.constant 1 : i32
    %14 = vector.broadcast %c1_i32 : i32 to vector<18x18x128xi32>
    %15 = arith.cmpi sge, %12, %14 : vector<18x18x128xi32>
    %c16_i32 = arith.constant 16 : i32
    %16 = vector.broadcast %c16_i32 : i32 to vector<18x18x128xi32>
    %17 = arith.cmpi sle, %12, %16 : vector<18x18x128xi32>
    %18 = arith.andi %15, %17 : vector<18x18x128xi1>
    %c1_i32_7 = arith.constant 1 : i32
    %19 = vector.broadcast %c1_i32_7 : i32 to vector<18x18x128xi32>
    %20 = arith.cmpi sge, %13, %19 : vector<18x18x128xi32>
    %21 = arith.andi %18, %20 : vector<18x18x128xi1>
    %c16_i32_8 = arith.constant 16 : i32
    %22 = vector.broadcast %c16_i32_8 : i32 to vector<18x18x128xi32>
    %23 = arith.cmpi sle, %13, %22 : vector<18x18x128xi32>
    %24 = arith.andi %21, %23 : vector<18x18x128xi1>
    %cst_9 = arith.constant 0.000000e+00 : f32
    %25 = vector.broadcast %cst_9 : f32 to vector<18x18x128xf32>
    %26 = arith.select %24, %11, %25 : vector<18x18x128xi1>, vector<18x18x128xf32>
    %cst_10 = arith.constant 0.000000e+00 : f32
    %27 = vector.broadcast %cst_10 : f32 to vector<256x128xf32>
    %c0_11 = arith.constant 0 : index
    %c0_12 = arith.constant 0 : index
    %28 = vector.load %arg9[%c0_11, %c0_12] : memref<256x128xf32, #tpu.memory_space<vmem>>, vector<256x128xf32>
    tpu.vector_store %arg9[%c0_11, %c0_12], %27 {strides = array<i32>} : memref<256x128xf32, #tpu.memory_space<vmem>>, vector<256x128xf32>,
    %29 = vector.extract_strided_slice %26 {offsets = [0, 0, 0], sizes = [16, 16, 128], strides = [1, 1, 1]} : vector<18x18x128xf32> to vector<16x16x128xf32>
    %30 = vector.shape_cast %29 : vector<16x16x128xf32> to vector<256x128xf32>
    %c0_13 = arith.constant 0 : index
    %c0_14 = arith.constant 0 : index
    %31 = vector.load %arg9[%c0_13, %c0_14] : memref<256x128xf32, #tpu.memory_space<vmem>>, vector<256x128xf32>
    %c0_15 = arith.constant 0 : index
    %c0_16 = arith.constant 0 : index
    %c0_17 = arith.constant 0 : index
    %32 = vector.load %arg2[%c0_15, %c0_16, %c0_17] : memref<9x128x128xf32, #tpu.memory_space<vmem>>, vector<1x128x128xf32>
    %33 = vector.shape_cast %32 : vector<1x128x128xf32> to vector<128x128xf32>
    %cst_18 = arith.constant dense<0.000000e+00> : vector<256x128xf32>
    %34 = tpu.matmul %30, %33, %cst_18 {dimension_numbers = #tpu.dot_dimension_numbers<[1], [0], [0], [1], [0, 0, 1, 1], [], []>} : vector<256x128xf32>, vector<128x128xf32>, vector<256x128xf32> -> vector<256x128xf32>
    %35 = arith.addf %31, %34 : vector<256x128xf32>
    %c0_19 = arith.constant 0 : index
    %c0_20 = arith.constant 0 : index
    %36 = vector.load %arg9[%c0_19, %c0_20] : memref<256x128xf32, #tpu.memory_space<vmem>>, vector<256x128xf32>
    tpu.vector_store %arg9[%c0_19, %c0_20], %35 {strides = array<i32>} : memref<256x128xf32, #tpu.memory_space<vmem>>, vector<256x128xf32>,
    %37 = vector.extract_strided_slice %26 {offsets = [0, 1, 0], sizes = [16, 16, 128], strides = [1, 1, 1]} : vector<18x18x128xf32> to vector<16x16x128xf32>
    %38 = vector.shape_cast %37 : vector<16x16x128xf32> to vector<256x128xf32>
    %c0_21 = arith.constant 0 : index
    %c0_22 = arith.constant 0 : index
    %39 = vector.load %arg9[%c0_21, %c0_22] : memref<256x128xf32, #tpu.memory_space<vmem>>, vector<256x128xf32>
    %c1 = arith.constant 1 : index
    %c0_23 = arith.constant 0 : index
    %c0_24 = arith.constant 0 : index
    %40 = vector.load %arg2[%c1, %c0_23, %c0_24] : memref<9x128x128xf32, #tpu.memory_space<vmem>>, vector<1x128x128xf32>
    %41 = vector.shape_cast %40 : vector<1x128x128xf32> to vector<128x128xf32>
    %cst_25 = arith.constant dense<0.000000e+00> : vector<256x128xf32>
    %42 = tpu.matmul %38, %41, %cst_25 {dimension_numbers = #tpu.dot_dimension_numbers<[1], [0], [0], [1], [0, 0, 1, 1], [], []>} : vector<256x128xf32>, vector<128x128xf32>, vector<256x128xf32> -> vector<256x128xf32>
    %43 = arith.addf %39, %42 : vector<256x128xf32>
    %c0_26 = arith.constant 0 : index
    %c0_27 = arith.constant 0 : index
    %44 = vector.load %arg9[%c0_26, %c0_27] : memref<256x128xf32, #tpu.memory_space<vmem>>, vector<256x128xf32>
    tpu.vector_store %arg9[%c0_26, %c0_27], %43 {strides = array<i32>} : memref<256x128xf32, #tpu.memory_space<vmem>>, vector<256x128xf32>,
    %45 = vector.extract_strided_slice %26 {offsets = [0, 2, 0], sizes = [16, 16, 128], strides = [1, 1, 1]} : vector<18x18x128xf32> to vector<16x16x128xf32>
    %46 = vector.shape_cast %45 : vector<16x16x128xf32> to vector<256x128xf32>
    %c0_28 = arith.constant 0 : index
    %c0_29 = arith.constant 0 : index
    %47 = vector.load %arg9[%c0_28, %c0_29] : memref<256x128xf32, #tpu.memory_space<vmem>>, vector<256x128xf32>
    %c2 = arith.constant 2 : index
    %c0_30 = arith.constant 0 : index
    %c0_31 = arith.constant 0 : index
    %48 = vector.load %arg2[%c2, %c0_30, %c0_31] : memref<9x128x128xf32, #tpu.memory_space<vmem>>, vector<1x128x128xf32>
    %49 = vector.shape_cast %48 : vector<1x128x128xf32> to vector<128x128xf32>
    %cst_32 = arith.constant dense<0.000000e+00> : vector<256x128xf32>
    %50 = tpu.matmul %46, %49, %cst_32 {dimension_numbers = #tpu.dot_dimension_numbers<[1], [0], [0], [1], [0, 0, 1, 1], [], []>} : vector<256x128xf32>, vector<128x128xf32>, vector<256x128xf32> -> vector<256x128xf32>
    %51 = arith.addf %47, %50 : vector<256x128xf32>
    %c0_33 = arith.constant 0 : index
    %c0_34 = arith.constant 0 : index
    %52 = vector.load %arg9[%c0_33, %c0_34] : memref<256x128xf32, #tpu.memory_space<vmem>>, vector<256x128xf32>
    tpu.vector_store %arg9[%c0_33, %c0_34], %51 {strides = array<i32>} : memref<256x128xf32, #tpu.memory_space<vmem>>, vector<256x128xf32>,
    %53 = vector.extract_strided_slice %26 {offsets = [1, 0, 0], sizes = [16, 16, 128], strides = [1, 1, 1]} : vector<18x18x128xf32> to vector<16x16x128xf32>
    %54 = vector.shape_cast %53 : vector<16x16x128xf32> to vector<256x128xf32>
    %c0_35 = arith.constant 0 : index
    %c0_36 = arith.constant 0 : index
    %55 = vector.load %arg9[%c0_35, %c0_36] : memref<256x128xf32, #tpu.memory_space<vmem>>, vector<256x128xf32>
    %c3 = arith.constant 3 : index
    %c0_37 = arith.constant 0 : index
    %c0_38 = arith.constant 0 : index
    %56 = vector.load %arg2[%c3, %c0_37, %c0_38] : memref<9x128x128xf32, #tpu.memory_space<vmem>>, vector<1x128x128xf32>
    %57 = vector.shape_cast %56 : vector<1x128x128xf32> to vector<128x128xf32>
    %cst_39 = arith.constant dense<0.000000e+00> : vector<256x128xf32>
    %58 = tpu.matmul %54, %57, %cst_39 {dimension_numbers = #tpu.dot_dimension_numbers<[1], [0], [0], [1], [0, 0, 1, 1], [], []>} : vector<256x128xf32>, vector<128x128xf32>, vector<256x128xf32> -> vector<256x128xf32>
    %59 = arith.addf %55, %58 : vector<256x128xf32>
    %c0_40 = arith.constant 0 : index
    %c0_41 = arith.constant 0 : index
    %60 = vector.load %arg9[%c0_40, %c0_41] : memref<256x128xf32, #tpu.memory_space<vmem>>, vector<256x128xf32>
    tpu.vector_store %arg9[%c0_40, %c0_41], %59 {strides = array<i32>} : memref<256x128xf32, #tpu.memory_space<vmem>>, vector<256x128xf32>,
    %61 = vector.extract_strided_slice %26 {offsets = [1, 1, 0], sizes = [16, 16, 128], strides = [1, 1, 1]} : vector<18x18x128xf32> to vector<16x16x128xf32>
    %62 = vector.shape_cast %61 : vector<16x16x128xf32> to vector<256x128xf32>
    %c0_42 = arith.constant 0 : index
    %c0_43 = arith.constant 0 : index
    %63 = vector.load %arg9[%c0_42, %c0_43] : memref<256x128xf32, #tpu.memory_space<vmem>>, vector<256x128xf32>
    %c4 = arith.constant 4 : index
    %c0_44 = arith.constant 0 : index
    %c0_45 = arith.constant 0 : index
    %64 = vector.load %arg2[%c4, %c0_44, %c0_45] : memref<9x128x128xf32, #tpu.memory_space<vmem>>, vector<1x128x128xf32>
    %65 = vector.shape_cast %64 : vector<1x128x128xf32> to vector<128x128xf32>
    %cst_46 = arith.constant dense<0.000000e+00> : vector<256x128xf32>
    %66 = tpu.matmul %62, %65, %cst_46 {dimension_numbers = #tpu.dot_dimension_numbers<[1], [0], [0], [1], [0, 0, 1, 1], [], []>} : vector<256x128xf32>, vector<128x128xf32>, vector<256x128xf32> -> vector<256x128xf32>
    %67 = arith.addf %63, %66 : vector<256x128xf32>
    %c0_47 = arith.constant 0 : index
    %c0_48 = arith.constant 0 : index
    %68 = vector.load %arg9[%c0_47, %c0_48] : memref<256x128xf32, #tpu.memory_space<vmem>>, vector<256x128xf32>
    tpu.vector_store %arg9[%c0_47, %c0_48], %67 {strides = array<i32>} : memref<256x128xf32, #tpu.memory_space<vmem>>, vector<256x128xf32>,
    %69 = vector.extract_strided_slice %26 {offsets = [1, 2, 0], sizes = [16, 16, 128], strides = [1, 1, 1]} : vector<18x18x128xf32> to vector<16x16x128xf32>
    %70 = vector.shape_cast %69 : vector<16x16x128xf32> to vector<256x128xf32>
    %c0_49 = arith.constant 0 : index
    %c0_50 = arith.constant 0 : index
    %71 = vector.load %arg9[%c0_49, %c0_50] : memref<256x128xf32, #tpu.memory_space<vmem>>, vector<256x128xf32>
    %c5 = arith.constant 5 : index
    %c0_51 = arith.constant 0 : index
    %c0_52 = arith.constant 0 : index
    %72 = vector.load %arg2[%c5, %c0_51, %c0_52] : memref<9x128x128xf32, #tpu.memory_space<vmem>>, vector<1x128x128xf32>
    %73 = vector.shape_cast %72 : vector<1x128x128xf32> to vector<128x128xf32>
    %cst_53 = arith.constant dense<0.000000e+00> : vector<256x128xf32>
    %74 = tpu.matmul %70, %73, %cst_53 {dimension_numbers = #tpu.dot_dimension_numbers<[1], [0], [0], [1], [0, 0, 1, 1], [], []>} : vector<256x128xf32>, vector<128x128xf32>, vector<256x128xf32> -> vector<256x128xf32>
    %75 = arith.addf %71, %74 : vector<256x128xf32>
    %c0_54 = arith.constant 0 : index
    %c0_55 = arith.constant 0 : index
    %76 = vector.load %arg9[%c0_54, %c0_55] : memref<256x128xf32, #tpu.memory_space<vmem>>, vector<256x128xf32>
    tpu.vector_store %arg9[%c0_54, %c0_55], %75 {strides = array<i32>} : memref<256x128xf32, #tpu.memory_space<vmem>>, vector<256x128xf32>,
    %77 = vector.extract_strided_slice %26 {offsets = [2, 0, 0], sizes = [16, 16, 128], strides = [1, 1, 1]} : vector<18x18x128xf32> to vector<16x16x128xf32>
    %78 = vector.shape_cast %77 : vector<16x16x128xf32> to vector<256x128xf32>
    %c0_56 = arith.constant 0 : index
    %c0_57 = arith.constant 0 : index
    %79 = vector.load %arg9[%c0_56, %c0_57] : memref<256x128xf32, #tpu.memory_space<vmem>>, vector<256x128xf32>
    %c6 = arith.constant 6 : index
    %c0_58 = arith.constant 0 : index
    %c0_59 = arith.constant 0 : index
    %80 = vector.load %arg2[%c6, %c0_58, %c0_59] : memref<9x128x128xf32, #tpu.memory_space<vmem>>, vector<1x128x128xf32>
    %81 = vector.shape_cast %80 : vector<1x128x128xf32> to vector<128x128xf32>
    %cst_60 = arith.constant dense<0.000000e+00> : vector<256x128xf32>
    %82 = tpu.matmul %78, %81, %cst_60 {dimension_numbers = #tpu.dot_dimension_numbers<[1], [0], [0], [1], [0, 0, 1, 1], [], []>} : vector<256x128xf32>, vector<128x128xf32>, vector<256x128xf32> -> vector<256x128xf32>
    %83 = arith.addf %79, %82 : vector<256x128xf32>
    %c0_61 = arith.constant 0 : index
    %c0_62 = arith.constant 0 : index
    %84 = vector.load %arg9[%c0_61, %c0_62] : memref<256x128xf32, #tpu.memory_space<vmem>>, vector<256x128xf32>
    tpu.vector_store %arg9[%c0_61, %c0_62], %83 {strides = array<i32>} : memref<256x128xf32, #tpu.memory_space<vmem>>, vector<256x128xf32>,
    %85 = vector.extract_strided_slice %26 {offsets = [2, 1, 0], sizes = [16, 16, 128], strides = [1, 1, 1]} : vector<18x18x128xf32> to vector<16x16x128xf32>
    %86 = vector.shape_cast %85 : vector<16x16x128xf32> to vector<256x128xf32>
    %c0_63 = arith.constant 0 : index
    %c0_64 = arith.constant 0 : index
    %87 = vector.load %arg9[%c0_63, %c0_64] : memref<256x128xf32, #tpu.memory_space<vmem>>, vector<256x128xf32>
    %c7 = arith.constant 7 : index
    %c0_65 = arith.constant 0 : index
    %c0_66 = arith.constant 0 : index
    %88 = vector.load %arg2[%c7, %c0_65, %c0_66] : memref<9x128x128xf32, #tpu.memory_space<vmem>>, vector<1x128x128xf32>
    %89 = vector.shape_cast %88 : vector<1x128x128xf32> to vector<128x128xf32>
    %cst_67 = arith.constant dense<0.000000e+00> : vector<256x128xf32>
    %90 = tpu.matmul %86, %89, %cst_67 {dimension_numbers = #tpu.dot_dimension_numbers<[1], [0], [0], [1], [0, 0, 1, 1], [], []>} : vector<256x128xf32>, vector<128x128xf32>, vector<256x128xf32> -> vector<256x128xf32>
    %91 = arith.addf %87, %90 : vector<256x128xf32>
    %c0_68 = arith.constant 0 : index
    %c0_69 = arith.constant 0 : index
    %92 = vector.load %arg9[%c0_68, %c0_69] : memref<256x128xf32, #tpu.memory_space<vmem>>, vector<256x128xf32>
    tpu.vector_store %arg9[%c0_68, %c0_69], %91 {strides = array<i32>} : memref<256x128xf32, #tpu.memory_space<vmem>>, vector<256x128xf32>,
    %93 = vector.extract_strided_slice %26 {offsets = [2, 2, 0], sizes = [16, 16, 128], strides = [1, 1, 1]} : vector<18x18x128xf32> to vector<16x16x128xf32>
    %94 = vector.shape_cast %93 : vector<16x16x128xf32> to vector<256x128xf32>
    %c0_70 = arith.constant 0 : index
    %c0_71 = arith.constant 0 : index
    %95 = vector.load %arg9[%c0_70, %c0_71] : memref<256x128xf32, #tpu.memory_space<vmem>>, vector<256x128xf32>
    %c8 = arith.constant 8 : index
    %c0_72 = arith.constant 0 : index
    %c0_73 = arith.constant 0 : index
    %96 = vector.load %arg2[%c8, %c0_72, %c0_73] : memref<9x128x128xf32, #tpu.memory_space<vmem>>, vector<1x128x128xf32>
    %97 = vector.shape_cast %96 : vector<1x128x128xf32> to vector<128x128xf32>
    %cst_74 = arith.constant dense<0.000000e+00> : vector<256x128xf32>
    %98 = tpu.matmul %94, %97, %cst_74 {dimension_numbers = #tpu.dot_dimension_numbers<[1], [0], [0], [1], [0, 0, 1, 1], [], []>} : vector<256x128xf32>, vector<128x128xf32>, vector<256x128xf32> -> vector<256x128xf32>
    %99 = arith.addf %95, %98 : vector<256x128xf32>
    %c0_75 = arith.constant 0 : index
    %c0_76 = arith.constant 0 : index
    %100 = vector.load %arg9[%c0_75, %c0_76] : memref<256x128xf32, #tpu.memory_space<vmem>>, vector<256x128xf32>
    tpu.vector_store %arg9[%c0_75, %c0_76], %99 {strides = array<i32>} : memref<256x128xf32, #tpu.memory_space<vmem>>, vector<256x128xf32>,
    %c0_77 = arith.constant 0 : index
    %c0_78 = arith.constant 0 : index
    %101 = vector.load %arg9[%c0_77, %c0_78] : memref<256x128xf32, #tpu.memory_space<vmem>>, vector<256x128xf32>
    %c0_79 = arith.constant 0 : index
    %c0_80 = arith.constant 0 : index
    %102 = vector.load %arg3[%c0_79, %c0_80] : memref<1x128xf32, #tpu.memory_space<vmem>>, vector<1x128xf32>
    %103 = vector.broadcast %102 : vector<1x128xf32> to vector<256x128xf32>
    %104 = arith.addf %101, %103 : vector<256x128xf32>
    %105 = vector.shape_cast %104 : vector<256x128xf32> to vector<1x256x128xf32>
    %c0_81 = arith.constant 0 : index
    %c0_82 = arith.constant 0 : index
    %c0_83 = arith.constant 0 : index
    %106 = vector.load %arg6[%c0_81, %c0_82, %c0_83] : memref<1x256x128xf32, #tpu.memory_space<vmem>>, vector<1x256x128xf32>
    tpu.vector_store %arg6[%c0_81, %c0_82, %c0_83], %105 {strides = array<i32>} : memref<1x256x128xf32, #tpu.memory_space<vmem>>, vector<1x256x128xf32>,
    %c0_i32 = arith.constant 0 : i32
    %107 = arith.cmpi eq, %arg0, %c0_i32 : i32
    %108 = arith.extui %107 : i1 to i32
    %c0_i32_84 = arith.constant 0 : i32
    %109 = arith.cmpi ne, %108, %c0_i32_84 : i32
    scf.if %109 {
      %cst_95 = arith.constant 0.000000e+00 : f32
      %121 = vector.broadcast %cst_95 : f32 to vector<1x128xf32>
      %c0_96 = arith.constant 0 : index
      %c0_97 = arith.constant 0 : index
      %122 = vector.load %arg7[%c0_96, %c0_97] : memref<1x128xf32, #tpu.memory_space<vmem>>, vector<1x128xf32>
      tpu.vector_store %arg7[%c0_96, %c0_97], %121 {strides = array<i32>} : memref<1x128xf32, #tpu.memory_space<vmem>>, vector<1x128xf32>,
      %cst_98 = arith.constant 0.000000e+00 : f32
      %123 = vector.broadcast %cst_98 : f32 to vector<1x128xf32>
      %c0_99 = arith.constant 0 : index
      %c0_100 = arith.constant 0 : index
      %124 = vector.load %arg8[%c0_99, %c0_100] : memref<1x128xf32, #tpu.memory_space<vmem>>, vector<1x128xf32>
      tpu.vector_store %arg8[%c0_99, %c0_100], %123 {strides = array<i32>} : memref<1x128xf32, #tpu.memory_space<vmem>>, vector<1x128xf32>,
    } else {
    }
    %c0_85 = arith.constant 0 : index
    %c0_86 = arith.constant 0 : index
    %110 = vector.load %arg7[%c0_85, %c0_86] : memref<1x128xf32, #tpu.memory_space<vmem>>, vector<1x128xf32>
    %cst_87 = arith.constant dense<0.000000e+00> : vector<128xf32>
    %111 = vector.multi_reduction <add>, %104, %cst_87 [0] : vector<256x128xf32> to vector<128xf32>
    %112 = vector.shape_cast %111 : vector<128xf32> to vector<1x128xf32>
    %113 = arith.addf %110, %112 : vector<1x128xf32>
    %c0_88 = arith.constant 0 : index
    %c0_89 = arith.constant 0 : index
    %114 = vector.load %arg7[%c0_88, %c0_89] : memref<1x128xf32, #tpu.memory_space<vmem>>, vector<1x128xf32>
    tpu.vector_store %arg7[%c0_88, %c0_89], %113 {strides = array<i32>} : memref<1x128xf32, #tpu.memory_space<vmem>>, vector<1x128xf32>,
    %c0_90 = arith.constant 0 : index
    %c0_91 = arith.constant 0 : index
    %115 = vector.load %arg8[%c0_90, %c0_91] : memref<1x128xf32, #tpu.memory_space<vmem>>, vector<1x128xf32>
    %116 = arith.mulf %104, %104 : vector<256x128xf32>
    %cst_92 = arith.constant dense<0.000000e+00> : vector<128xf32>
    %117 = vector.multi_reduction <add>, %116, %cst_92 [0] : vector<256x128xf32> to vector<128xf32>
    %118 = vector.shape_cast %117 : vector<128xf32> to vector<1x128xf32>
    %119 = arith.addf %115, %118 : vector<1x128xf32>
    %c0_93 = arith.constant 0 : index
    %c0_94 = arith.constant 0 : index
    %120 = vector.load %arg8[%c0_93, %c0_94] : memref<1x128xf32, #tpu.memory_space<vmem>>, vector<1x128xf32>
    tpu.vector_store %arg8[%c0_93, %c0_94], %119 {strides = array<i32>} : memref<1x128xf32, #tpu.memory_space<vmem>>, vector<1x128xf32>,
    return
  }
  func.func @transform_0(%arg0: i32) -> (i32, i32, i32, i32) {
    %c0_i32 = arith.constant 0 : i32
    %c0_i32_0 = arith.constant 0 : i32
    %c0_i32_1 = arith.constant 0 : i32
    %c0_i32_2 = arith.constant 0 : i32
    return %arg0, %c0_i32, %c0_i32_0, %c0_i32_1 : i32, i32, i32, i32
  }
  func.func @transform_1(%arg0: i32) -> (i32, i32, i32) {
    %c0_i32 = arith.constant 0 : i32
    %c0_i32_0 = arith.constant 0 : i32
    %c0_i32_1 = arith.constant 0 : i32
    %c0_i32_2 = arith.constant 0 : i32
    return %c0_i32, %c0_i32_0, %c0_i32_1 : i32, i32, i32
  }
  func.func @transform_2(%arg0: i32) -> (i32, i32) {
    %c0_i32 = arith.constant 0 : i32
    %c0_i32_0 = arith.constant 0 : i32
    %c0_i32_1 = arith.constant 0 : i32
    return %c0_i32, %c0_i32_0 : i32, i32
  }
  func.func @transform_3(%arg0: i32) -> (i32, i32) {
    %c0_i32 = arith.constant 0 : i32
    %c0_i32_0 = arith.constant 0 : i32
    %c0_i32_1 = arith.constant 0 : i32
    return %c0_i32, %c0_i32_0 : i32, i32
  }
  func.func @transform_4(%arg0: i32) -> (i32, i32) {
    %c0_i32 = arith.constant 0 : i32
    %c0_i32_0 = arith.constant 0 : i32
    %c0_i32_1 = arith.constant 0 : i32
    return %c0_i32, %c0_i32_0 : i32, i32
  }
  func.func @transform_5(%arg0: i32) -> (i32, i32, i32) {
    %c0_i32 = arith.constant 0 : i32
    %c0_i32_0 = arith.constant 0 : i32
    %c0_i32_1 = arith.constant 0 : i32
    return %arg0, %c0_i32, %c0_i32_0 : i32, i32, i32
  }
  func.func @transform_6(%arg0: i32) -> (i32, i32) {
    %c0_i32 = arith.constant 0 : i32
    %c0_i32_0 = arith.constant 0 : i32
    %c0_i32_1 = arith.constant 0 : i32
    return %c0_i32, %c0_i32_0 : i32, i32
  }
  func.func @transform_7(%arg0: i32) -> (i32, i32) {
    %c0_i32 = arith.constant 0 : i32
    %c0_i32_0 = arith.constant 0 : i32
    %c0_i32_1 = arith.constant 0 : i32
    return %c0_i32, %c0_i32_0 : i32, i32
  }
}

module attributes {stable_mosaic.version = 11 : i64} {
  func.func @_bn_relu_kernel(%arg0: i32, %arg1: memref<1x256x128xf32, #tpu.memory_space<vmem>>, %arg2: memref<1x128xf32, #tpu.memory_space<vmem>>, %arg3: memref<1x128xf32, #tpu.memory_space<vmem>>, %arg4: memref<1x256x128xf32, #tpu.memory_space<vmem>>) attributes {dimension_semantics = [#tpu.dimension_semantics<parallel>], iteration_bounds = array<i64: 2>, scalar_prefetch = 0 : i64, scratch_operands = 0 : i64, tpu.core_type = #tpu.core_type<tc>, window_params = [{transform_indices = @transform_0, window_bounds = array<i64: 1, 256, 128>}, {pipeline_mode = #tpu.pipeline_mode<synchronous>, transform_indices = @transform_1, window_bounds = array<i64: 1, 128>}, {pipeline_mode = #tpu.pipeline_mode<synchronous>, transform_indices = @transform_2, window_bounds = array<i64: 1, 128>}, {transform_indices = @transform_3, window_bounds = array<i64: 1, 256, 128>}]} {
    %c0 = arith.constant 0 : index
    %c0_0 = arith.constant 0 : index
    %0 = vector.load %arg2[%c0, %c0_0] : memref<1x128xf32, #tpu.memory_space<vmem>>, vector<1x128xf32>
    %1 = vector.shape_cast %0 : vector<1x128xf32> to vector<1x1x128xf32>
    %c0_1 = arith.constant 0 : index
    %c0_2 = arith.constant 0 : index
    %2 = vector.load %arg3[%c0_1, %c0_2] : memref<1x128xf32, #tpu.memory_space<vmem>>, vector<1x128xf32>
    %3 = vector.shape_cast %2 : vector<1x128xf32> to vector<1x1x128xf32>
    %c0_3 = arith.constant 0 : index
    %c0_4 = arith.constant 0 : index
    %c0_5 = arith.constant 0 : index
    %4 = vector.load %arg1[%c0_3, %c0_4, %c0_5] : memref<1x256x128xf32, #tpu.memory_space<vmem>>, vector<1x256x128xf32>
    %5 = vector.broadcast %1 : vector<1x1x128xf32> to vector<1x256x128xf32>
    %6 = arith.mulf %4, %5 : vector<1x256x128xf32>
    %7 = vector.broadcast %3 : vector<1x1x128xf32> to vector<1x256x128xf32>
    %8 = arith.addf %6, %7 : vector<1x256x128xf32>
    %cst = arith.constant 0.000000e+00 : f32
    %9 = vector.broadcast %cst : f32 to vector<1x256x128xf32>
    %10 = arith.maximumf %8, %9 : vector<1x256x128xf32>
    %c0_6 = arith.constant 0 : index
    %c0_7 = arith.constant 0 : index
    %c0_8 = arith.constant 0 : index
    %11 = vector.load %arg4[%c0_6, %c0_7, %c0_8] : memref<1x256x128xf32, #tpu.memory_space<vmem>>, vector<1x256x128xf32>
    tpu.vector_store %arg4[%c0_6, %c0_7, %c0_8], %10 {strides = array<i32>} : memref<1x256x128xf32, #tpu.memory_space<vmem>>, vector<1x256x128xf32>,
    return
  }
  func.func @transform_0(%arg0: i32) -> (i32, i32, i32) {
    %c0_i32 = arith.constant 0 : i32
    %c0_i32_0 = arith.constant 0 : i32
    %c0_i32_1 = arith.constant 0 : i32
    return %arg0, %c0_i32, %c0_i32_0 : i32, i32, i32
  }
  func.func @transform_1(%arg0: i32) -> (i32, i32) {
    %c0_i32 = arith.constant 0 : i32
    %c0_i32_0 = arith.constant 0 : i32
    %c0_i32_1 = arith.constant 0 : i32
    return %c0_i32, %c0_i32_0 : i32, i32
  }
  func.func @transform_2(%arg0: i32) -> (i32, i32) {
    %c0_i32 = arith.constant 0 : i32
    %c0_i32_0 = arith.constant 0 : i32
    %c0_i32_1 = arith.constant 0 : i32
    return %c0_i32, %c0_i32_0 : i32, i32
  }
  func.func @transform_3(%arg0: i32) -> (i32, i32, i32) {
    %c0_i32 = arith.constant 0 : i32
    %c0_i32_0 = arith.constant 0 : i32
    %c0_i32_1 = arith.constant 0 : i32
    return %arg0, %c0_i32, %c0_i32_0 : i32, i32, i32
  }
}

</mosaic_0001>

<bundles_post_ra>
// kernel: conv_block_forward.5
= control target key start
LH: loop header
LB: loop body
LE: loop exit
PB: predicated region body
PF: predicated region fallthrough
CT: control target
= control target key end

     0   :  { %s451_s12 = smov 0   ;;  %s610_s0 = inlined_call_operand.vmem [shape: f32[2,256,128], index: 0, kind: input, shape index: {}]   ;;  %s611_s1 = inlined_call_operand.vmem [shape: f32[1,128], index: 1, kind: input, shape index: {}]   ;;  %s612_s2 = inlined_call_operand.vmem [shape: f32[1,128], index: 2, kind: input, shape index: {}]   ;;  %s613_s3 = inlined_call_operand.vmem [shape: f32[2,256,128], index: 3, kind: output, shape index: {}]  }
   0x1 LB: > { %s400_s13 = sadd.s32 4294967295, %s429_s12   ;;  %p404_p0 = scmp.ge.s32.totalorder %s429_s12, 1  ;;  %s429_s12 = sphi %s451_s12, %s13_s12  }
   0x2   : > { %p137_p1 = scmp.lt.s32.totalorder %s429_s12, 3 }
   0x4   : > { %p138_p2 = pnand %p404_p0, %p137_p1 }
   0x5   : > { %p161_p3 = scmp.lt.s32.totalorder (!%p138_p2), %s400_s13, 1  ;;  %v462_v0 = vld [vmem:[%s611_s1] ss:$0 sm:$0xff] (!%p138_p2) }
   0x6   : > { %141 = sbr.rel (%p138_p2) target bundleno = 46 (0x2e), region = 32  ;;  %v472_v1 = vld [vmem:[%s612_s2] ss:$0 sm:$0xff] (!%p138_p2) }
   0xd   : > { %s615_s13 = smov (!%p161_p3, %s400_s13), 1 }
   0xe   : > { %s413_s14 = sshll.u32 %s615_s13, 8 }
   0xf   : > { %s467_s19 = scalar_lea.vmem %s610_s0, %s413_s14  ;;  %s495_s24 = scalar_lea.vmem %s613_s3, %s413_s14 }
  0x10   : > { %v173_v2 = vld [vmem:[%s467_s19] sm:$0xff]  ;;  %v174_v3 = vld [vmem:[%s467_s19 + $0x8] sm:$0xff]  ;;  %v175_v4 = vld [vmem:[%s467_s19 + $0x10] sm:$0xff] }
  0x11   : > { %v211_v5 = vmul.f32 %v462_v0, %v173_v2  ;;  %v212_v6 = vmul.f32 %v462_v0, %v174_v3  ;;  %v213_v7 = vmul.f32 %v462_v0, %v175_v4  ;;  %v176_v8 = vld [vmem:[%s467_s19 + $0x18] sm:$0xff]  ;;  %v177_v9 = vld [vmem:[%s467_s19 + $0x20] sm:$0xff]  ;;  %v178_v10 = vld [vmem:[%s467_s19 + $0x28] sm:$0xff] }
  0x12   : > { %v214_v11 = vmul.f32 %v462_v0, %v176_v8  ;;  %v215_v12 = vmul.f32 %v462_v0, %v177_v9  ;;  %v216_v13 = vmul.f32 %v462_v0, %v178_v10  ;;  %v179_v14 = vld [vmem:[%s467_s19 + $0x30] sm:$0xff]  ;;  %v180_v15 = vld [vmem:[%s467_s19 + $0x38] sm:$0xff]  ;;  %v181_v24 = vld [vmem:[%s467_s19 + $0x40] sm:$0xff] }
  0x13   : > { %v249_v16 = vadd.f32 %v472_v1, %v211_v5  ;;  %v250_v17 = vadd.f32 %v472_v1, %v212_v6  ;;  %v251_v18 = vadd.f32 %v472_v1, %v213_v7  ;;  %v217_v19 = vmul.f32 %v462_v0, %v179_v14  ;;  %v182_v25 = vld [vmem:[%s467_s19 + $0x48] sm:$0xff]  ;;  %v183_v26 = vld [vmem:[%s467_s19 + $0x50] sm:$0xff]  ;;  %v184_v31 = vld [vmem:[%s467_s19 + $0x58] sm:$0xff] }
  0x14   : > { %v252_v20 = vadd.f32 %v472_v1, %v214_v11  ;;  %v253_v21 = vadd.f32 %v472_v1, %v215_v12  ;;  %v254_v22 = vadd.f32 %v472_v1, %v216_v13  ;;  %v218_v23 = vmul.f32 %v462_v0, %v180_v15  ;;  %v185_v32 = vld [vmem:[%s467_s19 + $0x60] sm:$0xff]  ;;  %v186_v33 = vld [vmem:[%s467_s19 + $0x68] sm:$0xff]  ;;  %v187_v38 = vld [vmem:[%s467_s19 + $0x70] sm:$0xff] }
  0x15   : > { %v281_v27 = vmax.f32 %v249_v16, 0.0  ;;  %v282_v28 = vmax.f32 %v250_v17, 0.0  ;;  %v283_v29 = vmax.f32 %v251_v18, 0.0  ;;  %v255_v30 = vadd.f32 %v472_v1, %v217_v19  ;;  %v188_v43 = vld [vmem:[%s467_s19 + $0x78] sm:$0xff]  ;;  %v189_v56 = vld [vmem:[%s467_s19 + $0x80] sm:$0xff]  ;;  %v190_v57 = vld [vmem:[%s467_s19 + $0x88] sm:$0xff] }
  0x16   : > { %v284_v34 = vmax.f32 %v252_v20, 0.0  ;;  %v285_v35 = vmax.f32 %v253_v21, 0.0  ;;  %v286_v36 = vmax.f32 %v254_v22, 0.0  ;;  %v256_v37 = vadd.f32 %v472_v1, %v218_v23  ;;  %v191_v58 = vld [vmem:[%s467_s19 + $0x90] sm:$0xff]  ;;  %v192_v63 = vld [vmem:[%s467_s19 + $0x98] sm:$0xff]  ;;  %v193_v2 = vld [vmem:[%s467_s19 + $0xa0] sm:$0xff] }
  0x17   : > { %313 = vst [vmem:[%s495_s24] sm:$0xff] %v281_v27  ;;  %314 = vst [vmem:[%s495_s24 + $0x8] sm:$0xff] %v282_v28  ;;  %v287_v39 = vmax.f32 %v255_v30, 0.0  ;;  %v219_v40 = vmul.f32 %v462_v0, %v181_v24  ;;  %v220_v41 = vmul.f32 %v462_v0, %v182_v25  ;;  %v221_v42 = vmul.f32 %v462_v0, %v183_v26  ;;  %v194_v3 = vld [vmem:[%s467_s19 + $0xa8] sm:$0xff]  ;;  %v195_v8 = vld [vmem:[%s467_s19 + $0xb0] sm:$0xff] }
  0x18   : > { %315 = vst [vmem:[%s495_s24 + $0x10] sm:$0xff] %v283_v29  ;;  %316 = vst [vmem:[%s495_s24 + $0x18] sm:$0xff] %v284_v34  ;;  %v288_v44 = vmax.f32 %v256_v37, 0.0  ;;  %v222_v45 = vmul.f32 %v462_v0, %v184_v31  ;;  %v223_v46 = vmul.f32 %v462_v0, %v185_v32  ;;  %v224_v47 = vmul.f32 %v462_v0, %v186_v33  ;;  %v196_v13 = vld [vmem:[%s467_s19 + $0xb8] sm:$0xff]  ;;  %v197_v26 = vld [vmem:[%s467_s19 + $0xc0] sm:$0xff] }
  0x19   : > { %317 = vst [vmem:[%s495_s24 + $0x20] sm:$0xff] %v285_v35  ;;  %318 = vst [vmem:[%s495_s24 + $0x28] sm:$0xff] %v286_v36  ;;  %v257_v48 = vadd.f32 %v472_v1, %v219_v40  ;;  %v258_v49 = vadd.f32 %v472_v1, %v220_v41  ;;  %v259_v50 = vadd.f32 %v472_v1, %v221_v42  ;;  %v198_v27 = vld [vmem:[%s467_s19 + $0xc8] sm:$0xff]  ;;  %v199_v28 = vld [vmem:[%s467_s19 + $0xd0] sm:$0xff] }
  0x1a   : > { %319 = vst [vmem:[%s495_s24 + $0x30] sm:$0xff] %v287_v39  ;;  %v225_v51 = vmul.f32 %v462_v0, %v187_v38  ;;  %320 = vst [vmem:[%s495_s24 + $0x38] sm:$0xff] %v288_v44  ;;  %v260_v52 = vadd.f32 %v472_v1, %v222_v45  ;;  %v261_v53 = vadd.f32 %v472_v1, %v223_v46  ;;  %v200_v33 = vld [vmem:[%s467_s19 + $0xd8] sm:$0xff]  ;;  %v201_v34 = vld [vmem:[%s467_s19 + $0xe0] sm:$0xff] }
  0x1b   : > { %v262_v54 = vadd.f32 %v472_v1, %v224_v47  ;;  %v226_v55 = vmul.f32 %v462_v0, %v188_v43  ;;  %v289_v59 = vmax.f32 %v257_v48, 0.0  ;;  %v290_v60 = vmax.f32 %v258_v49, 0.0  ;;  %v202_v35 = vld [vmem:[%s467_s19 + $0xe8] sm:$0xff]  ;;  %v203_v40 = vld [vmem:[%s467_s19 + $0xf0] sm:$0xff]  ;;  %v204_v45 = vld [vmem:[%s467_s19 + $0xf8] sm:$0xff] }
  0x1c   : > { %v291_v61 = vmax.f32 %v259_v50, 0.0  ;;  %v263_v62 = vadd.f32 %v472_v1, %v225_v51  ;;  %v292_v4 = vmax.f32 %v260_v52, 0.0  ;;  %v293_v5 = vmax.f32 %v261_v53, 0.0 }
  0x1d   : > { %v294_v6 = vmax.f32 %v262_v54, 0.0  ;;  %v264_v7 = vadd.f32 %v472_v1, %v226_v55  ;;  %321 = vst [vmem:[%s495_s24 + $0x40] sm:$0xff] %v289_v59  ;;  %322 = vst [vmem:[%s495_s24 + $0x48] sm:$0xff] %v290_v60  ;;  %v227_v10 = vmul.f32 %v462_v0, %v189_v56  ;;  %v228_v11 = vmul.f32 %v462_v0, %v190_v57 }
  0x1e   : > { %323 = vst [vmem:[%s495_s24 + $0x50] sm:$0xff] %v291_v61  ;;  %v295_v9 = vmax.f32 %v263_v62, 0.0  ;;  %v229_v12 = vmul.f32 %v462_v0, %v191_v58  ;;  %324 = vst [vmem:[%s495_s24 + $0x58] sm:$0xff] %v292_v4  ;;  %v230_v15 = vmul.f32 %v462_v0, %v192_v63  ;;  %v231_v16 = vmul.f32 %v462_v0, %v193_v2 }
  0x1f   : > { %325 = vst [vmem:[%s495_s24 + $0x60] sm:$0xff] %v293_v5  ;;  %326 = vst [vmem:[%s495_s24 + $0x68] sm:$0xff] %v294_v6  ;;  %v296_v14 = vmax.f32 %v264_v7, 0.0  ;;  %v232_v17 = vmul.f32 %v462_v0, %v194_v3  ;;  %v265_v18 = vadd.f32 %v472_v1, %v227_v10  ;;  %v266_v19 = vadd.f32 %v472_v1, %v228_v11 }
  0x20   : > { %327 = vst [vmem:[%s495_s24 + $0x70] sm:$0xff] %v295_v9  ;;  %v267_v20 = vadd.f32 %v472_v1, %v229_v12  ;;  %v233_v21 = vmul.f32 %v462_v0, %v195_v8  ;;  %v268_v22 = vadd.f32 %v472_v1, %v230_v15  ;;  %v269_v23 = vadd.f32 %v472_v1, %v231_v16 }
  0x21   : > { %328 = vst [vmem:[%s495_s24 + $0x78] sm:$0xff] %v296_v14  ;;  %v270_v24 = vadd.f32 %v472_v1, %v232_v17  ;;  %v234_v25 = vmul.f32 %v462_v0, %v196_v13  ;;  %v297_v29 = vmax.f32 %v265_v18, 0.0  ;;  %v298_v30 = vmax.f32 %v266_v19, 0.0 }
  0x22   : > { %v299_v31 = vmax.f32 %v267_v20, 0.0  ;;  %v271_v32 = vadd.f32 %v472_v1, %v233_v21  ;;  %v300_v36 = vmax.f32 %v268_v22, 0.0  ;;  %v301_v37 = vmax.f32 %v269_v23, 0.0 }
  0x23   : > { %v302_v38 = vmax.f32 %v270_v24, 0.0  ;;  %v272_v39 = vadd.f32 %v472_v1, %v234_v25  ;;  %329 = vst [vmem:[%s495_s24 + $0x80] sm:$0xff] %v297_v29  ;;  %330 = vst [vmem:[%s495_s24 + $0x88] sm:$0xff] %v298_v30  ;;  %v235_v42 = vmul.f32 %v462_v0, %v197_v26  ;;  %v236_v43 = vmul.f32 %v462_v0, %v198_v27 }
  0x24   : > { %331 = vst [vmem:[%s495_s24 + $0x90] sm:$0xff] %v299_v31  ;;  %v303_v41 = vmax.f32 %v271_v32, 0.0  ;;  %v237_v44 = vmul.f32 %v462_v0, %v199_v28  ;;  %332 = vst [vmem:[%s495_s24 + $0x98] sm:$0xff] %v300_v36  ;;  %v238_v47 = vmul.f32 %v462_v0, %v200_v33  ;;  %v239_v48 = vmul.f32 %v462_v0, %v201_v34 }
  0x25   : > { %333 = vst [vmem:[%s495_s24 + $0xa0] sm:$0xff] %v301_v37  ;;  %334 = vst [vmem:[%s495_s24 + $0xa8] sm:$0xff] %v302_v38  ;;  %v304_v46 = vmax.f32 %v272_v39, 0.0  ;;  %v240_v49 = vmul.f32 %v462_v0, %v202_v35  ;;  %v273_v50 = vadd.f32 %v472_v1, %v235_v42  ;;  %v274_v51 = vadd.f32 %v472_v1, %v236_v43 }
  0x26   : > { %335 = vst [vmem:[%s495_s24 + $0xb0] sm:$0xff] %v303_v41  ;;  %v275_v52 = vadd.f32 %v472_v1, %v237_v44  ;;  %v241_v53 = vmul.f32 %v462_v0, %v203_v40  ;;  %v276_v54 = vadd.f32 %v472_v1, %v238_v47  ;;  %v277_v55 = vadd.f32 %v472_v1, %v239_v48 }
  0x27   : > { %336 = vst [vmem:[%s495_s24 + $0xb8] sm:$0xff] %v304_v46  ;;  %v278_v56 = vadd.f32 %v472_v1, %v240_v49  ;;  %v242_v57 = vmul.f32 %v462_v0, %v204_v45  ;;  %v305_v58 = vmax.f32 %v273_v50, 0.0  ;;  %v306_v59 = vmax.f32 %v274_v51, 0.0 }
  0x28   : > { %v307_v60 = vmax.f32 %v275_v52, 0.0  ;;  %v279_v61 = vadd.f32 %v472_v1, %v241_v53  ;;  %v308_v62 = vmax.f32 %v276_v54, 0.0  ;;  %v309_v63 = vmax.f32 %v277_v55, 0.0 }
  0x29   : > { %v310_v2 = vmax.f32 %v278_v56, 0.0  ;;  %v280_v3 = vadd.f32 %v472_v1, %v242_v57  ;;  %337 = vst [vmem:[%s495_s24 + $0xc0] sm:$0xff] %v305_v58  ;;  %338 = vst [vmem:[%s495_s24 + $0xc8] sm:$0xff] %v306_v59 }
  0x2a   : > { %339 = vst [vmem:[%s495_s24 + $0xd0] sm:$0xff] %v307_v60  ;;  %v311_v4 = vmax.f32 %v279_v61, 0.0  ;;  %340 = vst [vmem:[%s495_s24 + $0xd8] sm:$0xff] %v308_v62 }
  0x2b   : > { %341 = vst [vmem:[%s495_s24 + $0xe0] sm:$0xff] %v309_v63  ;;  %342 = vst [vmem:[%s495_s24 + $0xe8] sm:$0xff] %v310_v2  ;;  %v312_v0 = vmax.f32 %v280_v3, 0.0 }
  0x2c   : > { %343 = vst [vmem:[%s495_s24 + $0xf0] sm:$0xff] %v311_v4 }
  0x2d   : > { %344 = vst [vmem:[%s495_s24 + $0xf8] sm:$0xff] %v312_v0 }
  0x2e PF: > { %s13_s12 = sadd.s32 1, %s429_s12  }
  0x2f   : > { %p10_p4 = scmp.ge.s32.totalorder %s13_s12, 4  }
  0x31   :  { %12 = sbr.rel (!%p10_p4) target bundleno = 1 (0x1), region = 62 }

// kernel: conv_block_forward.3
= control target key start
LH: loop header
LB: loop body
LE: loop exit
PB: predicated region body
PF: predicated region fallthrough
CT: control target
= control target key end

     0   :  { %s5932_s24 = smov 0   ;;  %s7500_s0 = inlined_call_operand.vmem [shape: f32[2,18,18,128], index: 0, kind: input, shape index: {}]   ;;  %s7501_s1 = inlined_call_operand.vmem [shape: f32[9,128,128], index: 1, kind: input, shape index: {}]   ;;  %s7502_s2 = inlined_call_operand.vmem [shape: f32[1,128], index: 2, kind: input, shape index: {}]   ;;  %s7503_s3 = inlined_call_operand.vmem [shape: f32[1,128], index: 3, kind: input, shape index: {}]   ;;  %s7504_s4 = inlined_call_operand.vmem [shape: f32[1,128], index: 4, kind: input, shape index: {}]   ;;  %s7505_s5 = inlined_call_operand.vmem [shape: f32[2,256,128], index: 5, kind: output, shape index: {0}]   ;;  %s7506_s6 = inlined_call_operand.vmem [shape: f32[1,128], index: 6, kind: output, shape index: {1}]   ;;  %s7507_s7 = inlined_call_operand.vmem [shape: f32[1,128], index: 7, kind: output, shape index: {2}]  }
   0x1 LB: > { %s5938_s3 = sadd.s32 4294967295, %s5889_s24   ;;  %p4001_p0 = scmp.ge.s32.totalorder %s5889_s24, 1  ;;  %s5889_s24 = sphi %s5932_s24, %s18_s24  }
   0x2   : > { %p232_p1 = scmp.lt.s32.totalorder %s5889_s24, 3 }
   0x4   : > { %p233_p2 = pnand %p4001_p0, %p232_p1 }
   0x6   : > { %236 = sbr.rel (%p233_p2) target bundleno = 630 (0x276), region = 40 }
   0xd   : > { %v392_v0 = vld [vmem:[%s7501_s1] sm:$0xff]  ;;  %v393_v1 = vld [vmem:[%s7501_s1 + $0x8] sm:$0xff]  ;;  %p264_p3 = scmp.lt.s32.totalorder %s5938_s3, 1  ;;  %v394_v5 = vld [vmem:[%s7501_s1 + $0x10] sm:$0xff]  ;;  %vm745_vm0 = vcmask 1046528   ;;  %vm1196_vm1 = vcmask 1045504  }
   0xe   : > { %v4053_v2 = vld [vmem:[%s7501_s1 + $0x200] sm:$0xff]  ;;  %v5290_v3 = vpack.c.bf16 %v393_v1, %v392_v0  ;;  %v4054_v4 = vld [vmem:[%s7501_s1 + $0x208] sm:$0xff]  ;;  %v395_v6 = vld [vmem:[%s7501_s1 + $0x18] sm:$0xff]  ;;  %p4134_p4 = scmp.ne.s32.totalorder %s5938_s3, 0 }
   0xf   : > { %v5961_v7 = vpack.c.bf16 %v4054_v4, %v4053_v2  ;;  %v5294_v8 = vpack.c.bf16 %v395_v6, %v394_v5  ;;  %v4055_v9 = vld [vmem:[%s7501_s1 + $0x210] sm:$0xff]  ;;  %v4056_v10 = vld [vmem:[%s7501_s1 + $0x218] sm:$0xff]  ;;  %v396_v11 = vld [vmem:[%s7501_s1 + $0x20] sm:$0xff]  ;;  %s5973_s19 = scalar_select %p264_p3, %s5938_s3, 1 }
  0x10   : > { %5291 = vmatprep.subr.bf16.mxu1 %v5290_v3  ;;  %v5975_v12 = vpack.c.bf16 %v4056_v10, %v4055_v9  ;;  %v397_v13 = vld [vmem:[%s7501_s1 + $0x28] sm:$0xff]  ;;  %v4057_v14 = vld [vmem:[%s7501_s1 + $0x220] sm:$0xff]  ;;  %v398_v18 = vld [vmem:[%s7501_s1 + $0x30] sm:$0xff] }
  0x11   : > { %7583 = vst [vmem:[#allocation3_spill] sm:$0xff] %v5961_v7  ;;  %v4058_v15 = vld [vmem:[%s7501_s1 + $0x228] sm:$0xff]  ;;  %5419 = vmatprep.subr.bf16.mxu0 %v5961_v7  ;;  %5293 = vmatpush3.bf16.msra.mxu1 %v5290_v3  ;;  %s5850_s26 = smul.u32 432, %s5973_s19  ;;  %v5298_v16 = vpack.c.bf16 %v397_v13, %v396_v11  ;;  %v399_v19 = vld [vmem:[%s7501_s1 + $0x38] sm:$0xff]  ;;  %v4059_v20 = vld [vmem:[%s7501_s1 + $0x230] sm:$0xff] }
  0x12   : > { %7584 = vst [vmem:[#allocation4_spill] sm:$0xff] %v5975_v12  ;;  %5421 = vmatpush3.bf16.msra.mxu0 %v5961_v7  ;;  %5295 = vmatprep.subr.bf16.mxu1 %v5294_v8  ;;  %v5990_v17 = vpack.c.bf16 %v4058_v15, %v4057_v14  ;;  %v4060_v21 = vld [vmem:[%s7501_s1 + $0x238] sm:$0xff]  ;;  %v5302_v22 = vpack.c.bf16 %v399_v19, %v398_v18  ;;  %v400_v23 = vld [vmem:[%s7501_s1 + $0x40] sm:$0xff]  ;;  %v401_v25 = vld [vmem:[%s7501_s1 + $0x48] sm:$0xff] }
  0x13   : > { %5423 = vmatprep.subr.bf16.mxu0 %v5975_v12  ;;  %s6007_s14 = scalar_lea.vmem %s7500_s0, %s5850_s26  ;;  %v6014_v24 = vpack.c.bf16 %v4060_v21, %v4059_v20  ;;  %v4061_v26 = vld [vmem:[%s7501_s1 + $0x240] sm:$0xff]  ;;  %v4062_v28 = vld [vmem:[%s7501_s1 + $0x248] sm:$0xff]  ;;  %v5306_v33 = vpack.c.bf16 %v401_v25, %v400_v23  ;;  %v402_v35 = vld [vmem:[%s7501_s1 + $0x50] sm:$0xff] }
  0x14   : > { %7585 = vst [vmem:[#allocation5_spill] sm:$0xff] %v5990_v17  ;;  %v6023_v27 = vld [vmem:[%s6007_s14] sm:$0xff]  ;;  %v6030_v29 = vld [vmem:[%s6007_s14 + $0x18] sm:$0xff]  ;;  %v6039_v34 = vpack.c.bf16 %v4062_v28, %v4061_v26  ;;  %v4063_v38 = vld [vmem:[%s7501_s1 + $0x250] sm:$0xff] }
  0x15   : > { %5297 = vmatpush3.bf16.msra.mxu1 %v5294_v8  ;;  %7586 = vst [vmem:[#allocation6_spill] sm:$0xff] %v6014_v24  ;;  %4602 = vmatprep.mubr.f32.mxu1 %v6023_v27  ;;  %v6033_v30 = vld [vmem:[%s6007_s14 + $0x20] sm:$0xff]  ;;  %v751_v31 = vrot.slane %v6030_v29, 1  ;;  %v403_v36 = vld [vmem:[%s7501_s1 + $0x58] sm:$0xff]  ;;  %v405_v43 = vld [vmem:[%s7501_s1 + $0x68] sm:$0xff] }
  0x16   : > { %5425 = vmatpush3.bf16.msra.mxu0 %v5975_v12  ;;  %5299 = vmatprep.subr.bf16.mxu1 %v5298_v16  ;;  %v752_v32 = vrot.slane %v6033_v30, 1  ;;  %7587 = vst [vmem:[#allocation7_spill] sm:$0xff] %v6039_v34  ;;  %v4064_v39 = vld [vmem:[%s7501_s1 + $0x258] sm:$0xff]  ;;  %v5310_v40 = vpack.c.bf16 %v403_v36, %v402_v35  ;;  %v404_v42 = vld [vmem:[%s7501_s1 + $0x60] sm:$0xff]  ;;  %v4066_v45 = vld [vmem:[%s7501_s1 + $0x268] sm:$0xff] }
  0x17   : > { %5427 = vmatprep.subr.bf16.mxu0 %v5990_v17  ;;  %v6061_v41 = vpack.c.bf16 %v4064_v39, %v4063_v38  ;;  %v4065_v44 = vld [vmem:[%s7501_s1 + $0x260] sm:$0xff]  ;;  %v5314_v46 = vpack.c.bf16 %v405_v43, %v404_v42  ;;  %v406_v48 = vld [vmem:[%s7501_s1 + $0x70] sm:$0xff]  ;;  %v407_v49 = vld [vmem:[%s7501_s1 + $0x78] sm:$0xff] }
  0x18   : > { %v6050_v37 = vsel %vm745_vm0, %v751_v31, %v752_v32  ;;  %v6077_v47 = vpack.c.bf16 %v4066_v45, %v4065_v44  ;;  %v4067_v50 = vld [vmem:[%s7501_s1 + $0x270] sm:$0xff]  ;;  %v4068_v51 = vld [vmem:[%s7501_s1 + $0x278] sm:$0xff]  ;;  %v5318_v52 = vpack.c.bf16 %v407_v49, %v406_v48  ;;  %v4005_v54 = vld [vmem:[%s7501_s1 + $0x80] sm:$0xff] }
  0x19   : > { %5301 = vmatpush3.bf16.msra.mxu1 %v5298_v16  ;;  %4922 = vmatprep.mubr.f32.mxu0 %v6050_v37  ;;  %7588 = vst [vmem:[#allocation8_spill] sm:$0xff] %v6061_v41  ;;  %v6093_v53 = vpack.c.bf16 %v4068_v51, %v4067_v50  ;;  %v4006_v55 = vld [vmem:[%s7501_s1 + $0x88] sm:$0xff]  ;;  %v4069_v57 = vld [vmem:[%s7501_s1 + $0x280] sm:$0xff]  ;;  %v6111_v59 = vld [vmem:[%s6007_s14 + $0x30] sm:$0xff] }
  0x1a   : > { %5429 = vmatpush3.bf16.msra.mxu0 %v5990_v17  ;;  %5303 = vmatprep.subr.bf16.mxu1 %v5302_v22  ;;  %7589 = vst [vmem:[#allocation9_spill] sm:$0xff] %v6077_v47  ;;  %v6102_v56 = vld [vmem:[%s6007_s14 + $0x28] sm:$0x3]  ;;  %v6114_v60 = vld [vmem:[%s6007_s14 + $0x38] sm:$0xff]  ;;  %v5322_v61 = vpack.c.bf16 %v4006_v55, %v4005_v54  ;;  %v6120_v0 = vld [vmem:[%s6007_s14 + $0x40] sm:$0x3] }
  0x1b   : > { %5431 = vmatprep.subr.bf16.mxu0 %v6014_v24  ;;  %7590 = vst [vmem:[#allocation10_spill] sm:$0xff] %v6093_v53  ;;  %v4070_v58 = vld [vmem:[%s7501_s1 + $0x288] sm:$0xff]  ;;  %v754_v62 = vrot.slane %v6102_v56, 1  ;;  %v4071_v1 = vld [vmem:[%s7501_s1 + $0x290] sm:$0xff]  ;;  %v756_v2 = vrot.slane %v6111_v59, 1  ;;  %v757_v3 = vrot.slane %v6114_v60, 1 }
  0x1c   : > { %v5450_v63 = vpack.c.bf16 %v4070_v58, %v4069_v57  ;;  %v4072_v4 = vld [vmem:[%s7501_s1 + $0x298] sm:$0xff]  ;;  %v6131_v5 = vld [vmem:[%s6007_s14 + $0x48] sm:$0xff]  ;;  %v6134_v6 = vld [vmem:[%s6007_s14 + $0x50] sm:$0xff]  ;;  %v759_v13 = vrot.slane %v6120_v0, 1 }
  0x1d   : > { %5305 = vmatpush3.bf16.msra.mxu1 %v5302_v22  ;;  %v6137_v8 = vld [vmem:[%s6007_s14 + $0x8] sm:$0xff]  ;;  %v4007_v9 = vld [vmem:[%s7501_s1 + $0x90] sm:$0xff]  ;;  %v4008_v10 = vld [vmem:[%s7501_s1 + $0x98] sm:$0xff]  ;;  %v6149_v11 = vsel %vm745_vm0, %v752_v32, %v754_v62  ;;  %v5454_v14 = vpack.c.bf16 %v4072_v4, %v4071_v1  ;;  %v761_v15 = vrot.slane %v6131_v5, 1  ;;  %v762_v16 = vrot.slane %v6134_v6, 1 }
  0x1e   : > { %5433 = vmatpush3.bf16.msra.mxu0 %v6014_v24  ;;  %5307 = vmatprep.subr.bf16.mxu1 %v5306_v33  ;;  %v6155_v18 = vld [vmem:[%s6007_s14 + $0x58] sm:$0x3]  ;;  %v4073_v19 = vld [vmem:[%s7501_s1 + $0x2a0] sm:$0xff]  ;;  %v6162_v20 = vsel %vm745_vm0, %v756_v2, %v757_v3  ;;  %v5326_v21 = vpack.c.bf16 %v4008_v10, %v4007_v9  ;;  %v4074_v22 = vld [vmem:[%s7501_s1 + $0x2a8] sm:$0xff]  ;;  %v6182_v31 = vsel %vm745_vm0, %v757_v3, %v759_v13  ;;  %v1207_v24 = vrot.slane %v6111_v59, 2 }
  0x1f   : > { %5435 = vmatprep.subr.bf16.mxu0 %v6039_v34  ;;  %v6168_v23 = vld [vmem:[%s6007_s14 + $0x60] sm:$0xff]  ;;  %v6171_v25 = vld [vmem:[%s6007_s14 + $0x68] sm:$0xff]  ;;  %v764_v32 = vrot.slane %v6155_v18, 1  ;;  %v5458_v35 = vpack.c.bf16 %v4074_v22, %v4073_v19  ;;  %v6192_v39 = vld [vmem:[%s6007_s14 + $0x70] sm:$0x3] }
  0x20   : > { %v4009_v26 = vld [vmem:[%s7501_s1 + $0xa0] sm:$0xff]  ;;  %v4010_v28 = vld [vmem:[%s7501_s1 + $0xa8] sm:$0xff]  ;;  %v766_v36 = vrot.slane %v6168_v23, 1  ;;  %v767_v38 = vrot.slane %v6171_v25, 1  ;;  %v4076_v42 = vld [vmem:[%s7501_s1 + $0x2b8] sm:$0xff]  ;;  %v769_v50 = vrot.slane %v6192_v39, 1 }
  0x21   : > { %5309 = vmatpush3.bf16.msra.mxu1 %v5306_v33  ;;  %v6187_v33 = vsel %vm745_vm0, %v761_v15, %v762_v16  ;;  %v6202_v43 = vld [vmem:[%s6007_s14 + $0x78] sm:$0xff]  ;;  %v6205_v44 = vld [vmem:[%s6007_s14 + $0x80] sm:$0xff]  ;;  %v5330_v45 = vpack.c.bf16 %v4010_v28, %v4009_v26  ;;  %v6217_v49 = vsel %vm745_vm0, %v762_v16, %v764_v32  ;;  %v6226_v57 = vld [vmem:[%s6007_s14 + $0x88] sm:$0x3] }
  0x22   : > { %5437 = vmatpush3.bf16.msra.mxu0 %v6039_v34  ;;  %5311 = vmatprep.subr.bf16.mxu1 %v5310_v40  ;;  %v4012_v48 = vld [vmem:[%s7501_s1 + $0xb8] sm:$0xff]  ;;  %7591 = vst [vmem:[#allocation11_spill] sm:$0xff] %v6217_v49  ;;  %v6221_v51 = vsel %vm745_vm0, %v766_v36, %v767_v38  ;;  %v771_v54 = vrot.slane %v6202_v43, 1  ;;  %v772_v55 = vrot.slane %v6205_v44, 1  ;;  %v4077_v58 = vld [vmem:[%s7501_s1 + $0x2c0] sm:$0xff]  ;;  %v6236_v62 = vld [vmem:[%s6007_s14 + $0x90] sm:$0xff]  ;;  %v6251_v4 = vsel %vm745_vm0, %v767_v38, %v769_v50 }
  0x23   : > { %5439 = vmatprep.subr.bf16.mxu0 %v6061_v41  ;;  %7592 = vst [vmem:[#allocation12_spill] sm:$0xff] %v6221_v51  ;;  %v4013_v2 = vld [vmem:[%s7501_s1 + $0xc0] sm:$0xff]  ;;  %v4014_v3 = vld [vmem:[%s7501_s1 + $0xc8] sm:$0xff]  ;;  %7593 = vst [vmem:[#allocation13_spill] sm:$0xff] %v6251_v4  ;;  %v774_v9 = vrot.slane %v6226_v57, 1  ;;  %v1222_v12 = vrot.slane %v6202_v43, 2 }
  0x24   : > { %v6255_v10 = vsel %vm745_vm0, %v771_v54, %v772_v55  ;;  %v6260_v16 = vld [vmem:[%s6007_s14 + $0xa0] sm:$0x3]  ;;  %v4079_v19 = vld [vmem:[%s7501_s1 + $0x2d0] sm:$0xff]  ;;  %v6270_v22 = vld [vmem:[%s6007_s14 + $0xa8] sm:$0xff]  ;;  %v5338_v28 = vpack.c.bf16 %v4014_v3, %v4013_v2  ;;  %v1223_v7 = vrot.slane %v6205_v44, 2 }
  0x25   : > { %5313 = vmatpush3.bf16.msra.mxu1 %v5310_v40  ;;  %v4075_v40 = vld [vmem:[%s7501_s1 + $0x2b0] sm:$0xff]  ;;  %v6285_v36 = vsel %vm745_vm0, %v772_v55, %v774_v9  ;;  %v779_v38 = vrot.slane %v6260_v16, 1  ;;  %v4081_v50 = vld [vmem:[%s7501_s1 + $0x2e0] sm:$0xff]  ;;  %v6307_v55 = vld [vmem:[%s6007_s14 + $0xc8] sm:$0xff] }
  0x26   : > { %5441 = vmatpush3.bf16.msra.mxu0 %v6061_v41  ;;  %5315 = vmatprep.subr.bf16.mxu1 %v5314_v46  ;;  %v6273_v26 = vld [vmem:[%s6007_s14 + $0xb0] sm:$0xff]  ;;  %v6304_v54 = vld [vmem:[%s6007_s14 + $0xc0] sm:$0xff]  ;;  %7596 = vst [vmem:[#allocation16_spill] sm:$0xff] %v6307_v55  ;;  %v1203_v41 = vrot.slane %v6033_v30, 2 }
  0x27   : > { %5443 = vmatprep.subr.bf16.mxu0 %v6077_v47  ;;  %7594 = vst [vmem:[#allocation14_spill] sm:$0xff] %v6273_v26  ;;  %v4015_v32 = vld [vmem:[%s7501_s1 + $0xd0] sm:$0xff]  ;;  %7595 = vst [vmem:[#allocation15_spill] sm:$0xff] %v6304_v54 }
  0x29   : > { %5317 = vmatpush3.bf16.msra.mxu1 %v5314_v46  ;;  %v4011_v46 = vld [vmem:[%s7501_s1 + $0xb0] sm:$0xff] }
  0x2a   : > { %5445 = vmatpush3.bf16.msra.mxu0 %v6077_v47  ;;  %5319 = vmatprep.subr.bf16.mxu1 %v5318_v52  ;;  %v5334_v1 = vpack.c.bf16 %v4012_v48, %v4011_v46  ;;  %v782_v46 = vrot.slane %v6273_v26, 1  ;;  %v6294_v48 = vld [vmem:[%s6007_s14 + $0xb8] sm:$0x3]  ;;  %v1202_v47 = vrot.slane %v6030_v29, 2 }
  0x2b   : > { %5447 = vmatprep.subr.bf16.mxu0 %v6093_v53  ;;  %v784_v3 = vrot.slane %v6294_v48, 1 }
  0x2d   : > { %5321 = vmatpush3.bf16.msra.mxu1 %v5318_v52  ;;  %v5462_v52 = vpack.c.bf16 %v4076_v42, %v4075_v40 }
  0x2e   : > { %5449 = vmatpush3.bf16.msra.mxu0 %v6093_v53  ;;  %5323 = vmatprep.subr.bf16.mxu1 %v5322_v61 }
  0x2f   : > { %5451 = vmatprep.subr.bf16.mxu0 %v5450_v63 }
  0x30   : > { %4603 = vmatmul.mubr.f32.vlgmr.msra.gmra.mrb[0].mxu1 %v6137_v8 }
  0x31   : > { %4923 = vmatmul.mubr.f32.vlgmr.msra.gmra.mrb[0].mxu0 %v6149_v11  ;;  %5325 = vmatpush3.bf16.msra.mxu1 %v5322_v61  ;;  %v4078_v61 = vld [vmem:[%s7501_s1 + $0x2c8] sm:$0xff] }
  0x32   : > { %5453 = vmatpush3.bf16.msra.mxu0 %v5450_v63  ;;  %4605 = vmatprep.mubr.f32.mxu1 %v6030_v29  ;;  %v6239_v63 = vld [vmem:[%s6007_s14 + $0x98] sm:$0xff]  ;;  %v5466_v13 = vpack.c.bf16 %v4078_v61, %v4077_v58  ;;  %v4017_v61 = vld [vmem:[%s7501_s1 + $0xe0] sm:$0xff]  ;;  %v6367_v29 = vld [vmem:[%s6007_s14 + $0x10] sm:$0x3] }
  0x33   : > { %4925 = vmatprep.mubr.f32.mxu0 %v6162_v20  ;;  %5455 = vmatprep.subr.bf16.mxu0 %v5454_v14  ;;  %v777_v15 = vrot.slane %v6239_v63, 1 }
  0x34   : > { %4606 = vmatmul.mubr.f32.gmra.mrb[2].mxu1 %v6033_v30  ;;  %5327 = vmatprep.subr.bf16.mxu1 %v5326_v21  ;;  %v4021_v30 = vld [vmem:[%s7501_s1 + $0x100] sm:$0xff] }
  0x35   : > { %4926 = vmatmul.mubr.f32.gmra.mrb[2].mxu0 %v6182_v31  ;;  %4608 = vmatprep.mubr.f32.mxu1 %v6111_v59  ;;  %v6319_v2 = vsel %vm745_vm0, %v777_v15, %v779_v38  ;;  %v4020_v38 = vld [vmem:[%s7501_s1 + $0xf8] sm:$0xff] }
  0x36   : > { %5457 = vmatpush3.bf16.msra.mxu0 %v5454_v14  ;;  %4928 = vmatprep.mubr.f32.mxu0 %v6187_v33  ;;  %v776_v14 = vrot.slane %v6236_v62, 1 }
  0x37   : > { %5459 = vmatprep.subr.bf16.mxu0 %v5458_v35  ;;  %5329 = vmatpush3.bf16.msra.mxu1 %v5326_v21  ;;  %v4080_v21 = vld [vmem:[%s7501_s1 + $0x2d8] sm:$0xff] }
  0x38   : > { %4609 = vmatmul.mubr.f32.gmra.mrb[4].mxu1 %v6114_v60  ;;  %5331 = vmatprep.subr.bf16.mxu1 %v5330_v45  ;;  %v6289_v40 = vsel %vm745_vm0, %v776_v14, %v777_v15  ;;  %v5470_v42 = vpack.c.bf16 %v4080_v21, %v4079_v19  ;;  %v786_v19 = vrot.slane %v6304_v54, 1  ;;  %v787_v21 = vrot.slane %v6307_v55, 1  ;;  %v4084_v15 = vld [vmem:[%s7501_s1 + $0x2f8] sm:$0xff] }
  0x39   : > { %4929 = vmatmul.mubr.f32.gmra.mrb[4].mxu0 %v6217_v49  ;;  %4611 = vmatprep.mubr.f32.mxu1 %v6131_v5 }
  0x3a   : > { %5461 = vmatpush3.bf16.msra.mxu0 %v5458_v35  ;;  %4931 = vmatprep.mubr.f32.mxu0 %v6221_v51  ;;  %v4016_v35 = vld [vmem:[%s7501_s1 + $0xd8] sm:$0xff] }
  0x3b   : > { %5463 = vmatprep.subr.bf16.mxu0 %v5462_v52  ;;  %5333 = vmatpush3.bf16.msra.mxu1 %v5330_v45  ;;  %v781_v45 = vrot.slane %v6270_v22, 1  ;;  %v5342_v58 = vpack.c.bf16 %v4016_v35, %v4015_v32  ;;  %v6328_v32 = vld [vmem:[%s6007_s14 + $0xd0] sm:$0x3] }
  0x3c   : > { %4612 = vmatmul.mubr.f32.gmra.mrb[6].mxu1 %v6134_v6  ;;  %5335 = vmatprep.subr.bf16.mxu1 %v5334_v1 }
  0x3d   : > { %4932 = vmatmul.mubr.f32.gmra.mrb[6].mxu0 %v6251_v4  ;;  %4614 = vmatprep.mubr.f32.mxu1 %v6168_v23  ;;  %v6323_v9 = vsel %vm745_vm0, %v781_v45, %v782_v46  ;;  %v1197_v45 = vrot.slane %v6023_v27, 2 }
  0x3e   : > { %5465 = vmatpush3.bf16.msra.mxu0 %v5462_v52  ;;  %4934 = vmatprep.mubr.f32.mxu0 %v6255_v10  ;;  %v4082_v52 = vld [vmem:[%s7501_s1 + $0x2e8] sm:$0xff] }
  0x3f   : > { %5467 = vmatprep.subr.bf16.mxu0 %v5466_v13  ;;  %5337 = vmatpush3.bf16.msra.mxu1 %v5334_v1  ;;  %v4018_v1 = vld [vmem:[%s7501_s1 + $0xe8] sm:$0xff]  ;;  %v5474_v14 = vpack.c.bf16 %v4082_v52, %v4081_v50  ;;  %v1198_v50 = vrot.slane %v6137_v8, 2  ;;  %v6349_v52 = vsel %vm745_vm0, %v782_v46, %v784_v3 }
  0x40   : > { %4615 = vmatmul.mubr.f32.gmra.mrb[8].mxu1 %v6171_v25  ;;  %5339 = vmatprep.subr.bf16.mxu1 %v5338_v28  ;;  %v5346_v35 = vpack.c.bf16 %v4018_v1, %v4017_v61  ;;  %v789_v61 = vrot.slane %v6328_v32, 1  ;;  %v6353_v1 = vsel %vm745_vm0, %v786_v19, %v787_v21  ;;  %v4086_v46 = vld [vmem:[%s7501_s1 + $0x308] sm:$0xff]  ;;  %v1205_v19 = vrot.slane %v6102_v56, 2 }
  0x41   : > { %4935 = vmatmul.mubr.f32.gmra.mrb[8].mxu0 %v6285_v36  ;;  %4617 = vmatprep.mubr.f32.mxu1 %v6202_v43  ;;  %v1208_v56 = vrot.slane %v6114_v60, 2 }
  0x42   : > { %5469 = vmatpush3.bf16.msra.mxu0 %v5466_v13  ;;  %4937 = vmatprep.mubr.f32.mxu0 %v6289_v40  ;;  %v4083_v13 = vld [vmem:[%s7501_s1 + $0x2f0] sm:$0xff] }
  0x43   : > { %5471 = vmatprep.subr.bf16.mxu0 %v5470_v42  ;;  %5341 = vmatpush3.bf16.msra.mxu1 %v5338_v28  ;;  %v4019_v28 = vld [vmem:[%s7501_s1 + $0xf0] sm:$0xff]  ;;  %v5478_v53 = vpack.c.bf16 %v4084_v15, %v4083_v13  ;;  %v6378_v13 = vsel %vm745_vm0, %v787_v21, %v789_v61  ;;  %v6381_v15 = vsel %vm1196_vm1, %v1197_v45, %v1198_v50  ;;  %v4088_v21 = vld [vmem:[%s7501_s1 + $0x318] sm:$0xff] }
  0x44   : > { %4618 = vmatmul.mubr.f32.gmra.mrb[10].mxu1 %v6205_v44  ;;  %5343 = vmatprep.subr.bf16.mxu1 %v5342_v58  ;;  %v5350_v3 = vpack.c.bf16 %v4020_v38, %v4019_v28  ;;  %7597 = vst [vmem:[#allocation17_spill] sm:$0xff] %v6381_v15  ;;  %v1200_v28 = vrot.slane %v6367_v29, 2  ;;  %v6385_v38 = vsel %vm1196_vm1, %v1202_v47, %v1203_v41  ;;  %v6408_v61 = vld [vmem:[%s6007_s14 + $0xd8] sm:$0xff]  ;;  %v6570_v15 = vld [vmem:[%s6007_s14 + $0xe8] sm:$0x3] }
  0x45   : > { %4938 = vmatmul.mubr.f32.gmra.mrb[10].mxu0 %v6319_v2  ;;  %4620 = vmatprep.mubr.f32.mxu1 %v6236_v62  ;;  %7598 = vst [vmem:[#allocation18_spill] sm:$0xff] %v6385_v38 }
  0x46   : > { %5473 = vmatpush3.bf16.msra.mxu0 %v5470_v42  ;;  %4940 = vmatprep.mubr.f32.mxu0 %v6323_v9  ;;  %v4085_v42 = vld [vmem:[%s7501_s1 + $0x300] sm:$0xff]  ;;  %v6399_v45 = vsel %vm1196_vm1, %v1198_v50, %v1200_v28  ;;  %v6412_v50 = vsel %vm1196_vm1, %v1207_v24, %v1208_v56 }
  0x47   : > { %5475 = vmatprep.subr.bf16.mxu0 %v5474_v14  ;;  %5345 = vmatpush3.bf16.msra.mxu1 %v5342_v58  ;;  %v4022_v58 = vld [vmem:[%s7501_s1 + $0x108] sm:$0xff]  ;;  %v5482_v34 = vpack.c.bf16 %v4086_v46, %v4085_v42  ;;  %7599 = vst [vmem:[#allocation19_spill] sm:$0xff] %v6399_v45  ;;  %v1210_v42 = vrot.slane %v6120_v0, 2  ;;  %7601 = vst [vmem:[#allocation21_spill] sm:$0xff] %v6412_v50  ;;  %v1212_v46 = vrot.slane %v6131_v5, 2  ;;  %v6427_v24 = vld [vmem:[%s6007_s14 + $0xe0] sm:$0xff] }
  0x48   : > { %4621 = vmatmul.mubr.f32.gmra.mrb[12].mxu1 %v6239_v63  ;;  %5347 = vmatprep.subr.bf16.mxu1 %v5346_v35  ;;  %v6396_v47 = vpack.c.bf16 %v4022_v58, %v4021_v30  ;;  %v1213_v30 = vrot.slane %v6134_v6, 2  ;;  %v4090_v0 = vld [vmem:[%s7501_s1 + $0x328] sm:$0xff]  ;;  %v6434_v58 = vld [vmem:[%s6007_s14 + $0xf0] sm:$0xff]  ;;  %v1242_v45 = vrot.slane %v6408_v61, 2 }
  0x49   : > { %4941 = vmatmul.mubr.f32.gmra.mrb[12].mxu0 %v6349_v52  ;;  %4623 = vmatprep.mubr.f32.mxu1 %v6270_v22 }
  0x4a   : > { %5477 = vmatpush3.bf16.msra.mxu0 %v5474_v14  ;;  %4943 = vmatprep.mubr.f32.mxu0 %v6353_v1  ;;  %v4087_v14 = vld [vmem:[%s7501_s1 + $0x310] sm:$0xff]  ;;  %v6438_v28 = vsel %vm1196_vm1, %v1212_v46, %v1213_v30  ;;  %v6459_v46 = vld [vmem:[%s6007_s14 + $0x108] sm:$0xff] }
  0x4b   : > { %5479 = vmatprep.subr.bf16.mxu0 %v5478_v53  ;;  %5349 = vmatpush3.bf16.msra.mxu1 %v5346_v35  ;;  %v6405_v35 = vsel %vm1196_vm1, %v1203_v41, %v1205_v19  ;;  %v4089_v41 = vld [vmem:[%s7501_s1 + $0x320] sm:$0xff]  ;;  %v1215_v19 = vrot.slane %v6155_v18, 2  ;;  %7603 = vst [vmem:[#allocation23_spill] sm:$0xff] %v6438_v28  ;;  %v6452_v18 = vld [vmem:[%s6007_s14 + $0xf8] sm:$0xff] }
  0x4c   : > { %4624 = vmatmul.mubr.f32.gmra.mrb[14].mxu1 %v6273_v26  ;;  %5351 = vmatprep.subr.bf16.mxu1 %v5350_v3  ;;  %7600 = vst [vmem:[#allocation20_spill] sm:$0xff] %v6405_v35  ;;  %v5490_v17 = vpack.c.bf16 %v4090_v0, %v4089_v41  ;;  %v1220_v41 = vrot.slane %v6192_v39, 2  ;;  %v6477_v39 = vld [vmem:[%s6007_s14 + $0x110] sm:$0xff] }
  0x4d   : > { %4944 = vmatmul.mubr.f32.gmra.mrb[14].mxu0 %v6378_v13  ;;  %4626 = vmatprep.mubr.f32.mxu1 %v6304_v54 }
  0x4e   : > { %5481 = vmatpush3.bf16.msra.mxu0 %v5478_v53  ;;  %5002 = vmatprep.mubr.f32.mxu0 %v6385_v38  ;;  %v5486_v53 = vpack.c.bf16 %v4088_v21, %v4087_v14  ;;  %v1217_v14 = vrot.slane %v6168_v23, 2  ;;  %v1218_v21 = vrot.slane %v6171_v25, 2 }
  0x4f   : > { %5483 = vmatprep.subr.bf16.mxu0 %v5482_v34  ;;  %5353 = vmatpush3.bf16.msra.mxu1 %v5350_v3  ;;  %v6431_v3 = vsel %vm1196_vm1, %v1208_v56, %v1210_v42  ;;  %v4092_v56 = vld [vmem:[%s7501_s1 + $0x338] sm:$0xff]  ;;  %v6456_v42 = vsel %vm1196_vm1, %v1213_v30, %v1215_v19  ;;  %v4093_v30 = vld [vmem:[%s7501_s1 + $0x340] sm:$0xff] }
  0x50   : > { %4627 = vmatmul.mubr.f32.gmra.mrb[16].mxu1 %v6307_v55  ;;  %5355 = vmatprep.subr.bf16.mxu1 %v6396_v47  ;;  %7602 = vst [vmem:[#allocation22_spill] sm:$0xff] %v6431_v3  ;;  %7604 = vst [vmem:[#allocation24_spill] sm:$0xff] %v6456_v42  ;;  %v6463_v0 = vsel %vm1196_vm1, %v1217_v14, %v1218_v21  ;;  %v6481_v19 = vsel %vm1196_vm1, %v1218_v21, %v1220_v41  ;;  %v6484_v14 = vld [vmem:[%s6007_s14 + $0x120] sm:$0xff]  ;;  %v4095_v21 = vld [vmem:[%s7501_s1 + $0x350] sm:$0xff] }
  0x51   : > { %5003 = vmatmul.mubr.f32.vlgmr.msra.gmra.mrb[0].mxu0 %v6405_v35  ;;  %4629 = vmatprep.mubr.f32.mxu1 %v6408_v61  ;;  %7605 = vst [vmem:[#allocation25_spill] sm:$0xff] %v6463_v0  ;;  %7606 = vst [vmem:[#allocation26_spill] sm:$0xff] %v6481_v19  ;;  %v6509_v41 = vld [vmem:[%s6007_s14 + $0x138] sm:$0xff] }
  0x52   : > { %5485 = vmatpush3.bf16.msra.mxu0 %v5482_v34  ;;  %5005 = vmatprep.mubr.f32.mxu0 %v6412_v50  ;;  %v4091_v34 = vld [vmem:[%s7501_s1 + $0x330] sm:$0xff] }
  0x53   : > { %5487 = vmatprep.subr.bf16.mxu0 %v5486_v53 }
  0x54   : > { %4630 = vmatmul.mubr.f32.gmra.mrb[18].mxu1 %v6427_v24 }
  0x55   : > { %5006 = vmatmul.mubr.f32.gmra.mrb[2].mxu0 %v6431_v3  ;;  %4632 = vmatprep.mubr.f32.mxu1 %v6434_v58  ;;  %v5494_v3 = vpack.c.bf16 %v4092_v56, %v4091_v34  ;;  %v1225_v34 = vrot.slane %v6226_v57, 2  ;;  %v6488_v56 = vsel %vm1196_vm1, %v1222_v12, %v1223_v7  ;;  %v4096_v57 = vld [vmem:[%s7501_s1 + $0x358] sm:$0xff]  ;;  %v6502_v12 = vld [vmem:[%s6007_s14 + $0x128] sm:$0xff] }
  0x56   : > { %5008 = vmatprep.mubr.f32.mxu0 %v6438_v28  ;;  %5489 = vmatpush3.bf16.msra.mxu0 %v5486_v53  ;;  %v4094_v53 = vld [vmem:[%s7501_s1 + $0x348] sm:$0xff]  ;;  %7607 = vst [vmem:[#allocation27_spill] sm:$0xff] %v6488_v56  ;;  %v1228_v28 = vrot.slane %v6239_v63, 2  ;;  %v5502_v35 = vpack.c.bf16 %v4096_v57, %v4095_v21  ;;  %v1235_v21 = vrot.slane %v6294_v48, 2  ;;  %v4100_v48 = vld [vmem:[%s7501_s1 + $0x378] sm:$0xff] }
  0x57   : > { %5491 = vmatprep.subr.bf16.mxu0 %v5490_v17  ;;  %v5498_v50 = vpack.c.bf16 %v4094_v53, %v4093_v30  ;;  %v1230_v30 = vrot.slane %v6260_v16, 2  ;;  %v4098_v16 = vld [vmem:[%s7501_s1 + $0x368] sm:$0xff] }
  0x58   : > { %4633 = vmatmul.mubr.f32.gmra.mrb[20].mxu1 %v6452_v18 }
  0x59   : > { %5009 = vmatmul.mubr.f32.gmra.mrb[4].mxu0 %v6456_v42  ;;  %4635 = vmatprep.mubr.f32.mxu1 %v6459_v46  ;;  %v1227_v42 = vrot.slane %v6236_v62, 2 }
  0x5a   : > { %5011 = vmatprep.mubr.f32.mxu0 %v6463_v0  ;;  %5493 = vmatpush3.bf16.msra.mxu0 %v5490_v17  ;;  %v6506_v17 = vsel %vm1196_vm1, %v1223_v7, %v1225_v34  ;;  %v1233_v0 = vrot.slane %v6273_v26, 2  ;;  %v4097_v7 = vld [vmem:[%s7501_s1 + $0x360] sm:$0xff]  ;;  %v6534_v34 = vld [vmem:[%s6007_s14 + $0x150] sm:$0xff] }
  0x5b   : > { %5495 = vmatprep.subr.bf16.mxu0 %v5494_v3  ;;  %7608 = vst [vmem:[#allocation28_spill] sm:$0xff] %v6506_v17  ;;  %v6513_v53 = vsel %vm1196_vm1, %v1227_v42, %v1228_v28  ;;  %v6531_v42 = vsel %vm1196_vm1, %v1228_v28, %v1230_v30  ;;  %v5506_v38 = vpack.c.bf16 %v4098_v16, %v4097_v7  ;;  %v4099_v28 = vld [vmem:[%s7501_s1 + $0x370] sm:$0xff]  ;;  %v747_v30 = vrot.slane %v6137_v8, 1  ;;  %v6561_v16 = vld [vmem:[%s6007_s14 + $0x168] sm:$0xff] }
  0x5c   : > { %4636 = vmatmul.mubr.f32.gmra.mrb[22].mxu1 %v6477_v39  ;;  %7609 = vst [vmem:[#allocation29_spill] sm:$0xff] %v6513_v53  ;;  %7610 = vst [vmem:[#allocation30_spill] sm:$0xff] %v6531_v42  ;;  %v6558_v7 = vsel %vm1196_vm1, %v1233_v0, %v1235_v21  ;;  %v5510_v8 = vpack.c.bf16 %v4100_v48, %v4099_v28  ;;  %v1245_v48 = vrot.slane %v6570_v15, 2 }
  0x5d   : > { %5012 = vmatmul.mubr.f32.gmra.mrb[6].mxu0 %v6481_v19  ;;  %4638 = vmatprep.mubr.f32.mxu1 %v6484_v14  ;;  %v1232_v19 = vrot.slane %v6270_v22, 2  ;;  %7612 = vst [vmem:[#allocation32_spill] sm:$0xff] %v6558_v7 }
  0x5e   : > { %5014 = vmatprep.mubr.f32.mxu0 %v6488_v56  ;;  %5497 = vmatpush3.bf16.msra.mxu0 %v5494_v3  ;;  %v6527_v3 = vld [vmem:[%s6007_s14 + $0x140] sm:$0xff]  ;;  %v1238_v56 = vrot.slane %v6307_v55, 2  ;;  %v1248_v55 = vrot.slane %v6452_v18, 2 }
  0x5f   : > { %5499 = vmatprep.subr.bf16.mxu0 %v5498_v50  ;;  %v6538_v57 = vsel %vm1196_vm1, %v1232_v19, %v1233_v0  ;;  %v746_v19 = vrot.slane %v6023_v27, 1  ;;  %v1243_v27 = vrot.slane %v6427_v24, 2  ;;  %v4101_v0 = vld [vmem:[%s7501_s1 + $0x380] sm:$0xff] }
  0x60   : > { %4639 = vmatmul.mubr.f32.gmra.mrb[24].mxu1 %v6502_v12  ;;  %7611 = vst [vmem:[#allocation31_spill] sm:$0xff] %v6538_v57 }
  0x61   : > { %5015 = vmatmul.mubr.f32.gmra.mrb[8].mxu0 %v6506_v17  ;;  %4641 = vmatprep.mubr.f32.mxu1 %v6509_v41  ;;  %v1237_v17 = vrot.slane %v6304_v54, 2  ;;  %v748_v28 = vsel %vm745_vm0, %v746_v19, %v747_v30  ;;  %v6597_v54 = vld [vmem:[%s6007_s14 + $0x100] sm:$0x3] }
  0x62   : > { %5017 = vmatprep.mubr.f32.mxu0 %v6513_v53  ;;  %5501 = vmatpush3.bf16.msra.mxu0 %v5498_v50  ;;  %v6552_v50 = vld [vmem:[%s6007_s14 + $0x158] sm:$0xff]  ;;  %v1240_v53 = vrot.slane %v6328_v32, 2  ;;  %v4102_v32 = vld [vmem:[%s7501_s1 + $0x388] sm:$0xff]  ;;  %v1250_v19 = vrot.slane %v6597_v54, 2 }
  0x63   : > { %5503 = vmatprep.subr.bf16.mxu0 %v5502_v35 }
  0x64   : > { %4642 = vmatmul.mubr.f32.gmra.mrb[26].mxu1 %v6527_v3  ;;  %v6587_v21 = vsel %vm1196_vm1, %v1238_v56, %v1240_v53  ;;  %v6612_v53 = vsel %vm1196_vm1, %v1243_v27, %v1245_v48  ;;  %v1257_v48 = vrot.slane %v6484_v14, 2 }
  0x65   : > { %5018 = vmatmul.mubr.f32.gmra.mrb[10].mxu0 %v6531_v42  ;;  %4644 = vmatprep.mubr.f32.mxu1 %v6534_v34  ;;  %v6565_v42 = vsel %vm1196_vm1, %v1237_v17, %v1238_v56  ;;  %v749_v17 = vrot.slane %v6367_v29, 1  ;;  %v6599_v29 = vpack.c.bf16 %v4102_v32, %v4101_v0  ;;  %v4023_v56 = vld [vmem:[%s7501_s1 + $0x110] sm:$0xff]  ;;  %7614 = vst [vmem:[#allocation34_spill] sm:$0xff] %v6612_v53  ;;  %v1252_v32 = vrot.slane %v6459_v46, 2 }
  0x66   : > { %5020 = vmatprep.mubr.f32.mxu0 %v6538_v57  ;;  %5505 = vmatpush3.bf16.msra.mxu0 %v5502_v35  ;;  %7613 = vst [vmem:[#allocation33_spill] sm:$0xff] %v6565_v42  ;;  %v6582_v35 = vld [vmem:[%s6007_s14 + $0x170] sm:$0xff]  ;;  %v6592_v57 = vsel %vm1196_vm1, %v1242_v45, %v1243_v27  ;;  %v6635_v27 = vsel %vm1196_vm1, %v1248_v55, %v1250_v19 }
  0x67   : > { %5507 = vmatprep.subr.bf16.mxu0 %v5506_v38  ;;  %v750_v45 = vsel %vm745_vm0, %v747_v30, %v749_v17  ;;  %v4025_v30 = vld [vmem:[%s7501_s1 + $0x120] sm:$0xff]  ;;  %7616 = vst [vmem:[#allocation36_spill] sm:$0xff] %v6635_v27 }
  0x68   : > { %4645 = vmatmul.mubr.f32.gmra.mrb[28].mxu1 %v6552_v50 }
  0x69   : > { %5021 = vmatmul.mubr.f32.gmra.mrb[12].mxu0 %v6558_v7  ;;  %4647 = vmatprep.mubr.f32.mxu1 %v6561_v16  ;;  %v1247_v7 = vrot.slane %v6434_v58, 2 }
  0x6a   : > { %5023 = vmatprep.mubr.f32.mxu0 %v6565_v42  ;;  %5509 = vmatpush3.bf16.msra.mxu0 %v5506_v38  ;;  %v4024_v38 = vld [vmem:[%s7501_s1 + $0x118] sm:$0xff]  ;;  %v1253_v42 = vrot.slane %v6477_v39, 2 }
  0x6b   : > { %5511 = vmatprep.subr.bf16.mxu0 %v5510_v8  ;;  %v6616_v0 = vsel %vm1196_vm1, %v1247_v7, %v1248_v55  ;;  %v5358_v26 = vpack.c.bf16 %v4024_v38, %v4023_v56  ;;  %v4026_v7 = vld [vmem:[%s7501_s1 + $0x128] sm:$0xff]  ;;  %v1258_v56 = vrot.slane %v6502_v12, 2  ;;  %v6644_v38 = vld [vmem:[%s6007_s14 + $0x130] sm:$0x3]  ;;  %v4028_v55 = vld [vmem:[%s7501_s1 + $0x138] sm:$0xff] }
  0x6c   : > { %4648 = vmatmul.mubr.f32.gmra.mrb[30].mxu1 %v6582_v35  ;;  %7615 = vst [vmem:[#allocation35_spill] sm:$0xff] %v6616_v0  ;;  %v6639_v17 = vsel %vm1196_vm1, %v1252_v32, %v1253_v42  ;;  %v1262_v32 = vrot.slane %v6509_v41, 2 }
  0x6d   : > { %5024 = vmatmul.mubr.f32.gmra.mrb[14].mxu0 %v6587_v21  ;;  %4682 = vmatprep.mubr.f32.mxu1 %v748_v28  ;;  %v6621_v28 = vld [vmem:[%s6007_s14 + $0x118] sm:$0x3]  ;;  %7617 = vst [vmem:[#allocation37_spill] sm:$0xff] %v6639_v17  ;;  %v6661_v19 = vsel %vm1196_vm1, %v1257_v48, %v1258_v56 }
  0x6e   : > { %5026 = vmatprep.mubr.f32.mxu0 %v6592_v57  ;;  %5513 = vmatpush3.bf16.msra.mxu0 %v5510_v8  ;;  %v1255_v8 = vrot.slane %v6621_v28, 2  ;;  %7619 = vst [vmem:[#allocation39_spill] sm:$0xff] %v6661_v19 }
  0x6f   : > { %5515 = vmatprep.subr.bf16.mxu0 %v6599_v29 }
  0x70   : > { %4683 = vmatmul.mubr.f32.vlgmr.msra.gmra.mrb[0].mxu1 %v750_v45  ;;  %v6657_v45 = vsel %vm1196_vm1, %v1253_v42, %v1255_v8  ;;  %v4030_v42 = vld [vmem:[%s7501_s1 + $0x148] sm:$0xff] }
  0x71   : > { %5027 = vmatmul.mubr.f32.gmra.mrb[16].mxu0 %v6612_v53  ;;  %5357 = vmatpush3.bf16.msra.mxu1 %v6396_v47  ;;  %v5362_v47 = vpack.c.bf16 %v4026_v7, %v4025_v30  ;;  %7618 = vst [vmem:[#allocation38_spill] sm:$0xff] %v6657_v45  ;;  %v1263_v30 = vrot.slane %v6527_v3, 2  ;;  %v6666_v7 = vld [vmem:[%s6007_s14 + $0x148] sm:$0x3]  ;;  %v6738_v53 = vld [vmem:[%s6007_s14 + $0x190] sm:$0x3] }
  0x72   : > { %4685 = vmatprep.mubr.f32.mxu1 %v6050_v37  ;;  %5029 = vmatprep.mubr.f32.mxu0 %v6616_v0  ;;  %v4027_v37 = vld [vmem:[%s7501_s1 + $0x130] sm:$0xff]  ;;  %v1265_v48 = vrot.slane %v6666_v7, 2  ;;  %v6688_v0 = vld [vmem:[%s6007_s14 + $0x160] sm:$0x3] }
  0x73   : > { %5359 = vmatprep.subr.bf16.mxu1 %v5358_v26 }
  0x74   : > { %4686 = vmatmul.mubr.f32.gmra.mrb[2].mxu1 %v6149_v11  ;;  %v1260_v11 = vrot.slane %v6644_v38, 2 }
  0x75   : > { %5030 = vmatmul.mubr.f32.gmra.mrb[18].mxu0 %v6635_v27  ;;  %4688 = vmatprep.mubr.f32.mxu1 %v6162_v20  ;;  %v5366_v27 = vpack.c.bf16 %v4028_v55, %v4027_v37  ;;  %v6683_v37 = vsel %vm1196_vm1, %v1262_v32, %v1263_v30  ;;  %v1267_v55 = vrot.slane %v6534_v34, 2  ;;  %v1270_v32 = vrot.slane %v6688_v0, 2 }
  0x76   : > { %5032 = vmatprep.mubr.f32.mxu0 %v6639_v17  ;;  %5361 = vmatpush3.bf16.msra.mxu1 %v5358_v26  ;;  %v4029_v26 = vld [vmem:[%s7501_s1 + $0x140] sm:$0xff]  ;;  %v6679_v8 = vsel %vm1196_vm1, %v1258_v56, %v1260_v11  ;;  %7621 = vst [vmem:[#allocation41_spill] sm:$0xff] %v6683_v37  ;;  %v1268_v17 = vrot.slane %v6552_v50, 2  ;;  %v4031_v56 = vld [vmem:[%s7501_s1 + $0x150] sm:$0xff]  ;;  %v6701_v11 = vsel %vm1196_vm1, %v1263_v30, %v1265_v48  ;;  %v6717_v30 = vld [vmem:[%s6007_s14 + $0x188] sm:$0xff] }
  0x77   : > { %5363 = vmatprep.subr.bf16.mxu1 %v5362_v47  ;;  %7620 = vst [vmem:[#allocation40_spill] sm:$0xff] %v6679_v8  ;;  %7622 = vst [vmem:[#allocation42_spill] sm:$0xff] %v6701_v11  ;;  %v4034_v48 = vld [vmem:[%s7501_s1 + $0x168] sm:$0xff] }
  0x78   : > { %4689 = vmatmul.mubr.f32.gmra.mrb[4].mxu1 %v6182_v31 }
  0x79   : > { %5033 = vmatmul.mubr.f32.gmra.mrb[20].mxu0 %v6657_v45  ;;  %4691 = vmatprep.mubr.f32.mxu1 %v6187_v33  ;;  %v5370_v45 = vpack.c.bf16 %v4030_v42, %v4029_v26  ;;  %v6705_v26 = vsel %vm1196_vm1, %v1267_v55, %v1268_v17  ;;  %v1272_v42 = vrot.slane %v6561_v16, 2  ;;  %v6729_v55 = vsel %vm1196_vm1, %v1268_v17, %v1270_v32  ;;  %v4035_v17 = vld [vmem:[%s7501_s1 + $0x170] sm:$0xff] }
  0x7a   : > { %5035 = vmatprep.mubr.f32.mxu0 %v6661_v19  ;;  %5365 = vmatpush3.bf16.msra.mxu1 %v5362_v47  ;;  %v4032_v47 = vld [vmem:[%s7501_s1 + $0x158] sm:$0xff]  ;;  %v1273_v19 = vrot.slane %v6582_v35, 2  ;;  %7623 = vst [vmem:[#allocation43_spill] sm:$0xff] %v6729_v55 }
  0x7b   : > { %5367 = vmatprep.subr.bf16.mxu1 %v5366_v27 }
  0x7c   : > { %4692 = vmatmul.mubr.f32.gmra.mrb[6].mxu1 %v6217_v49  ;;  %v6710_v49 = vld [vmem:[%s6007_s14 + $0x178] sm:$0x3] }
  0x7d   : > { %5036 = vmatmul.mubr.f32.gmra.mrb[22].mxu0 %v6679_v8  ;;  %4694 = vmatprep.mubr.f32.mxu1 %v6221_v51  ;;  %v6713_v8 = vld [vmem:[%s6007_s14 + $0x180] sm:$0xff]  ;;  %v2334_v51 = vrot.slane %v6717_v30, 2 }
  0x7e   : > { %5038 = vmatprep.mubr.f32.mxu0 %v6683_v37  ;;  %5369 = vmatpush3.bf16.msra.mxu1 %v5366_v27  ;;  %v5374_v37 = vpack.c.bf16 %v4032_v47, %v4031_v56  ;;  %v4033_v27 = vld [vmem:[%s7501_s1 + $0x160] sm:$0xff]  ;;  %v1275_v56 = vrot.slane %v6710_v49, 2  ;;  %v6733_v47 = vsel %vm1196_vm1, %v1272_v42, %v1273_v19  ;;  %v2336_v42 = vrot.slane %v6738_v53, 2 }
  0x7f   : > { %5371 = vmatprep.subr.bf16.mxu1 %v5370_v45  ;;  %7624 = vst [vmem:[#allocation44_spill] sm:$0xff] %v6733_v47 }
  0x80   : > { %4695 = vmatmul.mubr.f32.gmra.mrb[8].mxu1 %v6251_v4  ;;  %v2333_v4 = vrot.slane %v6713_v8, 2  ;;  %v6751_v32 = vsel %vm1196_vm1, %v1273_v19, %v1275_v56  ;;  %v791_v19 = vrot.slane %v6408_v61, 1 }
  0x81   : > { %5039 = vmatmul.mubr.f32.gmra.mrb[24].mxu0 %v6701_v11  ;;  %4697 = vmatprep.mubr.f32.mxu1 %v6255_v10  ;;  %v5378_v11 = vpack.c.bf16 %v4034_v48, %v4033_v27 }
  0x82   : > { %5041 = vmatprep.mubr.f32.mxu0 %v6705_v26  ;;  %5373 = vmatpush3.bf16.msra.mxu1 %v5370_v45  ;;  %v4036_v45 = vld [vmem:[%s7501_s1 + $0x178] sm:$0xff]  ;;  %v6755_v27 = vsel %vm1196_vm1, %v2333_v4, %v2334_v51  ;;  %v6768_v4 = vsel %vm1196_vm1, %v2334_v51, %v2336_v42  ;;  %v794_v51 = vrot.slane %v6570_v15, 1 }
  0x83   : > { %5375 = vmatprep.subr.bf16.mxu1 %v5374_v37  ;;  %7625 = vst [vmem:[#allocation45_spill] sm:$0xff] %v6755_v27  ;;  %v5382_v48 = vpack.c.bf16 %v4036_v45, %v4035_v17  ;;  %7626 = vst [vmem:[#allocation46_spill] sm:$0xff] %v6768_v4  ;;  %v4103_v17 = vld [vmem:[%s7501_s1 + $0x390] sm:$0xff]  ;;  %v4104_v45 = vld [vmem:[%s7501_s1 + $0x398] sm:$0xff] }
  0x84   : > { %4698 = vmatmul.mubr.f32.gmra.mrb[10].mxu1 %v6285_v36  ;;  %v5518_v42 = vpack.c.bf16 %v4104_v45, %v4103_v17  ;;  %v801_v17 = vrot.slane %v6459_v46, 1  ;;  %v802_v45 = vrot.slane %v6477_v39, 1 }
  0x85   : > { %5042 = vmatmul.mubr.f32.gmra.mrb[26].mxu0 %v6729_v55  ;;  %4700 = vmatprep.mubr.f32.mxu1 %v6289_v40  ;;  %v4037_v55 = vld [vmem:[%s7501_s1 + $0x180] sm:$0xff] }
  0x86   : > { %5044 = vmatprep.mubr.f32.mxu0 %v6733_v47  ;;  %5377 = vmatpush3.bf16.msra.mxu1 %v5374_v37  ;;  %v4038_v47 = vld [vmem:[%s7501_s1 + $0x188] sm:$0xff]  ;;  %v792_v37 = vrot.slane %v6427_v24, 1 }
  0x87   : > { %5379 = vmatprep.subr.bf16.mxu1 %v5378_v11  ;;  %v6772_v56 = vpack.c.bf16 %v4038_v47, %v4037_v55  ;;  %v796_v55 = vrot.slane %v6434_v58, 1  ;;  %v797_v47 = vrot.slane %v6452_v18, 1 }
  0x88   : > { %4701 = vmatmul.mubr.f32.gmra.mrb[12].mxu1 %v6319_v2  ;;  %v6801_v15 = vsel %vm745_vm0, %v792_v37, %v794_v51  ;;  %v806_v51 = vrot.slane %v6484_v14, 1 }
  0x89   : > { %5045 = vmatmul.mubr.f32.gmra.mrb[28].mxu0 %v6751_v32  ;;  %4703 = vmatprep.mubr.f32.mxu1 %v6323_v9 }
  0x8a   : > { %5047 = vmatprep.mubr.f32.mxu0 %v6755_v27  ;;  %5381 = vmatpush3.bf16.msra.mxu1 %v5378_v11  ;;  %v6786_v11 = vsel %vm745_vm0, %v791_v19, %v792_v37  ;;  %v6807_v19 = vsel %vm745_vm0, %v796_v55, %v797_v47  ;;  %v4107_v37 = vld [vmem:[%s7501_s1 + $0x3b0] sm:$0xff]  ;;  %v807_v55 = vrot.slane %v6502_v12, 1  ;;  %v7652_v27 = vld [vmem:[#allocation12_spill] sm:$0xff] }
  0x8b   : > { %5383 = vmatprep.subr.bf16.mxu1 %v5382_v48 }
  0x8c   : > { %4704 = vmatmul.mubr.f32.gmra.mrb[14].mxu1 %v6349_v52 }
  0x8d   : > { %5048 = vmatmul.mubr.f32.gmra.mrb[30].mxu0 %v6768_v4  ;;  %4706 = vmatprep.mubr.f32.mxu1 %v6353_v1  ;;  %v4105_v4 = vld [vmem:[%s7501_s1 + $0x3a0] sm:$0xff] }
  0x8e   : > { %5082 = vmatprep.mubr.f32.mxu0 %v6111_v59  ;;  %5385 = vmatpush3.bf16.msra.mxu1 %v5382_v48  ;;  %v4106_v59 = vld [vmem:[%s7501_s1 + $0x3a8] sm:$0xff]  ;;  %v799_v48 = vrot.slane %v6597_v54, 1  ;;  %v4108_v54 = vld [vmem:[%s7501_s1 + $0x3b8] sm:$0xff] }
  0x8f   : > { %5387 = vmatprep.subr.bf16.mxu1 %v6772_v56 }
  0x90   : > { %4707 = vmatmul.mubr.f32.gmra.mrb[16].mxu1 %v6378_v13 }
  0x91   : > { %5083 = vmatmul.mubr.f32.vlgmr.msra.gmra.mrb[0].mxu0 %v6114_v60  ;;  %4709 = vmatprep.mubr.f32.mxu1 %v6786_v11  ;;  %v5522_v60 = vpack.c.bf16 %v4106_v59, %v4105_v4  ;;  %v6826_v4 = vsel %vm745_vm0, %v801_v17, %v802_v45  ;;  %v5526_v59 = vpack.c.bf16 %v4108_v54, %v4107_v37  ;;  %v812_v17 = vrot.slane %v6527_v3, 1 }
  0x92   : > { %5517 = vmatpush3.bf16.msra.mxu0 %v6599_v29  ;;  %5085 = vmatprep.mubr.f32.mxu0 %v6131_v5  ;;  %v6821_v5 = vsel %vm745_vm0, %v797_v47, %v799_v48  ;;  %v804_v29 = vrot.slane %v6621_v28, 1  ;;  %v809_v47 = vrot.slane %v6644_v38, 1  ;;  %v811_v48 = vrot.slane %v6509_v41, 1 }
  0x93   : > { %5519 = vmatprep.subr.bf16.mxu0 %v5518_v42  ;;  %v816_v54 = vrot.slane %v6534_v34, 1 }
  0x94   : > { %4710 = vmatmul.mubr.f32.gmra.mrb[18].mxu1 %v6801_v15  ;;  %v6840_v28 = vsel %vm745_vm0, %v802_v45, %v804_v29  ;;  %v6859_v38 = vsel %vm745_vm0, %v807_v55, %v809_v47  ;;  %v814_v45 = vrot.slane %v6666_v7, 1  ;;  %v817_v29 = vrot.slane %v6552_v50, 1 }
  0x95   : > { %5086 = vmatmul.mubr.f32.gmra.mrb[2].mxu0 %v6134_v6  ;;  %4712 = vmatprep.mubr.f32.mxu1 %v6807_v19  ;;  %v4109_v6 = vld [vmem:[%s7501_s1 + $0x3c0] sm:$0xff] }
  0x96   : > { %5088 = vmatprep.mubr.f32.mxu0 %v6168_v23  ;;  %5521 = vmatpush3.bf16.msra.mxu0 %v5518_v42  ;;  %v4110_v23 = vld [vmem:[%s7501_s1 + $0x3c8] sm:$0xff]  ;;  %v6845_v42 = vsel %vm745_vm0, %v806_v51, %v807_v55  ;;  %v6878_v7 = vsel %vm745_vm0, %v812_v17, %v814_v45  ;;  %v819_v55 = vrot.slane %v6688_v0, 1  ;;  %v7627_v0 = vld [vmem:[#allocation14_spill] sm:$0xff]  ;;  %v4117_v45 = vld [vmem:[%s7501_s1 + $0x400] sm:$0xff] }
  0x97   : > { %5523 = vmatprep.subr.bf16.mxu0 %v5522_v60  ;;  %v5530_v37 = vpack.c.bf16 %v4110_v23, %v4109_v6  ;;  %v821_v6 = vrot.slane %v6561_v16, 1  ;;  %v822_v23 = vrot.slane %v6582_v35, 1 }
  0x98   : > { %4713 = vmatmul.mubr.f32.gmra.mrb[20].mxu1 %v6821_v5 }
  0x99   : > { %5089 = vmatmul.mubr.f32.gmra.mrb[4].mxu0 %v6171_v25  ;;  %4715 = vmatprep.mubr.f32.mxu1 %v6826_v4  ;;  %v4111_v25 = vld [vmem:[%s7501_s1 + $0x3d0] sm:$0xff] }
  0x9a   : > { %5091 = vmatprep.mubr.f32.mxu0 %v6202_v43  ;;  %5525 = vmatpush3.bf16.msra.mxu0 %v5522_v60  ;;  %v4112_v43 = vld [vmem:[%s7501_s1 + $0x3d8] sm:$0xff]  ;;  %v6864_v60 = vsel %vm745_vm0, %v811_v48, %v812_v17  ;;  %v6897_v48 = vsel %vm745_vm0, %v817_v29, %v819_v55  ;;  %v824_v17 = vrot.slane %v6710_v49, 1  ;;  %v7631_v55 = vld [vmem:[#allocation17_spill] sm:$0xff] }
  0x9b   : > { %5527 = vmatprep.subr.bf16.mxu0 %v5526_v59  ;;  %v5534_v51 = vpack.c.bf16 %v4112_v43, %v4111_v25  ;;  %v6902_v25 = vsel %vm745_vm0, %v821_v6, %v822_v23  ;;  %v7632_v6 = vld [vmem:[#allocation19_spill] sm:$0xff] }
  0x9c   : > { %4716 = vmatmul.mubr.f32.gmra.mrb[22].mxu1 %v6840_v28  ;;  %7629 = vst [vmem:[#allocation14_spill] sm:$0xff] %v6902_v25  ;;  %v6914_v49 = vsel %vm745_vm0, %v822_v23, %v824_v17  ;;  %v4041_v23 = vld [vmem:[%s7501_s1 + $0x1a0] sm:$0xff] }
  0x9d   : > { %5092 = vmatmul.mubr.f32.gmra.mrb[6].mxu0 %v6205_v44  ;;  %4718 = vmatprep.mubr.f32.mxu1 %v6845_v42  ;;  %v4113_v44 = vld [vmem:[%s7501_s1 + $0x3e0] sm:$0xff] }
  0x9e   : > { %5094 = vmatprep.mubr.f32.mxu0 %v6236_v62  ;;  %5529 = vmatpush3.bf16.msra.mxu0 %v5526_v59  ;;  %v4114_v62 = vld [vmem:[%s7501_s1 + $0x3e8] sm:$0xff]  ;;  %v6883_v59 = vsel %vm745_vm0, %v816_v54, %v817_v29  ;;  %v4045_v17 = vld [vmem:[%s7501_s1 + $0x1c0] sm:$0xff] }
  0x9f   : > { %5531 = vmatprep.subr.bf16.mxu0 %v5530_v37  ;;  %v5538_v47 = vpack.c.bf16 %v4114_v62, %v4113_v44  ;;  %v4118_v54 = vld [vmem:[%s7501_s1 + $0x408] sm:$0xff]  ;;  %v4039_v44 = vld [vmem:[%s7501_s1 + $0x190] sm:$0xff]  ;;  %v4040_v62 = vld [vmem:[%s7501_s1 + $0x198] sm:$0xff] }
  0xa0   : > { %4719 = vmatmul.mubr.f32.gmra.mrb[24].mxu1 %v6859_v38  ;;  %v7630_v29 = vld [vmem:[#allocation16_spill] sm:$0xff] }
  0xa1   : > { %5095 = vmatmul.mubr.f32.gmra.mrb[8].mxu0 %v6239_v63  ;;  %4721 = vmatprep.mubr.f32.mxu1 %v6864_v60  ;;  %v4115_v63 = vld [vmem:[%s7501_s1 + $0x3f0] sm:$0xff] }
  0xa2   : > { %5097 = vmatprep.mubr.f32.mxu0 %v6270_v22  ;;  %5533 = vmatpush3.bf16.msra.mxu0 %v5530_v37  ;;  %v4116_v22 = vld [vmem:[%s7501_s1 + $0x3f8] sm:$0xff]  ;;  %v7628_v37 = vld [vmem:[#allocation15_spill] sm:$0xff] }
  0xa3   : > { %5535 = vmatprep.subr.bf16.mxu0 %v5534_v51  ;;  %v5542_v43 = vpack.c.bf16 %v4116_v22, %v4115_v63  ;;  %v7634_v63 = vld [vmem:[#allocation20_spill] sm:$0xff]  ;;  %v4043_v22 = vld [vmem:[%s7501_s1 + $0x1b0] sm:$0xff] }
  0xa4   : > { %4722 = vmatmul.mubr.f32.gmra.mrb[26].mxu1 %v6878_v7 }
  0xa5   : > { %5098 = vmatmul.mubr.f32.gmra.mrb[10].mxu0 %v7627_v0  ;;  %4724 = vmatprep.mubr.f32.mxu1 %v6883_v59  ;;  %v4044_v0 = vld [vmem:[%s7501_s1 + $0x1b8] sm:$0xff] }
  0xa6   : > { %5100 = vmatprep.mubr.f32.mxu0 %v7628_v37  ;;  %5537 = vmatpush3.bf16.msra.mxu0 %v5534_v51  ;;  %v6917_v51 = vpack.c.bf16 %v4118_v54, %v4117_v45  ;;  %v4046_v37 = vld [vmem:[%s7501_s1 + $0x1c8] sm:$0xff]  ;;  %v4047_v45 = vld [vmem:[%s7501_s1 + $0x1d0] sm:$0xff]  ;;  %v4048_v54 = vld [vmem:[%s7501_s1 + $0x1d8] sm:$0xff] }
  0xa7   : > { %5539 = vmatprep.subr.bf16.mxu0 %v5538_v47 }
  0xa8   : > { %4725 = vmatmul.mubr.f32.gmra.mrb[28].mxu1 %v6897_v48 }
  0xa9   : > { %5101 = vmatmul.mubr.f32.gmra.mrb[12].mxu0 %v7630_v29  ;;  %4727 = vmatprep.mubr.f32.mxu1 %v6902_v25  ;;  %v7639_v29 = vld [vmem:[#allocation25_spill] sm:$0xff] }
  0xaa   : > { %5103 = vmatprep.mubr.f32.mxu0 %v6408_v61  ;;  %5541 = vmatpush3.bf16.msra.mxu0 %v5538_v47  ;;  %v5390_v61 = vpack.c.bf16 %v4040_v62, %v4039_v44  ;;  %v4042_v47 = vld [vmem:[%s7501_s1 + $0x1a8] sm:$0xff]  ;;  %v5406_v44 = vpack.c.bf16 %v4048_v54, %v4047_v45  ;;  %v7640_v62 = vld [vmem:[#allocation26_spill] sm:$0xff]  ;;  %v4119_v45 = vld [vmem:[%s7501_s1 + $0x410] sm:$0xff] }
  0xab   : > { %5543 = vmatprep.subr.bf16.mxu0 %v5542_v43  ;;  %v4120_v54 = vld [vmem:[%s7501_s1 + $0x418] sm:$0xff] }
  0xac   : > { %4728 = vmatmul.mubr.f32.gmra.mrb[30].mxu1 %v6914_v49 }
  0xad   : > { %5104 = vmatmul.mubr.f32.gmra.mrb[14].mxu0 %v6427_v24  ;;  %4762 = vmatprep.mubr.f32.mxu1 %v7631_v55  ;;  %v7633_v24 = vld [vmem:[#allocation18_spill] sm:$0xff]  ;;  %v4049_v55 = vld [vmem:[%s7501_s1 + $0x1e0] sm:$0xff] }
  0xae   : > { %5106 = vmatprep.mubr.f32.mxu0 %v6434_v58  ;;  %5545 = vmatpush3.bf16.msra.mxu0 %v5542_v43  ;;  %v5394_v58 = vpack.c.bf16 %v4042_v47, %v4041_v23  ;;  %v7638_v43 = vld [vmem:[#allocation24_spill] sm:$0xff] }
  0xaf   : > { %5547 = vmatprep.subr.bf16.mxu0 %v6917_v51  ;;  %v7642_v47 = vld [vmem:[#allocation28_spill] sm:$0xff] }
  0xb0   : > { %4763 = vmatmul.mubr.f32.vlgmr.msra.gmra.mrb[0].mxu1 %v7632_v6  ;;  %v7641_v6 = vld [vmem:[#allocation27_spill] sm:$0xff] }
  0xb1   : > { %5107 = vmatmul.mubr.f32.gmra.mrb[16].mxu0 %v6452_v18  ;;  %5389 = vmatpush3.bf16.msra.mxu1 %v6772_v56  ;;  %v7635_v18 = vld [vmem:[#allocation21_spill] sm:$0xff]  ;;  %v7636_v56 = vld [vmem:[#allocation22_spill] sm:$0xff] }
  0xb2   : > { %4765 = vmatprep.mubr.f32.mxu1 %v7633_v24  ;;  %5109 = vmatprep.mubr.f32.mxu0 %v6459_v46  ;;  %v5398_v46 = vpack.c.bf16 %v4044_v0, %v4043_v22  ;;  %v4051_v24 = vld [vmem:[%s7501_s1 + $0x1f0] sm:$0xff]  ;;  %v6992_v22 = vld [vmem:[%s6007_s14 + $0x198] sm:$0xff] }
  0xb3   : > { %5391 = vmatprep.subr.bf16.mxu1 %v5390_v61 }
  0xb4   : > { %4766 = vmatmul.mubr.f32.gmra.mrb[2].mxu1 %v7634_v63  ;;  %v7643_v63 = vld [vmem:[#allocation29_spill] sm:$0xff] }
  0xb5   : > { %5110 = vmatmul.mubr.f32.gmra.mrb[18].mxu0 %v6477_v39  ;;  %4768 = vmatprep.mubr.f32.mxu1 %v7635_v18  ;;  %v7637_v39 = vld [vmem:[#allocation23_spill] sm:$0xff] }
  0xb6   : > { %5112 = vmatprep.mubr.f32.mxu0 %v6484_v14  ;;  %5393 = vmatpush3.bf16.msra.mxu1 %v5390_v61  ;;  %v5402_v14 = vpack.c.bf16 %v4046_v37, %v4045_v17  ;;  %v4050_v61 = vld [vmem:[%s7501_s1 + $0x1e8] sm:$0xff]  ;;  %v7645_v17 = vld [vmem:[#allocation31_spill] sm:$0xff] }
  0xb7   : > { %5395 = vmatprep.subr.bf16.mxu1 %v5394_v58  ;;  %v5410_v23 = vpack.c.bf16 %v4050_v61, %v4049_v55  ;;  %v6999_v37 = vld [vmem:[%s6007_s14 + $0x1a0] sm:$0xff]  ;;  %v5550_v55 = vpack.c.bf16 %v4120_v54, %v4119_v45  ;;  %v4124_v45 = vld [vmem:[%s7501_s1 + $0x438] sm:$0xff] }
  0xb8   : > { %4769 = vmatmul.mubr.f32.gmra.mrb[4].mxu1 %v7636_v56  ;;  %v7648_v61 = vld [vmem:[#allocation3_spill] sm:$0xff] }
  0xb9   : > { %5113 = vmatmul.mubr.f32.gmra.mrb[20].mxu0 %v6502_v12  ;;  %4771 = vmatprep.mubr.f32.mxu1 %v7637_v39  ;;  %v7650_v54 = vld [vmem:[#allocation11_spill] sm:$0xff] }
  0xba   : > { %5115 = vmatprep.mubr.f32.mxu0 %v6509_v41  ;;  %5397 = vmatpush3.bf16.msra.mxu1 %v5394_v58  ;;  %v4052_v58 = vld [vmem:[%s7501_s1 + $0x1f8] sm:$0xff] }
  0xbb   : > { %5399 = vmatprep.subr.bf16.mxu1 %v5398_v46  ;;  %v5414_v0 = vpack.c.bf16 %v4052_v58, %v4051_v24  ;;  %v4122_v24 = vld [vmem:[%s7501_s1 + $0x428] sm:$0xff]  ;;  %v7649_v58 = vld [vmem:[#allocation34_spill] sm:$0xff] }
  0xbc   : > { %4772 = vmatmul.mubr.f32.gmra.mrb[6].mxu1 %v7638_v43 }
  0xbd   : > { %5116 = vmatmul.mubr.f32.gmra.mrb[22].mxu0 %v6527_v3  ;;  %4774 = vmatprep.mubr.f32.mxu1 %v7639_v29 }
  0xbe   : > { %5118 = vmatprep.mubr.f32.mxu0 %v6534_v34  ;;  %5401 = vmatpush3.bf16.msra.mxu1 %v5398_v46  ;;  %v7644_v46 = vld [vmem:[#allocation30_spill] sm:$0xff] }
  0xbf   : > { %5403 = vmatprep.subr.bf16.mxu1 %v5402_v14 }
  0xc0   : > { %4775 = vmatmul.mubr.f32.gmra.mrb[8].mxu1 %v7640_v62 }
  0xc1   : > { %5119 = vmatmul.mubr.f32.gmra.mrb[24].mxu0 %v6552_v50  ;;  %4777 = vmatprep.mubr.f32.mxu1 %v7641_v6 }
  0xc2   : > { %5121 = vmatprep.mubr.f32.mxu0 %v6561_v16  ;;  %5405 = vmatpush3.bf16.msra.mxu1 %v5402_v14  ;;  %v7646_v14 = vld [vmem:[#allocation32_spill] sm:$0xff] }
  0xc3   : > { %5407 = vmatprep.subr.bf16.mxu1 %v5406_v44 }
  0xc4   : > { %4778 = vmatmul.mubr.f32.gmra.mrb[10].mxu1 %v7642_v47 }
  0xc5   : > { %5122 = vmatmul.mubr.f32.gmra.mrb[26].mxu0 %v6582_v35  ;;  %4780 = vmatprep.mubr.f32.mxu1 %v7643_v63 }
  0xc6   : > { %5124 = vmatprep.mubr.f32.mxu0 %v6713_v8  ;;  %5409 = vmatpush3.bf16.msra.mxu1 %v5406_v44  ;;  %v7647_v44 = vld [vmem:[#allocation33_spill] sm:$0xff] }
  0xc7   : > { %5411 = vmatprep.subr.bf16.mxu1 %v5410_v23 }
  0xc8   : > { %4781 = vmatmul.mubr.f32.gmra.mrb[12].mxu1 %v7644_v46 }
  0xc9   : > { %5125 = vmatmul.mubr.f32.gmra.mrb[28].mxu0 %v6717_v30  ;;  %4783 = vmatprep.mubr.f32.mxu1 %v7645_v17 }
  0xca   : > { %5127 = vmatprep.mubr.f32.mxu0 %v6992_v22  ;;  %5413 = vmatpush3.bf16.msra.mxu1 %v5410_v23  ;;  %v4121_v23 = vld [vmem:[%s7501_s1 + $0x420] sm:$0xff] }
  0xcb   : > { %5415 = vmatprep.subr.bf16.mxu1 %v5414_v0 }
  0xcc   : > { %4784 = vmatmul.mubr.f32.gmra.mrb[14].mxu1 %v7646_v14 }
  0xcd   : > { %5128 = vmatmul.mubr.f32.gmra.mrb[30].mxu0 %v6999_v37  ;;  %4786 = vmatprep.mubr.f32.mxu1 %v7647_v44 }
  0xce   : > { %5162 = vmatprep.mubr.f32.mxu0 %v6162_v20  ;;  %5417 = vmatpush3.bf16.msra.mxu1 %v5414_v0  ;;  %v5554_v20 = vpack.c.bf16 %v4122_v24, %v4121_v23  ;;  %v4123_v0 = vld [vmem:[%s7501_s1 + $0x430] sm:$0xff]  ;;  %v4125_v23 = vld [vmem:[%s7501_s1 + $0x440] sm:$0xff]  ;;  %v4126_v24 = vld [vmem:[%s7501_s1 + $0x448] sm:$0xff] }
  0xcf   : > { %5578 = vmatprep.subr.bf16.mxu1 %v7648_v61 }
  0xd0   : > { %4787 = vmatmul.mubr.f32.gmra.mrb[16].mxu1 %v6587_v21 }
  0xd1   : > { %5163 = vmatmul.mubr.f32.vlgmr.msra.gmra.mrb[0].mxu0 %v6182_v31  ;;  %4789 = vmatprep.mubr.f32.mxu1 %v6592_v57  ;;  %v7651_v31 = vld [vmem:[#allocation35_spill] sm:$0xff] }
  0xd2   : > { %5549 = vmatpush3.bf16.msra.mxu0 %v6917_v51  ;;  %5165 = vmatprep.mubr.f32.mxu0 %v6187_v33  ;;  %v5558_v33 = vpack.c.bf16 %v4124_v45, %v4123_v0  ;;  %v7653_v51 = vld [vmem:[#allocation36_spill] sm:$0xff]  ;;  %v4127_v0 = vld [vmem:[%s7501_s1 + $0x450] sm:$0xff]  ;;  %v4128_v45 = vld [vmem:[%s7501_s1 + $0x458] sm:$0xff] }
  0xd3   : > { %5551 = vmatprep.subr.bf16.mxu0 %v5550_v55 }
  0xd4   : > { %4790 = vmatmul.mubr.f32.gmra.mrb[18].mxu1 %v7649_v58  ;;  %v7654_v58 = vld [vmem:[#allocation13_spill] sm:$0xff] }
  0xd5   : > { %5166 = vmatmul.mubr.f32.gmra.mrb[2].mxu0 %v7650_v54  ;;  %4792 = vmatprep.mubr.f32.mxu1 %v7651_v31  ;;  %v7655_v54 = vld [vmem:[#allocation37_spill] sm:$0xff] }
  0xd6   : > { %5168 = vmatprep.mubr.f32.mxu0 %v7652_v27  ;;  %5553 = vmatpush3.bf16.msra.mxu0 %v5550_v55  ;;  %v5562_v27 = vpack.c.bf16 %v4126_v24, %v4125_v23  ;;  %v7656_v55 = vld [vmem:[#allocation38_spill] sm:$0xff]  ;;  %v4129_v23 = vld [vmem:[%s7501_s1 + $0x460] sm:$0xff]  ;;  %v4130_v24 = vld [vmem:[%s7501_s1 + $0x468] sm:$0xff] }
  0xd7   : > { %5555 = vmatprep.subr.bf16.mxu0 %v5554_v20 }
  0xd8   : > { %4793 = vmatmul.mubr.f32.gmra.mrb[20].mxu1 %v7653_v51 }
  0xd9   : > { %5169 = vmatmul.mubr.f32.gmra.mrb[4].mxu0 %v7654_v58  ;;  %4795 = vmatprep.mubr.f32.mxu1 %v7655_v54  ;;  %v7657_v58 = vld [vmem:[#allocation39_spill] sm:$0xff] }
  0xda   : > { %5171 = vmatprep.mubr.f32.mxu0 %v6255_v10  ;;  %5557 = vmatpush3.bf16.msra.mxu0 %v5554_v20  ;;  %v5566_v10 = vpack.c.bf16 %v4128_v45, %v4127_v0  ;;  %v7658_v20 = vld [vmem:[#allocation40_spill] sm:$0xff]  ;;  %v4131_v0 = vld [vmem:[%s7501_s1 + $0x470] sm:$0xff]  ;;  %v4132_v45 = vld [vmem:[%s7501_s1 + $0x478] sm:$0xff] }
  0xdb   : > { %5559 = vmatprep.subr.bf16.mxu0 %v5558_v33 }
  0xdc   : > { %4796 = vmatmul.mubr.f32.gmra.mrb[22].mxu1 %v7656_v55 }
  0xdd   : > { %5172 = vmatmul.mubr.f32.gmra.mrb[6].mxu0 %v6285_v36  ;;  %4798 = vmatprep.mubr.f32.mxu1 %v7657_v58  ;;  %v7659_v36 = vld [vmem:[#allocation41_spill] sm:$0xff] }
  0xde   : > { %5174 = vmatprep.mubr.f32.mxu0 %v6289_v40  ;;  %5561 = vmatpush3.bf16.msra.mxu0 %v5558_v33  ;;  %v5570_v40 = vpack.c.bf16 %v4130_v24, %v4129_v23  ;;  %v7660_v33 = vld [vmem:[#allocation42_spill] sm:$0xff]  ;;  %v5864_v24 = vld [vmem:[%s6007_s14 + $0x48] sm:$0xff] }
  0xdf   : > { %5563 = vmatprep.subr.bf16.mxu0 %v5562_v27  ;;  %v5863_v23 = vld [vmem:[%s6007_s14 + $0x38] sm:$0xff] }
  0xe0   : > { %4799 = vmatmul.mubr.f32.gmra.mrb[24].mxu1 %v7658_v20 }
  0xe1   : > { %5175 = vmatmul.mubr.f32.gmra.mrb[8].mxu0 %v6319_v2  ;;  %4801 = vmatprep.mubr.f32.mxu1 %v7659_v36  ;;  %v5574_v2 = vpack.c.bf16 %v4132_v45, %v4131_v0  ;;  %v5866_v0 = vld [vmem:[%s6007_s14 + $0x60] sm:$0xff]  ;;  %v7665_v45 = vld [vmem:[#allocation6_spill] sm:$0xff] }
  0xe2   : > { %5177 = vmatprep.mubr.f32.mxu0 %v6323_v9  ;;  %5565 = vmatpush3.bf16.msra.mxu0 %v5562_v27  ;;  %v7661_v9 = vld [vmem:[#allocation43_spill] sm:$0xff]  ;;  %v7662_v27 = vld [vmem:[#allocation44_spill] sm:$0xff] }
  0xe3   : > { %5567 = vmatprep.subr.bf16.mxu0 %v5566_v10 }
  0xe4   : > { %4802 = vmatmul.mubr.f32.gmra.mrb[26].mxu1 %v7660_v33 }
  0xe5   : > { %5178 = vmatmul.mubr.f32.gmra.mrb[10].mxu0 %v6349_v52  ;;  %4804 = vmatprep.mubr.f32.mxu1 %v6705_v26  ;;  %v5860_v52 = vld [vmem:[%s6007_s14 + $0x18] sm:$0xff] }
  0xe6   : > { %5180 = vmatprep.mubr.f32.mxu0 %v6353_v1  ;;  %5569 = vmatpush3.bf16.msra.mxu0 %v5566_v10  ;;  %v5861_v1 = vld [vmem:[%s6007_s14 + $0x20] sm:$0xff]  ;;  %v7663_v10 = vld [vmem:[#allocation4_spill] sm:$0xff] }
  0xe7   : > { %5571 = vmatprep.subr.bf16.mxu0 %v5570_v40 }
  0xe8   : > { %4805 = vmatmul.mubr.f32.gmra.mrb[28].mxu1 %v7661_v9 }
  0xe9   : > { %5181 = vmatmul.mubr.f32.gmra.mrb[12].mxu0 %v6378_v13  ;;  %4807 = vmatprep.mubr.f32.mxu1 %v7662_v27  ;;  %v5862_v13 = vld [vmem:[%s6007_s14 + $0x30] sm:$0xff] }
  0xea   : > { %5183 = vmatprep.mubr.f32.mxu0 %v6786_v11  ;;  %5573 = vmatpush3.bf16.msra.mxu0 %v5570_v40  ;;  %v5865_v40 = vld [vmem:[%s6007_s14 + $0x50] sm:$0xff] }
  0xeb   : > { %5575 = vmatprep.subr.bf16.mxu0 %v5574_v2 }
  0xec   : > { %4808 = vmatmul.mubr.f32.gmra.mrb[30].mxu1 %v6751_v32 }
  0xed   : > { %5184 = vmatmul.mubr.f32.gmra.mrb[14].mxu0 %v6801_v15  ;;  %4842 = vmatprep.mubr.f32.mxu1 %v5860_v52  ;;  %v5868_v52 = vld [vmem:[%s6007_s14 + $0x78] sm:$0xff] }
  0xee   : > { %5186 = vmatprep.mubr.f32.mxu0 %v6807_v19  ;;  %5577 = vmatpush3.bf16.msra.mxu0 %v5574_v2  ;;  %v5867_v2 = vld [vmem:[%s6007_s14 + $0x68] sm:$0xff] }
  0xf0   : > { %4843 = vmatmul.mubr.f32.vlgmr.msra.gmra.mrb[0].mxu1 %v5861_v1  ;;  %v1988_v1 = vrot.slane %v6713_v8, 1 }
  0xf1   : > { %5187 = vmatmul.mubr.f32.gmra.mrb[16].mxu0 %v6821_v5  ;;  %5586 = vmatpush3.bf16.msra.mxu1 %v7648_v61  ;;  %v7664_v61 = vld [vmem:[#allocation5_spill] sm:$0xff] }
  0xf2   : > { %4845 = vmatprep.mubr.f32.mxu1 %v5862_v13  ;;  %5189 = vmatprep.mubr.f32.mxu0 %v6826_v4  ;;  %v1989_v13 = vrot.slane %v6717_v30, 1 }
  0xf3   : > { %5579 = vmatprep.subr.bf16.mxu1 %v7663_v10 }
  0xf4   : > { %4846 = vmatmul.mubr.f32.gmra.mrb[2].mxu1 %v5863_v23  ;;  %v5869_v23 = vld [vmem:[%s6007_s14 + $0x80] sm:$0xff] }
  0xf5   : > { %5190 = vmatmul.mubr.f32.gmra.mrb[18].mxu0 %v6840_v28  ;;  %4848 = vmatprep.mubr.f32.mxu1 %v5864_v24  ;;  %v5870_v24 = vld [vmem:[%s6007_s14 + $0x90] sm:$0xff] }
  0xf6   : > { %5192 = vmatprep.mubr.f32.mxu0 %v6845_v42  ;;  %5587 = vmatpush3.bf16.msra.mxu1 %v7663_v10  ;;  %v7666_v10 = vld [vmem:[#allocation7_spill] sm:$0xff] }
  0xf7   : > { %5580 = vmatprep.subr.bf16.mxu1 %v7664_v61 }
  0xf8   : > { %4849 = vmatmul.mubr.f32.gmra.mrb[4].mxu1 %v5865_v40  ;;  %v3019_v40 = vrot.slane %v6992_v22, 1 }
  0xf9   : > { %5193 = vmatmul.mubr.f32.gmra.mrb[20].mxu0 %v6859_v38  ;;  %4851 = vmatprep.mubr.f32.mxu1 %v5866_v0  ;;  %v3020_v0 = vrot.slane %v6999_v37, 1 }
  0xfa   : > { %5195 = vmatprep.mubr.f32.mxu0 %v6864_v60  ;;  %5588 = vmatpush3.bf16.msra.mxu1 %v7664_v61  ;;  %v1991_v61 = vrot.slane %v6738_v53, 1  ;;  %v5872_v53 = vld [vmem:[%s6007_s14 + $0xa8] sm:$0xff] }
  0xfb   : > { %5581 = vmatprep.subr.bf16.mxu1 %v7665_v45 }
  0xfc   : > { %4852 = vmatmul.mubr.f32.gmra.mrb[6].mxu1 %v5867_v2  ;;  %v7119_v2 = vld [vmem:[%s6007_s14 + $0x1a8] sm:$0x3] }
  0xfd   : > { %5196 = vmatmul.mubr.f32.gmra.mrb[22].mxu0 %v6878_v7  ;;  %4854 = vmatprep.mubr.f32.mxu1 %v5868_v52  ;;  %v7667_v52 = vld [vmem:[#allocation8_spill] sm:$0xff] }
  0xfe   : > { %5198 = vmatprep.mubr.f32.mxu0 %v6883_v59  ;;  %5589 = vmatpush3.bf16.msra.mxu1 %v7665_v45  ;;  %v7116_v45 = vsel %vm745_vm0, %v1988_v1, %v1989_v13  ;;  %v3022_v1 = vrot.slane %v7119_v2, 1 }
  0xff   : > { %5582 = vmatprep.subr.bf16.mxu1 %v7666_v10 }
 0x100   : > { %4855 = vmatmul.mubr.f32.gmra.mrb[8].mxu1 %v5869_v23  ;;  %v5871_v23 = vld [vmem:[%s6007_s14 + $0x98] sm:$0xff] }
 0x101   : > { %5199 = vmatmul.mubr.f32.gmra.mrb[24].mxu0 %v6897_v48  ;;  %4857 = vmatprep.mubr.f32.mxu1 %v5870_v24  ;;  %v3021_v24 = vsel %vm745_vm0, %v3019_v40, %v3020_v0  ;;  %v5876_v40 = vld [vmem:[%s6007_s14 + $0xd8] sm:$0xff] }
 0x102   : > { %5201 = vmatprep.mubr.f32.mxu0 %v6902_v25  ;;  %5590 = vmatpush3.bf16.msra.mxu1 %v7666_v10  ;;  %v7127_v10 = vsel %vm745_vm0, %v1989_v13, %v1991_v61  ;;  %v7668_v25 = vld [vmem:[#allocation9_spill] sm:$0xff]  ;;  %v3023_v13 = vsel %vm745_vm0, %v3020_v0, %v3022_v1  ;;  %v7669_v61 = vld [vmem:[#allocation10_spill] sm:$0xff]  ;;  %v5880_v1 = vld [vmem:[%s6007_s14 + $0x108] sm:$0xff] }
 0x103   : > { %5583 = vmatprep.subr.bf16.mxu1 %v7667_v52  ;;  %v5878_v0 = vld [vmem:[%s6007_s14 + $0xf0] sm:$0xff] }
 0x104   : > { %4858 = vmatmul.mubr.f32.gmra.mrb[10].mxu1 %v5871_v23  ;;  %v5873_v23 = vld [vmem:[%s6007_s14 + $0xb0] sm:$0xff] }
 0x105   : > { %5202 = vmatmul.mubr.f32.gmra.mrb[26].mxu0 %v6914_v49  ;;  %4860 = vmatprep.mubr.f32.mxu1 %v5872_v53  ;;  %v5874_v53 = vld [vmem:[%s6007_s14 + $0xc0] sm:$0xff] }
 0x106   : > { %5204 = vmatprep.mubr.f32.mxu0 %v7116_v45  ;;  %5591 = vmatpush3.bf16.msra.mxu1 %v7667_v52  ;;  %v5875_v52 = vld [vmem:[%s6007_s14 + $0xc8] sm:$0xff] }
 0x107   : > { %5584 = vmatprep.subr.bf16.mxu1 %v7668_v25 }
 0x108   : > { %4861 = vmatmul.mubr.f32.gmra.mrb[12].mxu1 %v5873_v23  ;;  %v5882_v23 = vld [vmem:[%s6007_s14 + $0x120] sm:$0xff] }
 0x109   : > { %5205 = vmatmul.mubr.f32.gmra.mrb[28].mxu0 %v7127_v10  ;;  %4863 = vmatprep.mubr.f32.mxu1 %v5874_v53 }
 0x10a   : > { %5207 = vmatprep.mubr.f32.mxu0 %v3021_v24  ;;  %5592 = vmatpush3.bf16.msra.mxu1 %v7668_v25  ;;  %v5877_v24 = vld [vmem:[%s6007_s14 + $0xe0] sm:$0xff]  ;;  %v5879_v25 = vld [vmem:[%s6007_s14 + $0xf8] sm:$0xff] }
 0x10b   : > { %5585 = vmatprep.subr.bf16.mxu1 %v7669_v61 }
 0x10c   : > { %4864 = vmatmul.mubr.f32.gmra.mrb[14].mxu1 %v5875_v52 }
 0x10d   : > { %5208 = vmatmul.mubr.f32.gmra.mrb[30].mxu0 %v3023_v13  ;;  %4866 = vmatprep.mubr.f32.mxu1 %v5876_v40 }
 0x10e   : > { %5242 = vmatprep.mubr.f32.mxu0 %v7635_v18  ;;  %5593 = vmatpush3.bf16.msra.mxu1 %v7669_v61  ;;  %v5881_v18 = vld [vmem:[%s6007_s14 + $0x110] sm:$0xff]  ;;  %s4137_s14 = sshll.u32 %s5973_s19, 8 }
 0x10f   : > { %s7219_s4 = scalar_lea.vmem %s7505_s5, %s4137_s14 }
 0x110   : > { %4867 = vmatmul.mubr.f32.gmra.mrb[16].mxu1 %v5877_v24 }
 0x111   : > { %5243 = vmatmul.mubr.f32.vlgmr.msra.gmra.mrb[0].mxu0 %v7636_v56  ;;  %4869 = vmatprep.mubr.f32.mxu1 %v5878_v0  ;;  %v7214_v56 = vld [vmem:[%s7502_s2] ss:$0 sm:$0xff] }
 0x112   : > { %5245 = vmatprep.mubr.f32.mxu0 %v7637_v39 }
 0x114   : > { %4870 = vmatmul.mubr.f32.gmra.mrb[18].mxu1 %v5879_v25 }
 0x115   : > { %5246 = vmatmul.mubr.f32.gmra.mrb[2].mxu0 %v7638_v43  ;;  %4872 = vmatprep.mubr.f32.mxu1 %v5880_v1 }
 0x116   : > { %5248 = vmatprep.mubr.f32.mxu0 %v7639_v29 }
 0x118   : > { %4873 = vmatmul.mubr.f32.gmra.mrb[20].mxu1 %v5881_v18 }
 0x119   : > { %5249 = vmatmul.mubr.f32.gmra.mrb[4].mxu0 %v7640_v62  ;;  %4875 = vmatprep.mubr.f32.mxu1 %v5882_v23 }
 0x11a   : > { %5251 = vmatprep.mubr.f32.mxu0 %v7641_v6 }
 0x11c   : > { %4876 = vmatmul.mubr.f32.gmra.mrb[22].mxu1 %v6502_v12  ;;  %v7670_v12 = vld [vmem:[#allocation34_spill] sm:$0xff] }
 0x11d   : > { %5252 = vmatmul.mubr.f32.gmra.mrb[6].mxu0 %v7642_v47  ;;  %4878 = vmatprep.mubr.f32.mxu1 %v6509_v41  ;;  %v3364_v41 = vrot.slane %v6992_v22, 2 }
 0x11e   : > { %5254 = vmatprep.mubr.f32.mxu0 %v7643_v63 }
 0x120   : > { %4879 = vmatmul.mubr.f32.gmra.mrb[24].mxu1 %v6527_v3  ;;  %v3365_v3 = vrot.slane %v6999_v37, 2 }
 0x121   : > { %5255 = vmatmul.mubr.f32.gmra.mrb[8].mxu0 %v7644_v46  ;;  %4881 = vmatprep.mubr.f32.mxu1 %v6534_v34  ;;  %v7671_v34 = vld [vmem:[#allocation14_spill] sm:$0xff] }
 0x122   : > { %5257 = vmatprep.mubr.f32.mxu0 %v7645_v17 }
 0x124   : > { %4882 = vmatmul.mubr.f32.gmra.mrb[26].mxu1 %v6552_v50  ;;  %v3367_v50 = vrot.slane %v7119_v2, 2 }
 0x125   : > { %5258 = vmatmul.mubr.f32.gmra.mrb[10].mxu0 %v7646_v14  ;;  %4884 = vmatprep.mubr.f32.mxu1 %v6561_v16  ;;  %v3366_v16 = vsel %vm1196_vm1, %v3364_v41, %v3365_v3 }
 0x126   : > { %5260 = vmatprep.mubr.f32.mxu0 %v7647_v44 }
 0x128   : > { %4885 = vmatmul.mubr.f32.gmra.mrb[28].mxu1 %v6582_v35  ;;  %v7673_v35 = vld [vmem:[#allocation46_spill] sm:$0xff] }
 0x129   : > { %5261 = vmatmul.mubr.f32.gmra.mrb[12].mxu0 %v6587_v21  ;;  %4887 = vmatprep.mubr.f32.mxu1 %v6713_v8  ;;  %v3368_v21 = vsel %vm1196_vm1, %v3365_v3, %v3367_v50 }
 0x12a   : > { %5263 = vmatprep.mubr.f32.mxu0 %v6592_v57  ;;  %v7672_v57 = vld [vmem:[#allocation45_spill] sm:$0xff] }
 0x12c   : > { %4888 = vmatmul.mubr.f32.gmra.mrb[30].mxu1 %v6717_v30 }
 0x12d   : > { %5264 = vmatmul.mubr.f32.gmra.mrb[14].mxu0 %v7670_v12  ;;  %4946 = vmatprep.mubr.f32.mxu1 %v6786_v11 }
 0x12e   : > { %5266 = vmatprep.mubr.f32.mxu0 %v7651_v31 }
 0x130   : > { %4947 = vmatmul.mubr.f32.vlgmr.msra.gmra.mrb[16].mxu1 %v6801_v15 }
 0x131   : > { %5267 = vmatmul.mubr.f32.gmra.mrb[16].mxu0 %v7653_v51  ;;  %4949 = vmatprep.mubr.f32.mxu1 %v6807_v19 }
 0x132   : > { %5269 = vmatprep.mubr.f32.mxu0 %v7655_v54 }
 0x134   : > { %4950 = vmatmul.mubr.f32.gmra.mrb[18].mxu1 %v6821_v5 }
 0x135   : > { %5270 = vmatmul.mubr.f32.gmra.mrb[18].mxu0 %v7656_v55  ;;  %4952 = vmatprep.mubr.f32.mxu1 %v6826_v4 }
 0x136   : > { %5272 = vmatprep.mubr.f32.mxu0 %v7657_v58 }
 0x138   : > { %4953 = vmatmul.mubr.f32.gmra.mrb[20].mxu1 %v6840_v28 }
 0x139   : > { %5273 = vmatmul.mubr.f32.gmra.mrb[20].mxu0 %v7658_v20  ;;  %4955 = vmatprep.mubr.f32.mxu1 %v6845_v42 }
 0x13a   : > { %5275 = vmatprep.mubr.f32.mxu0 %v7659_v36 }
 0x13c   : > { %4956 = vmatmul.mubr.f32.gmra.mrb[22].mxu1 %v6859_v38 }
 0x13d   : > { %5276 = vmatmul.mubr.f32.gmra.mrb[22].mxu0 %v7660_v33  ;;  %4958 = vmatprep.mubr.f32.mxu1 %v6864_v60 }
 0x13e   : > { %5278 = vmatprep.mubr.f32.mxu0 %v6705_v26 }
 0x140   : > { %4959 = vmatmul.mubr.f32.gmra.mrb[24].mxu1 %v6878_v7 }
 0x141   : > { %5279 = vmatmul.mubr.f32.gmra.mrb[24].mxu0 %v7661_v9  ;;  %4961 = vmatprep.mubr.f32.mxu1 %v6883_v59 }
 0x142   : > { %5281 = vmatprep.mubr.f32.mxu0 %v7662_v27 }
 0x144   : > { %4962 = vmatmul.mubr.f32.gmra.mrb[26].mxu1 %v6897_v48 }
 0x145   : > { %5282 = vmatmul.mubr.f32.gmra.mrb[26].mxu0 %v6751_v32  ;;  %4964 = vmatprep.mubr.f32.mxu1 %v7671_v34 }
 0x146   : > { %5284 = vmatprep.mubr.f32.mxu0 %v7672_v57 }
 0x148   : > { %4965 = vmatmul.mubr.f32.gmra.mrb[28].mxu1 %v6914_v49 }
 0x149   : > { %5285 = vmatmul.mubr.f32.gmra.mrb[28].mxu0 %v7673_v35  ;;  %4967 = vmatprep.mubr.f32.mxu1 %v7116_v45 }
 0x14a   : > { %5287 = vmatprep.mubr.f32.mxu0 %v3366_v16 }
 0x14c   : > { %4968 = vmatmul.mubr.f32.gmra.mrb[30].mxu1 %v7127_v10 }
 0x14d   : > { %5288 = vmatmul.mubr.f32.gmra.mrb[30].mxu0 %v3368_v21 }
 0x1c3   : > { %v4844_v8 = vpop.f32.mrb[0].mxu1 }
 0x1c4   : > { %v1762_v26 = vpop.f32.mrb[1].mxu1 }
 0x1c7   : > { %v4847_v30 = vpop.f32.mrb[2].mxu1 }
 0x1c8   : > { %v1772_v32 = vpop.f32.mrb[3].mxu1 }
 0x1cb   : > { %v4850_v11 = vpop.f32.mrb[4].mxu1 }
 0x1cc   : > { %v1782_v15 = vpop.f32.mrb[5].mxu1 }
 0x1cf   : > { %v4853_v19 = vpop.f32.mrb[6].mxu1 }
 0x1d0   : > { %v1792_v5 = vpop.f32.mrb[7].mxu1 }
 0x1d3   : > { %v4856_v4 = vpop.f32.mrb[8].mxu1 }
 0x1d4   : > { %v1802_v28 = vpop.f32.mrb[9].mxu1 }
 0x1d7   : > { %v4859_v42 = vpop.f32.mrb[10].mxu1 }
 0x1d8   : > { %v1812_v38 = vpop.f32.mrb[11].mxu1 }
 0x1db   : > { %v4862_v60 = vpop.f32.mrb[12].mxu1 }
 0x1dc   : > { %v1822_v7 = vpop.f32.mrb[13].mxu1 }
 0x1df   : > { %v4865_v59 = vpop.f32.mrb[14].mxu1 }
 0x1e0   : > { %v7208_v48 = vpop.f32.mrb[15].mxu1 }
 0x1e4   : > { %v5244_v49 = vpop.f32.mrb[0].mxu0 }
 0x1e5   : > { %v5594_v39 = vadd.f32 %v5244_v49, %v4844_v8  ;;  %v3486_v43 = vpop.f32.mrb[1].mxu0 }
 0x1e6   : > { %v5595_v29 = vadd.f32 %v3486_v43, %v1762_v26 }
 0x1e7   : > { %v7222_v62 = vadd.f32 %v5594_v39, %v7214_v56 }
 0x1e8   : > { %v7225_v6 = vadd.f32 %v5595_v29, %v7214_v56  ;;  %v5247_v47 = vpop.f32.mrb[2].mxu0 }
 0x1e9   : > { %3781 = vst [vmem:[%s7219_s4 + $0x8] sm:$0xff] %v7222_v62  ;;  %v5596_v63 = vadd.f32 %v5247_v47, %v4847_v30  ;;  %v3496_v22 = vpop.f32.mrb[3].mxu0 }
 0x1ea   : > { %3780 = vst [vmem:[%s7219_s4] sm:$0xff] %v7225_v6  ;;  %v5597_v46 = vadd.f32 %v3496_v22, %v1772_v32 }
 0x1eb   : > { %v7232_v17 = vadd.f32 %v5596_v63, %v7214_v56 }
 0x1ec   : > { %v7235_v37 = vadd.f32 %v5597_v46, %v7214_v56  ;;  %v5250_v14 = vpop.f32.mrb[4].mxu0 }
 0x1ed   : > { %3783 = vst [vmem:[%s7219_s4 + $0x18] sm:$0xff] %v7232_v17  ;;  %v5598_v44 = vadd.f32 %v5250_v14, %v4850_v11  ;;  %v3506_v31 = vpop.f32.mrb[5].mxu0 }
 0x1ee   : > { %3782 = vst [vmem:[%s7219_s4 + $0x10] sm:$0xff] %v7235_v37  ;;  %v5599_v51 = vadd.f32 %v3506_v31, %v1782_v15 }
 0x1ef   : > { %v7242_v54 = vadd.f32 %v5598_v44, %v7214_v56 }
 0x1f0   : > { %v7245_v55 = vadd.f32 %v5599_v51, %v7214_v56  ;;  %v5253_v58 = vpop.f32.mrb[6].mxu0 }
 0x1f1   : > { %3785 = vst [vmem:[%s7219_s4 + $0x28] sm:$0xff] %v7242_v54  ;;  %v5600_v20 = vadd.f32 %v5253_v58, %v4853_v19  ;;  %v3516_v36 = vpop.f32.mrb[7].mxu0 }
 0x1f2   : > { %3784 = vst [vmem:[%s7219_s4 + $0x20] sm:$0xff] %v7245_v55  ;;  %v5601_v33 = vadd.f32 %v3516_v36, %v1792_v5 }
 0x1f3   : > { %v7252_v9 = vadd.f32 %v5600_v20, %v7214_v56 }
 0x1f4   : > { %v7255_v27 = vadd.f32 %v5601_v33, %v7214_v56  ;;  %v5256_v45 = vpop.f32.mrb[8].mxu0 }
 0x1f5   : > { %3787 = vst [vmem:[%s7219_s4 + $0x38] sm:$0xff] %v7252_v9  ;;  %v5602_v2 = vadd.f32 %v5256_v45, %v4856_v4  ;;  %v3526_v10 = vpop.f32.mrb[9].mxu0 }
 0x1f6   : > { %3786 = vst [vmem:[%s7219_s4 + $0x30] sm:$0xff] %v7255_v27  ;;  %v5603_v53 = vadd.f32 %v3526_v10, %v1802_v28 }
 0x1f7   : > { %v7262_v13 = vadd.f32 %v5602_v2, %v7214_v56 }
 0x1f8   : > { %v7265_v61 = vadd.f32 %v5603_v53, %v7214_v56  ;;  %v5259_v52 = vpop.f32.mrb[10].mxu0 }
 0x1f9   : > { %3789 = vst [vmem:[%s7219_s4 + $0x48] sm:$0xff] %v7262_v13  ;;  %v5604_v40 = vadd.f32 %v5259_v52, %v4859_v42  ;;  %v3536_v24 = vpop.f32.mrb[11].mxu0 }
 0x1fa   : > { %3788 = vst [vmem:[%s7219_s4 + $0x40] sm:$0xff] %v7265_v61  ;;  %v5605_v0 = vadd.f32 %v3536_v24, %v1812_v38 }
 0x1fb   : > { %v7272_v25 = vadd.f32 %v5604_v40, %v7214_v56 }
 0x1fc   : > { %v7275_v1 = vadd.f32 %v5605_v0, %v7214_v56  ;;  %v5262_v18 = vpop.f32.mrb[12].mxu0 }
 0x1fd   : > { %3791 = vst [vmem:[%s7219_s4 + $0x58] sm:$0xff] %v7272_v25  ;;  %v5606_v23 = vadd.f32 %v5262_v18, %v4862_v60  ;;  %v3546_v12 = vpop.f32.mrb[13].mxu0 }
 0x1fe   : > { %3790 = vst [vmem:[%s7219_s4 + $0x50] sm:$0xff] %v7275_v1  ;;  %v5607_v41 = vadd.f32 %v3546_v12, %v1822_v7 }
 0x1ff   : > { %v7282_v3 = vadd.f32 %v5606_v23, %v7214_v56 }
 0x200   : > { %v7285_v34 = vadd.f32 %v5607_v41, %v7214_v56  ;;  %v5265_v57 = vpop.f32.mrb[14].mxu0 }
 0x201   : > { %3793 = vst [vmem:[%s7219_s4 + $0x68] sm:$0xff] %v7282_v3  ;;  %v5608_v50 = vadd.f32 %v5265_v57, %v4865_v59  ;;  %v3556_v16 = vpop.f32.mrb[15].mxu0 }
 0x202   : > { %3792 = vst [vmem:[%s7219_s4 + $0x60] sm:$0xff] %v7285_v34  ;;  %v5609_v35 = vadd.f32 %v3556_v16, %v7208_v48 }
 0x203   : > { %v7293_v21 = vadd.f32 %v5608_v50, %v7214_v56  ;;  %v4948_v8 = vpop.f32.mrb[16].mxu1 }
 0x204   : > { %v7296_v26 = vadd.f32 %v5609_v35, %v7214_v56  ;;  %v5268_v30 = vpop.f32.mrb[16].mxu0  ;;  %v2190_v32 = vpop.f32.mrb[17].mxu1 }
 0x205   : > { %3795 = vst [vmem:[%s7219_s4 + $0x78] sm:$0xff] %v7293_v21  ;;  %v5610_v11 = vadd.f32 %v5268_v30, %v4948_v8  ;;  %v3566_v15 = vpop.f32.mrb[17].mxu0 }
 0x206   : > { %3794 = vst [vmem:[%s7219_s4 + $0x70] sm:$0xff] %v7296_v26  ;;  %v5611_v19 = vadd.f32 %v3566_v15, %v2190_v32 }
 0x207   : > { %v7303_v5 = vadd.f32 %v5610_v11, %v7214_v56  ;;  %v4951_v4 = vpop.f32.mrb[18].mxu1 }
 0x208   : > { %v7306_v28 = vadd.f32 %v5611_v19, %v7214_v56  ;;  %v5271_v42 = vpop.f32.mrb[18].mxu0  ;;  %v2200_v38 = vpop.f32.mrb[19].mxu1 }
 0x209   : > { %3797 = vst [vmem:[%s7219_s4 + $0x88] sm:$0xff] %v7303_v5  ;;  %v5612_v60 = vadd.f32 %v5271_v42, %v4951_v4  ;;  %v3576_v7 = vpop.f32.mrb[19].mxu0 }
 0x20a   : > { %3796 = vst [vmem:[%s7219_s4 + $0x80] sm:$0xff] %v7306_v28  ;;  %v5613_v59 = vadd.f32 %v3576_v7, %v2200_v38 }
 0x20b   : > { %v7313_v48 = vadd.f32 %v5612_v60, %v7214_v56  ;;  %v4954_v49 = vpop.f32.mrb[20].mxu1 }
 0x20c   : > { %v7316_v39 = vadd.f32 %v5613_v59, %v7214_v56  ;;  %v5274_v43 = vpop.f32.mrb[20].mxu0  ;;  %v2210_v29 = vpop.f32.mrb[21].mxu1 }
 0x20d   : > { %3799 = vst [vmem:[%s7219_s4 + $0x98] sm:$0xff] %v7313_v48  ;;  %v5614_v47 = vadd.f32 %v5274_v43, %v4954_v49  ;;  %v3586_v63 = vpop.f32.mrb[21].mxu0 }
 0x20e   : > { %3798 = vst [vmem:[%s7219_s4 + $0x90] sm:$0xff] %v7316_v39  ;;  %v5615_v22 = vadd.f32 %v3586_v63, %v2210_v29 }
 0x20f   : > { %v7323_v46 = vadd.f32 %v5614_v47, %v7214_v56  ;;  %v4957_v14 = vpop.f32.mrb[22].mxu1 }
 0x210   : > { %v7326_v44 = vadd.f32 %v5615_v22, %v7214_v56  ;;  %v5277_v31 = vpop.f32.mrb[22].mxu0  ;;  %v2220_v51 = vpop.f32.mrb[23].mxu1  ;;  %v5891_v22 = vmov (!%p4134_p4), 0.0  }
 0x211   : > { %3801 = vst [vmem:[%s7219_s4 + $0xa8] sm:$0xff] %v7323_v46  ;;  %v5616_v58 = vadd.f32 %v5277_v31, %v4957_v14  ;;  %v3596_v20 = vpop.f32.mrb[23].mxu0  ;;  %3816 = vst [vmem:[%s7506_s6] sm:$0x1] (!%p4134_p4), %v5891_v22 }
 0x212   : > { %3800 = vst [vmem:[%s7219_s4 + $0xa0] sm:$0xff] %v7326_v44  ;;  %v5617_v36 = vadd.f32 %v3596_v20, %v2220_v51  ;;  %3817 = vst [vmem:[%s7507_s7] sm:$0x1] (!%p4134_p4), %v5891_v22 }
 0x213   : > { %v7333_v33 = vadd.f32 %v5616_v58, %v7214_v56  ;;  %v4960_v45 = vpop.f32.mrb[24].mxu1 }
 0x214   : > { %v7336_v2 = vadd.f32 %v5617_v36, %v7214_v56  ;;  %v5280_v10 = vpop.f32.mrb[24].mxu0  ;;  %v2230_v53 = vpop.f32.mrb[25].mxu1 }
 0x215   : > { %3803 = vst [vmem:[%s7219_s4 + $0xb8] sm:$0xff] %v7333_v33  ;;  %v5618_v52 = vadd.f32 %v5280_v10, %v4960_v45  ;;  %v3606_v40 = vpop.f32.mrb[25].mxu0 }
 0x216   : > { %3802 = vst [vmem:[%s7219_s4 + $0xb0] sm:$0xff] %v7336_v2  ;;  %v5619_v24 = vadd.f32 %v3606_v40, %v2230_v53 }
 0x217   : > { %v7343_v0 = vadd.f32 %v5618_v52, %v7214_v56  ;;  %v4963_v18 = vpop.f32.mrb[26].mxu1 }
 0x218   : > { %v7346_v23 = vadd.f32 %v5619_v24, %v7214_v56  ;;  %v5283_v12 = vpop.f32.mrb[26].mxu0  ;;  %v2240_v41 = vpop.f32.mrb[27].mxu1 }
 0x219   : > { %3805 = vst [vmem:[%s7219_s4 + $0xc8] sm:$0xff] %v7343_v0  ;;  %v5620_v57 = vadd.f32 %v5283_v12, %v4963_v18  ;;  %v3616_v50 = vpop.f32.mrb[27].mxu0 }
 0x21a   : > { %3804 = vst [vmem:[%s7219_s4 + $0xc0] sm:$0xff] %v7346_v23  ;;  %v5621_v16 = vadd.f32 %v3616_v50, %v2240_v41 }
 0x21b   : > { %v7353_v35 = vadd.f32 %v5620_v57, %v7214_v56  ;;  %v4966_v8 = vpop.f32.mrb[28].mxu1 }
 0x21c   : > { %v7356_v30 = vadd.f32 %v5621_v16, %v7214_v56  ;;  %v5286_v32 = vpop.f32.mrb[28].mxu0  ;;  %v2250_v11 = vpop.f32.mrb[29].mxu1 }
 0x21d   : > { %3807 = vst [vmem:[%s7219_s4 + $0xd8] sm:$0xff] %v7353_v35  ;;  %v5622_v15 = vadd.f32 %v5286_v32, %v4966_v8  ;;  %v3626_v19 = vpop.f32.mrb[29].mxu0 }
 0x21e   : > { %3806 = vst [vmem:[%s7219_s4 + $0xd0] sm:$0xff] %v7356_v30  ;;  %v5623_v4 = vadd.f32 %v3626_v19, %v2250_v11 }
 0x21f   : > { %v7363_v42 = vadd.f32 %v5622_v15, %v7214_v56  ;;  %v4969_v38 = vpop.f32.mrb[30].mxu1 }
 0x220   : > { %v7366_v60 = vadd.f32 %v5623_v4, %v7214_v56  ;;  %v5289_v7 = vpop.f32.mrb[30].mxu0  ;;  %v2260_v59 = vpop.f32.mrb[31].mxu1  ;;  %3815 = sbr.rel (%p4134_p4) target bundleno = 551 (0x227), region = 44 }
 0x221   : > { %3809 = vst [vmem:[%s7219_s4 + $0xe8] sm:$0xff] %v7363_v42  ;;  %v5624_v49 = vadd.f32 %v5289_v7, %v4969_v38  ;;  %v3636_v43 = vpop.f32.mrb[31].mxu0 }
 0x222   : > { %3808 = vst [vmem:[%s7219_s4 + $0xe0] sm:$0xff] %v7366_v60  ;;  %v5625_v29 = vadd.f32 %v3636_v43, %v2260_v59 }
 0x223   : > { %v7373_v47 = vadd.f32 %v5624_v49, %v7214_v56 }
 0x224   : > { %v7376_v63 = vadd.f32 %v5625_v29, %v7214_v56 }
 0x225   : > { %3811 = vst [vmem:[%s7219_s4 + $0xf8] sm:$0xff] %v7373_v47 }
 0x226   : > { %3810 = vst [vmem:[%s7219_s4 + $0xf0] sm:$0xff] %v7376_v63 }
 0x227 PF: > { %v3819_v56 = vadd.f32 %v7222_v62, %v7225_v6  ;;  %v3859_v51 = vmul.f32 %v7225_v6, %v7225_v6  ;;  %v3860_v58 = vmul.f32 %v7222_v62, %v7222_v62  ;;  %v3861_v36 = vmul.f32 %v7235_v37, %v7235_v37 }
 0x228   : > { %v3862_v10 = vmul.f32 %v7232_v17, %v7232_v17  ;;  %v3863_v40 = vmul.f32 %v7245_v55, %v7245_v55  ;;  %v3864_v62 = vmul.f32 %v7242_v54, %v7242_v54  ;;  %v3865_v12 = vmul.f32 %v7255_v27, %v7255_v27 }
 0x229   : > { %v3820_v14 = vadd.f32 %v3819_v56, %v7235_v37  ;;  %v3891_v53 = vadd.f32 %v3860_v58, %v3859_v51  ;;  %v3866_v57 = vmul.f32 %v7252_v9, %v7252_v9  ;;  %v3867_v16 = vmul.f32 %v7265_v61, %v7265_v61 }
 0x22a   : > { %v3868_v32 = vmul.f32 %v7262_v13, %v7262_v13  ;;  %v3869_v15 = vmul.f32 %v7275_v1, %v7275_v1  ;;  %v3870_v4 = vmul.f32 %v7272_v25, %v7272_v25  ;;  %v3871_v7 = vmul.f32 %v7285_v34, %v7285_v34 }
 0x22b   : > { %v3821_v31 = vadd.f32 %v3820_v14, %v7232_v17  ;;  %v3892_v6 = vadd.f32 %v3891_v53, %v3861_v36  ;;  %v3872_v49 = vmul.f32 %v7282_v3, %v7282_v3  ;;  %v3873_v29 = vmul.f32 %v7296_v26, %v7296_v26 }
 0x22c   : > { %v3874_v56 = vmul.f32 %v7293_v21, %v7293_v21  ;;  %v3876_v58 = vmul.f32 %v7303_v5, %v7303_v5  ;;  %v3877_v36 = vmul.f32 %v7316_v39, %v7316_v39 }
 0x22d   : > { %v3822_v20 = vadd.f32 %v3821_v31, %v7245_v55  ;;  %v3893_v18 = vadd.f32 %v3892_v6, %v3862_v10  ;;  %v3875_v31 = vmul.f32 %v7306_v28, %v7306_v28  ;;  %v3878_v10 = vmul.f32 %v7313_v48, %v7313_v48 }
 0x22e   : > { %v3880_v6 = vmul.f32 %v7323_v46, %v7323_v46 }
 0x22f   : > { %v3823_v45 = vadd.f32 %v3822_v20, %v7242_v54  ;;  %v3894_v41 = vadd.f32 %v3893_v18, %v3863_v40 }
 0x231   : > { %v3824_v52 = vadd.f32 %v3823_v45, %v7255_v27  ;;  %v3895_v50 = vadd.f32 %v3894_v41, %v3864_v62  ;;  %v3881_v62 = vmul.f32 %v7336_v2, %v7336_v2  ;;  %v3883_v41 = vmul.f32 %v7346_v23, %v7346_v23 }
 0x233   : > { %v3825_v24 = vadd.f32 %v3824_v52, %v7252_v9  ;;  %v3896_v8 = vadd.f32 %v3895_v50, %v3865_v12  ;;  %v3879_v52 = vmul.f32 %v7326_v44, %v7326_v44 }
 0x235   : > { %v3826_v37 = vadd.f32 %v3825_v24, %v7265_v61  ;;  %v3897_v11 = vadd.f32 %v3896_v8, %v3866_v57  ;;  %v3884_v57 = vmul.f32 %v7343_v0, %v7343_v0  ;;  %v3886_v8 = vmul.f32 %v7353_v35, %v7353_v35 }
 0x237   : > { %v3827_v17 = vadd.f32 %v3826_v37, %v7262_v13  ;;  %v3898_v19 = vadd.f32 %v3897_v11, %v3867_v16  ;;  %v3882_v37 = vmul.f32 %v7333_v33, %v7333_v33 }
 0x239   : > { %v3828_v55 = vadd.f32 %v3827_v17, %v7275_v1  ;;  %v3899_v38 = vadd.f32 %v3898_v19, %v3868_v32  ;;  %v3887_v32 = vmul.f32 %v7366_v60, %v7366_v60  ;;  %v3889_v19 = vmul.f32 %v7376_v63, %v7376_v63 }
 0x23b   : > { %v3829_v54 = vadd.f32 %v3828_v55, %v7272_v25  ;;  %v3900_v59 = vadd.f32 %v3899_v38, %v3869_v15  ;;  %v3885_v55 = vmul.f32 %v7356_v30, %v7356_v30 }
 0x23d   : > { %v3830_v27 = vadd.f32 %v3829_v54, %v7285_v34  ;;  %v3901_v43 = vadd.f32 %v3900_v59, %v3870_v4 }
 0x23f   : > { %v3831_v9 = vadd.f32 %v3830_v27, %v7282_v3  ;;  %v3902_v22 = vadd.f32 %v3901_v43, %v3871_v7  ;;  %v3888_v27 = vmul.f32 %v7363_v42, %v7363_v42 }
 0x241   : > { %v3832_v61 = vadd.f32 %v3831_v9, %v7296_v26  ;;  %v3903_v14 = vadd.f32 %v3902_v22, %v3872_v49 }
 0x243   : > { %v3833_v13 = vadd.f32 %v3832_v61, %v7293_v21  ;;  %v3904_v51 = vadd.f32 %v3903_v14, %v3873_v29 }
 0x245   : > { %v3834_v1 = vadd.f32 %v3833_v13, %v7306_v28  ;;  %v3905_v20 = vadd.f32 %v3904_v51, %v3874_v56 }
 0x247   : > { %v3835_v25 = vadd.f32 %v3834_v1, %v7303_v5  ;;  %v3906_v45 = vadd.f32 %v3905_v20, %v3875_v31 }
 0x249   : > { %v3836_v34 = vadd.f32 %v3835_v25, %v7316_v39  ;;  %v3907_v53 = vadd.f32 %v3906_v45, %v3876_v58  ;;  %v3858_v25 = vld [vmem:[%s7507_s7] sm:$0x1] }
 0x24b   : > { %v3837_v3 = vadd.f32 %v3836_v34, %v7313_v48  ;;  %v3908_v40 = vadd.f32 %v3907_v53, %v3877_v36 }
 0x24d   : > { %v3838_v26 = vadd.f32 %v3837_v3, %v7326_v44  ;;  %v3909_v24 = vadd.f32 %v3908_v40, %v3878_v10 }
 0x24f   : > { %v3839_v21 = vadd.f32 %v3838_v26, %v7323_v46  ;;  %v3910_v18 = vadd.f32 %v3909_v24, %v3879_v52 }
 0x251   : > { %v3840_v28 = vadd.f32 %v3839_v21, %v7336_v2  ;;  %v3911_v12 = vadd.f32 %v3910_v18, %v3880_v6 }
 0x253   : > { %v3841_v5 = vadd.f32 %v3840_v28, %v7333_v33  ;;  %v3912_v17 = vadd.f32 %v3911_v12, %v3881_v62 }
 0x255   : > { %v3842_v39 = vadd.f32 %v3841_v5, %v7346_v23  ;;  %v3913_v50 = vadd.f32 %v3912_v17, %v3882_v37 }
 0x257   : > { %v3843_v48 = vadd.f32 %v3842_v39, %v7343_v0  ;;  %v3914_v16 = vadd.f32 %v3913_v50, %v3883_v41 }
 0x259   : > { %v3844_v44 = vadd.f32 %v3843_v48, %v7356_v30  ;;  %v3915_v54 = vadd.f32 %v3914_v16, %v3884_v57 }
 0x25b   : > { %v3845_v46 = vadd.f32 %v3844_v44, %v7353_v35  ;;  %v3916_v11 = vadd.f32 %v3915_v54, %v3885_v55  ;;  %v3890_v35 = vmul.f32 %v7373_v47, %v7373_v47 }
 0x25d   : > { %v3846_v2 = vadd.f32 %v3845_v46, %v7366_v60  ;;  %v3917_v15 = vadd.f32 %v3916_v11, %v3886_v8 }
 0x25f   : > { %v3847_v33 = vadd.f32 %v3846_v2, %v7363_v42  ;;  %v3918_v9 = vadd.f32 %v3917_v15, %v3887_v32  ;;  %v3818_v42 = vld [vmem:[%s7506_s6] sm:$0x1] }
 0x261   : > { %v3848_v23 = vadd.f32 %v3847_v33, %v7376_v63  ;;  %v3919_v38 = vadd.f32 %v3918_v9, %v3888_v27 }
 0x263   : > { %v3849_v0 = vadd.f32 %v3848_v23, %v7373_v47  ;;  %v3920_v7 = vadd.f32 %v3919_v38, %v3889_v19 }
 0x265   : > { %v3850_v30 = vrot.slane %v3849_v0, 4  ;;  %v3921_v59 = vadd.f32 %v3920_v7, %v3890_v35 }
 0x267   : > { %v3851_v4 = vadd.f32 %v3850_v30, %v3849_v0  ;;  %v3922_v49 = vrot.slane %v3921_v59, 4 }
 0x269   : > { %v3852_v61 = vrot.slane %v3851_v4, 2  ;;  %v3923_v1 = vadd.f32 %v3922_v49, %v3921_v59 }
 0x26b   : > { %v3853_v60 = vadd.f32 %v3852_v61, %v3851_v4  ;;  %v3924_v63 = vrot.slane %v3923_v1, 2 }
 0x26d   : > { %v3854_v13 = vrot.slane %v3853_v60, 1  ;;  %v3925_v47 = vadd.f32 %v3924_v63, %v3923_v1 }
 0x26f   : > { %v3855_v43 = vadd.f32 %v3854_v13, %v3853_v60  ;;  %v3926_v22 = vrot.slane %v3925_v47, 1 }
 0x271   : > { %v3856_v29 = vadd.f32 %v3855_v43, %v3818_v42  ;;  %v3927_v56 = vadd.f32 %v3926_v22, %v3925_v47 }
 0x273   : > { %3857 = vst [vmem:[%s7506_s6] sm:$0x1] %v3856_v29  ;;  %v3928_v14 = vadd.f32 %v3927_v56, %v3858_v25 }
 0x275   : > { %3929 = vst [vmem:[%s7507_s7] sm:$0x1] %v3928_v14 }
 0x276 PF: > { %s18_s24 = sadd.s32 1, %s5889_s24  }
 0x277   : > { %p15_p5 = scmp.ge.s32.totalorder %s18_s24, 4  }
 0x279   :  { %17 = sbr.rel (!%p15_p5) target bundleno = 1 (0x1), region = 98 }

// kernel: conv_block_forward.4
= control target key start
LH: loop header
LB: loop body
LE: loop exit
PB: predicated region body
PF: predicated region fallthrough
CT: control target
= control target key end

     0   :  { %s6213_s24 = smov 0   ;;  %s8087_s0 = inlined_call_operand.vmem [shape: f32[2,18,18,128], index: 0, kind: input, shape index: {}]   ;;  %s8088_s1 = inlined_call_operand.vmem [shape: f32[9,128,128], index: 1, kind: input, shape index: {}]   ;;  %s8089_s2 = inlined_call_operand.vmem [shape: f32[1,128], index: 2, kind: input, shape index: {}]   ;;  %s8090_s3 = inlined_call_operand.vmem [shape: f32[1,128], index: 3, kind: input, shape index: {}]   ;;  %s8091_s4 = inlined_call_operand.vmem [shape: f32[1,128], index: 4, kind: input, shape index: {}]   ;;  %s8092_s5 = inlined_call_operand.vmem [shape: f32[2,256,128], index: 5, kind: output, shape index: {0}]   ;;  %s8093_s6 = inlined_call_operand.vmem [shape: f32[1,128], index: 6, kind: output, shape index: {1}]   ;;  %s8094_s7 = inlined_call_operand.vmem [shape: f32[1,128], index: 7, kind: output, shape index: {2}]  }
   0x1 LB: > { %s6219_s25 = sadd.s32 4294967295, %s6169_s24   ;;  %p4253_p0 = scmp.ge.s32.totalorder %s6169_s24, 1  ;;  %s6169_s24 = sphi %s6213_s24, %s18_s24  }
   0x2   : > { %p232_p1 = scmp.lt.s32.totalorder %s6169_s24, 3 }
   0x4   : > { %p233_p2 = pnand %p4253_p0, %p232_p1 }
   0x6   : > { %236 = sbr.rel (%p233_p2) target bundleno = 630 (0x276), region = 40 }
   0xd   : > { %v644_v0 = vld [vmem:[%s8088_s1] sm:$0xff]  ;;  %v645_v1 = vld [vmem:[%s8088_s1 + $0x8] sm:$0xff]  ;;  %p264_p3 = scmp.lt.s32.totalorder %s6219_s25, 1  ;;  %v646_v5 = vld [vmem:[%s8088_s1 + $0x10] sm:$0xff]  ;;  %v8095_v7 = vmov 0.0   ;;  %v504_v18 = vlaneseq  ;;  %vm997_vm1 = vcmask 1046528  }
   0xe   : > { %v4338_v2 = vld [vmem:[%s8088_s1 + $0x200] sm:$0xff]  ;;  %v5590_v3 = vpack.c.bf16 %v645_v1, %v644_v0  ;;  %v4339_v4 = vld [vmem:[%s8088_s1 + $0x208] sm:$0xff]  ;;  %v647_v6 = vld [vmem:[%s8088_s1 + $0x18] sm:$0xff]  ;;  %4902 = vmatprep.mubr.f32.mxu1 %v8095_v7  ;;  %vm1448_vm3 = vcmask 1045504   ;;  %p4434_p4 = scmp.ne.s32.totalorder %s6219_s25, 0 }
   0xf   : > { %v6243_v8 = vpack.c.bf16 %v4339_v4, %v4338_v2  ;;  %v5594_v9 = vpack.c.bf16 %v647_v6, %v646_v5  ;;  %v4340_v10 = vld [vmem:[%s8088_s1 + $0x210] sm:$0xff]  ;;  %v4341_v11 = vld [vmem:[%s8088_s1 + $0x218] sm:$0xff]  ;;  %v648_v12 = vld [vmem:[%s8088_s1 + $0x20] sm:$0xff]  ;;  %s6255_s21 = scalar_select %p264_p3, %s6219_s25, 1  ;;  %v6298_v27 = vshrl.u32 %v504_v18, 7 }
  0x10   : > { %5591 = vmatprep.subr.bf16.mxu1 %v5590_v3  ;;  %v6257_v13 = vpack.c.bf16 %v4341_v11, %v4340_v10  ;;  %v649_v14 = vld [vmem:[%s8088_s1 + $0x28] sm:$0xff]  ;;  %v4342_v15 = vld [vmem:[%s8088_s1 + $0x220] sm:$0xff]  ;;  %v650_v20 = vld [vmem:[%s8088_s1 + $0x30] sm:$0xff] }
  0x11   : > { %8216 = vst [vmem:[#allocation3_spill] sm:$0xff] %v6243_v8  ;;  %v4343_v16 = vld [vmem:[%s8088_s1 + $0x228] sm:$0xff]  ;;  %5719 = vmatprep.subr.bf16.mxu0 %v6243_v8  ;;  %5593 = vmatpush3.bf16.msra.mxu1 %v5590_v3  ;;  %s6150_s30 = smul.u32 432, %s6255_s21  ;;  %v5598_v17 = vpack.c.bf16 %v649_v14, %v648_v12  ;;  %v651_v21 = vld [vmem:[%s8088_s1 + $0x38] sm:$0xff]  ;;  %v4344_v22 = vld [vmem:[%s8088_s1 + $0x230] sm:$0xff]  ;;  %v6330_v41 = vadd.s32 16, %v6298_v27 }
  0x12   : > { %8217 = vst [vmem:[#allocation4_spill] sm:$0xff] %v6257_v13  ;;  %5721 = vmatpush3.bf16.msra.mxu0 %v6243_v8  ;;  %5595 = vmatprep.subr.bf16.mxu1 %v5594_v9  ;;  %v6272_v19 = vpack.c.bf16 %v4343_v16, %v4342_v15  ;;  %v4345_v23 = vld [vmem:[%s8088_s1 + $0x238] sm:$0xff]  ;;  %v5602_v24 = vpack.c.bf16 %v651_v21, %v650_v20  ;;  %v652_v25 = vld [vmem:[%s8088_s1 + $0x40] sm:$0xff]  ;;  %v653_v26 = vld [vmem:[%s8088_s1 + $0x48] sm:$0xff]  ;;  %vm508_vm0 = vcmp.ge.s32.totalorder %v6298_v27, 1  ;;  %s4437_s10 = sshll.u32 %s6255_s21, 8 }
  0x13   : > { %5723 = vmatprep.subr.bf16.mxu0 %v6257_v13  ;;  %s6289_s18 = scalar_lea.vmem %s8087_s0, %s6150_s30  ;;  %v6301_v28 = vpack.c.bf16 %v4345_v23, %v4344_v22  ;;  %v4346_v29 = vld [vmem:[%s8088_s1 + $0x240] sm:$0xff]  ;;  %v4347_v30 = vld [vmem:[%s8088_s1 + $0x248] sm:$0xff]  ;;  %v5606_v38 = vpack.c.bf16 %v653_v26, %v652_v25  ;;  %v654_v39 = vld [vmem:[%s8088_s1 + $0x50] sm:$0xff]  ;;  %vm519_vm2 = vcmp.le.s32.totalorder %v6330_v41, 16  ;;  %s7806_s15 = scalar_lea.vmem %s8092_s5, %s4437_s10 }
  0x14   : > { %8218 = vst [vmem:[#allocation5_spill] sm:$0xff] %v6272_v19  ;;  %v277_v31 = vld [vmem:[%s6289_s18 + $0x18] sm:$0xff]  ;;  %v278_v32 = vld [vmem:[%s6289_s18 + $0x20] sm:$0xff]  ;;  %v279_v37 = vld [vmem:[%s6289_s18 + $0x28] sm:$0x3]  ;;  %v6334_v43 = vpack.c.bf16 %v4347_v30, %v4346_v29 }
  0x15   : > { %5597 = vmatpush3.bf16.msra.mxu1 %v5594_v9  ;;  %8219 = vst [vmem:[#allocation6_spill] sm:$0xff] %v6301_v28  ;;  %v6314_v33 = vld [vmem:[%s8090_s3] ss:$0 sm:$0xff]  ;;  %v280_v42 = vld [vmem:[%s6289_s18 + $0x30] sm:$0xff]  ;;  %v655_v44 = vld [vmem:[%s8088_s1 + $0x58] sm:$0xff] }
  0x16   : > { %5725 = vmatpush3.bf16.msra.mxu0 %v6257_v13  ;;  %5599 = vmatprep.subr.bf16.mxu1 %v5598_v17  ;;  %v6319_v34 = vld [vmem:[%s8091_s4] ss:$0 sm:$0xff]  ;;  %v339_v35 = vmul.f32 %v6314_v33, %v277_v31  ;;  %v340_v36 = vmul.f32 %v6314_v33, %v278_v32  ;;  %v341_v40 = vmul.f32 %v6314_v33, %v279_v37  ;;  %v281_v47 = vld [vmem:[%s6289_s18 + $0x38] sm:$0xff]  ;;  %v4348_v50 = vld [vmem:[%s8088_s1 + $0x250] sm:$0xff] }
  0x17   : > { %5727 = vmatprep.subr.bf16.mxu0 %v6272_v19  ;;  %8220 = vst [vmem:[#allocation7_spill] sm:$0xff] %v6334_v43  ;;  %v342_v48 = vmul.f32 %v6314_v33, %v280_v42  ;;  %v282_v49 = vld [vmem:[%s6289_s18 + $0x40] sm:$0x3]  ;;  %v4349_v51 = vld [vmem:[%s8088_s1 + $0x258] sm:$0xff]  ;;  %v343_v53 = vmul.f32 %v6314_v33, %v281_v47  ;;  %v283_v55 = vld [vmem:[%s6289_s18 + $0x48] sm:$0xff]  ;;  %v5610_v59 = vpack.c.bf16 %v655_v44, %v654_v39 }
  0x18   : > { %v399_v45 = vadd.f32 %v6319_v34, %v339_v35  ;;  %v400_v46 = vadd.f32 %v6319_v34, %v340_v36  ;;  %v401_v52 = vadd.f32 %v6319_v34, %v341_v40  ;;  %v344_v54 = vmul.f32 %v6314_v33, %v282_v49  ;;  %v656_v63 = vld [vmem:[%s8088_s1 + $0x60] sm:$0xff]  ;;  %v657_v0 = vld [vmem:[%s8088_s1 + $0x68] sm:$0xff]  ;;  %v284_v10 = vld [vmem:[%s6289_s18 + $0x50] sm:$0xff] }
  0x19   : > { %5601 = vmatpush3.bf16.msra.mxu1 %v5598_v17  ;;  %v402_v58 = vadd.f32 %v6319_v34, %v342_v48  ;;  %v6364_v62 = vpack.c.bf16 %v4349_v51, %v4348_v50  ;;  %v345_v3 = vmul.f32 %v6314_v33, %v283_v55  ;;  %v4350_v4 = vld [vmem:[%s8088_s1 + $0x260] sm:$0xff]  ;;  %v4351_v5 = vld [vmem:[%s8088_s1 + $0x268] sm:$0xff]  ;;  %v403_v9 = vadd.f32 %v6319_v34, %v343_v53  ;;  %v658_v11 = vld [vmem:[%s8088_s1 + $0x70] sm:$0xff] }
  0x1a   : > { %5729 = vmatpush3.bf16.msra.mxu0 %v6272_v19  ;;  %5603 = vmatprep.subr.bf16.mxu1 %v5602_v24  ;;  %v6355_v56 = vmax.f32 %v399_v45, 0.0  ;;  %v6357_v57 = vmax.f32 %v400_v46, 0.0  ;;  %v455_v60 = vmax.f32 %v401_v52, 0.0  ;;  %v404_v61 = vadd.f32 %v6319_v34, %v344_v54  ;;  %v659_v12 = vld [vmem:[%s8088_s1 + $0x78] sm:$0xff]  ;;  %v4352_v17 = vld [vmem:[%s8088_s1 + $0x270] sm:$0xff]  ;;  %v286_v23 = vld [vmem:[%s6289_s18 + $0x60] sm:$0xff] }
  0x1b   : > { %5731 = vmatprep.subr.bf16.mxu0 %v6301_v28  ;;  %8223 = vst [vmem:[#allocation10_spill] sm:$0xff] %v6364_v62  ;;  %v6394_v14 = vmax.f32 %v402_v58, 0.0  ;;  %v285_v15 = vld [vmem:[%s6289_s18 + $0x58] sm:$0x3]  ;;  %v5614_v16 = vpack.c.bf16 %v657_v0, %v656_v63  ;;  %v346_v25 = vmul.f32 %v6314_v33, %v284_v10  ;;  %v405_v26 = vadd.f32 %v6319_v34, %v345_v3  ;;  %v287_v29 = vld [vmem:[%s6289_s18 + $0x68] sm:$0xff]  ;;  %v4354_v45 = vld [vmem:[%s8088_s1 + $0x280] sm:$0xff] }
  0x1c   : > { %8221 = vst [vmem:[#allocation8_spill] sm:$0xff] %v6355_v56  ;;  %8222 = vst [vmem:[#allocation9_spill] sm:$0xff] %v6357_v57  ;;  %v6375_v1 = vsel %vm508_vm0, %v6355_v56, 0.0  ;;  %v1004_v2 = vrot.slane %v6357_v57, 1  ;;  %v4353_v18 = vld [vmem:[%s8088_s1 + $0x278] sm:$0xff]  ;;  %v6411_v21 = vsel %vm519_vm2, %v455_v60, 0.0  ;;  %v5618_v31 = vpack.c.bf16 %v659_v12, %v658_v11 }
  0x1d   : > { %5605 = vmatpush3.bf16.msra.mxu1 %v5602_v24  ;;  %v1003_v6 = vrot.slane %v6375_v1, 1  ;;  %8224 = vst [vmem:[#allocation11_spill] sm:$0xff] %v6394_v14  ;;  %v458_v22 = vmax.f32 %v404_v61, 0.0  ;;  %v6415_v24 = vpack.c.bf16 %v4351_v5, %v4350_v4  ;;  %v288_v30 = vld [vmem:[%s6289_s18 + $0x70] sm:$0x3]  ;;  %v6422_v32 = vmax.f32 %v403_v9, 0.0 }
  0x1e   : > { %5733 = vmatpush3.bf16.msra.mxu0 %v6301_v28  ;;  %5607 = vmatprep.subr.bf16.mxu1 %v5606_v38  ;;  %v347_v35 = vmul.f32 %v6314_v33, %v285_v15  ;;  %v289_v36 = vld [vmem:[%s6289_s18 + $0x78] sm:$0xff]  ;;  %v6426_v37 = vpack.c.bf16 %v4353_v18, %v4352_v17  ;;  %v1006_v39 = vrot.slane %v6411_v21, 1  ;;  %v6435_v40 = vsel %vm508_vm0, %v6394_v14, 0.0  ;;  %v4275_v44 = vld [vmem:[%s8088_s1 + $0x88] sm:$0xff]  ;;  %v290_v50 = vld [vmem:[%s6289_s18 + $0x80] sm:$0xff] }
  0x1f   : > { %5735 = vmatprep.subr.bf16.mxu0 %v6334_v43  ;;  %v6407_v20 = vsel %vm997_vm1, %v1003_v6, %v1004_v2  ;;  %8225 = vst [vmem:[#allocation12_spill] sm:$0xff] %v6415_v24  ;;  %8226 = vst [vmem:[#allocation13_spill] sm:$0xff] %v6422_v32  ;;  %v348_v42 = vmul.f32 %v6314_v33, %v286_v23  ;;  %v6447_v46 = vsel %vm519_vm2, %v458_v22, 0.0  ;;  %v4355_v51 = vld [vmem:[%s8088_s1 + $0x288] sm:$0xff]  ;;  %v4356_v52 = vld [vmem:[%s8088_s1 + $0x290] sm:$0xff]  ;;  %v6464_v55 = vmax.f32 %v405_v26, 0.0 }
  0x20   : > { %5222 = vmatprep.mubr.f32.mxu0 %v6407_v20  ;;  %8227 = vst [vmem:[#allocation14_spill] sm:$0xff] %v6426_v37  ;;  %v407_v47 = vadd.f32 %v6319_v34, %v347_v35  ;;  %v349_v48 = vmul.f32 %v6314_v33, %v287_v29  ;;  %v350_v49 = vmul.f32 %v6314_v33, %v288_v30  ;;  %v4357_v53 = vld [vmem:[%s8088_s1 + $0x298] sm:$0xff]  ;;  %v1008_v60 = vrot.slane %v6435_v40, 1  ;;  %v291_v3 = vld [vmem:[%s6289_s18 + $0x88] sm:$0x3]  ;;  %v4276_v5 = vld [vmem:[%s8088_s1 + $0x90] sm:$0xff] }
  0x21   : > { %5609 = vmatpush3.bf16.msra.mxu1 %v5606_v38  ;;  %v4274_v38 = vld [vmem:[%s8088_s1 + $0x80] sm:$0xff]  ;;  %v406_v54 = vadd.f32 %v6319_v34, %v346_v25  ;;  %8228 = vst [vmem:[#allocation15_spill] sm:$0xff] %v6464_v55  ;;  %v408_v58 = vadd.f32 %v6319_v34, %v348_v42  ;;  %v1009_v61 = vrot.slane %v6422_v32, 1  ;;  %v4277_v6 = vld [vmem:[%s8088_s1 + $0x98] sm:$0xff]  ;;  %v352_v11 = vmul.f32 %v6314_v33, %v290_v50  ;;  %v4359_v26 = vld [vmem:[%s8088_s1 + $0x2a8] sm:$0xff] }
  0x22   : > { %5737 = vmatpush3.bf16.msra.mxu0 %v6334_v43  ;;  %5611 = vmatprep.subr.bf16.mxu1 %v5610_v59  ;;  %v461_v63 = vmax.f32 %v407_v47, 0.0  ;;  %v409_v0 = vadd.f32 %v6319_v34, %v349_v48  ;;  %v5622_v4 = vpack.c.bf16 %v4275_v44, %v4274_v38  ;;  %v410_v10 = vadd.f32 %v6319_v34, %v350_v49  ;;  %v4358_v25 = vld [vmem:[%s8088_s1 + $0x2a0] sm:$0xff]  ;;  %v292_v38 = vld [vmem:[%s6289_s18 + $0x90] sm:$0xff]  ;;  %v295_v49 = vld [vmem:[%s6289_s18 + $0xa8] sm:$0xff] }
  0x23   : > { %5739 = vmatprep.subr.bf16.mxu0 %v6364_v62  ;;  %v6478_v9 = vmax.f32 %v408_v58, 0.0  ;;  %v5750_v12 = vpack.c.bf16 %v4355_v51, %v4354_v45  ;;  %v1011_v15 = vrot.slane %v6447_v46, 1  ;;  %v6491_v18 = vsel %vm997_vm1, %v1004_v2, %v1006_v39  ;;  %v293_v39 = vld [vmem:[%s6289_s18 + $0x98] sm:$0xff]  ;;  %v294_v48 = vld [vmem:[%s6289_s18 + $0xa0] sm:$0x3] }
  0x24   : > { %v6493_v22 = vmax.f32 %v406_v54, 0.0  ;;  %v6498_v23 = vsel %vm508_vm0, %v6464_v55, 0.0  ;;  %v353_v2 = vmul.f32 %v6314_v33, %v291_v3  ;;  %v6508_v29 = vsel %vm997_vm1, %v1008_v60, %v1009_v61  ;;  %v296_v60 = vld [vmem:[%s6289_s18 + $0xb0] sm:$0xff] }
  0x25   : > { %5613 = vmatpush3.bf16.msra.mxu1 %v5610_v59  ;;  %v351_v59 = vmul.f32 %v6314_v33, %v289_v36  ;;  %8229 = vst [vmem:[#allocation16_spill] sm:$0xff] %v6478_v9  ;;  %8231 = vst [vmem:[#allocation18_spill] sm:$0xff] %v6508_v29  ;;  %v6510_v30 = vpack.c.bf16 %v4277_v6, %v4276_v5  ;;  %v6514_v35 = vsel %vm519_vm2, %v461_v63, 0.0  ;;  %v6516_v36 = vmax.f32 %v409_v0, 0.0  ;;  %v4360_v0 = vld [vmem:[%s8088_s1 + $0x2b0] sm:$0xff] }
  0x26   : > { %5741 = vmatpush3.bf16.msra.mxu0 %v6364_v62  ;;  %5615 = vmatprep.subr.bf16.mxu1 %v5614_v16  ;;  %8230 = vst [vmem:[#allocation17_spill] sm:$0xff] %v6493_v22  ;;  %v6523_v42 = vsel %vm508_vm0, %v6478_v9, 0.0  ;;  %v464_v44 = vmax.f32 %v410_v10, 0.0  ;;  %v412_v45 = vadd.f32 %v6319_v34, %v352_v11  ;;  %v413_v47 = vadd.f32 %v6319_v34, %v353_v2  ;;  %v297_v6 = vld [vmem:[%s6289_s18 + $0xb8] sm:$0x3] }
  0x27   : > { %5743 = vmatprep.subr.bf16.mxu0 %v6415_v24  ;;  %v411_v17 = vadd.f32 %v6319_v34, %v351_v59  ;;  %8232 = vst [vmem:[#allocation19_spill] sm:$0xff] %v6516_v36  ;;  %v6531_v50 = vsel %vm997_vm1, %v1009_v61, %v1011_v15  ;;  %v6534_v51 = vpack.c.bf16 %v4359_v26, %v4358_v25  ;;  %v1016_v54 = vrot.slane %v6514_v35, 1  ;;  %v4361_v11 = vld [vmem:[%s8088_s1 + $0x2b8] sm:$0xff]  ;;  %v4279_v25 = vld [vmem:[%s8088_s1 + $0xa8] sm:$0xff] }
  0x28   : > { %v354_v58 = vmul.f32 %v6314_v33, %v292_v38  ;;  %v355_v59 = vmul.f32 %v6314_v33, %v293_v39  ;;  %v1018_v61 = vrot.slane %v6523_v42, 1  ;;  %v8097_v63 = vrot.slane %v6516_v36, 1 }
  0x29   : > { %5617 = vmatpush3.bf16.msra.mxu1 %v5614_v16  ;;  %v6484_v16 = vpack.c.bf16 %v4357_v53, %v4356_v52  ;;  %v6536_v52 = vmax.f32 %v411_v17, 0.0  ;;  %v1014_v53 = vrot.slane %v6493_v22, 1  ;;  %v356_v3 = vmul.f32 %v6314_v33, %v294_v48  ;;  %v4278_v17 = vld [vmem:[%s8088_s1 + $0xa0] sm:$0xff] }
  0x2a   : > { %5745 = vmatpush3.bf16.msra.mxu0 %v6415_v24  ;;  %5619 = vmatprep.subr.bf16.mxu1 %v5618_v31  ;;  %v357_v5 = vmul.f32 %v6314_v33, %v295_v49  ;;  %v6555_v10 = vsel %vm519_vm2, %v464_v44, 0.0  ;;  %v6560_v15 = vmax.f32 %v412_v45, 0.0  ;;  %v414_v26 = vadd.f32 %v6319_v34, %v354_v58  ;;  %v298_v49 = vld [vmem:[%s6289_s18 + $0xc0] sm:$0xff] }
  0x2b   : > { %5747 = vmatprep.subr.bf16.mxu0 %v6426_v37  ;;  %8233 = vst [vmem:[#allocation20_spill] sm:$0xff] %v6536_v52  ;;  %v6575_v2 = vsel %vm508_vm0, %v6536_v52, 0.0  ;;  %v415_v38 = vadd.f32 %v6319_v34, %v355_v59  ;;  %v416_v39 = vadd.f32 %v6319_v34, %v356_v3  ;;  %v358_v44 = vmul.f32 %v6314_v33, %v296_v60  ;;  %v4362_v3 = vld [vmem:[%s8088_s1 + $0x2c0] sm:$0xff] }
  0x2c   : > { %8234 = vst [vmem:[#allocation21_spill] sm:$0xff] %v6560_v15  ;;  %v6585_v45 = vmax.f32 %v414_v26, 0.0  ;;  %v359_v48 = vmul.f32 %v6314_v33, %v297_v6  ;;  %v6593_v58 = vsel %vm997_vm1, %v1014_v53, %v1016_v54  ;;  %v1021_v59 = vrot.slane %v6555_v10, 1 }
  0x2d   : > { %5621 = vmatpush3.bf16.msra.mxu1 %v5618_v31  ;;  %v1013_v31 = vrot.slane %v6498_v23, 1  ;;  %v5762_v60 = vpack.c.bf16 %v4361_v11, %v4360_v0  ;;  %v1023_v54 = vrot.slane %v6575_v2, 1  ;;  %v1024_v0 = vrot.slane %v6560_v15, 1  ;;  %v4280_v11 = vld [vmem:[%s8088_s1 + $0xb0] sm:$0xff] }
  0x2e   : > { %5749 = vmatpush3.bf16.msra.mxu0 %v6426_v37  ;;  %5623 = vmatprep.subr.bf16.mxu1 %v5622_v4  ;;  %8235 = vst [vmem:[#allocation22_spill] sm:$0xff] %v6585_v45  ;;  %v470_v26 = vmax.f32 %v416_v39, 0.0  ;;  %v6636_v24 = vsel %vm508_vm0, %v6585_v45, 0.0 }
  0x2f   : > { %5751 = vmatprep.subr.bf16.mxu0 %v5750_v12 }
  0x30   : > { %4903 = vmatmul.mubr.f32.vlgmr.msra.gmra.mrb[0].mxu1 %v8095_v7  ;;  %v418_v7 = vadd.f32 %v6319_v34, %v358_v44 }
  0x31   : > { %5223 = vmatmul.mubr.f32.vlgmr.msra.gmra.mrb[0].mxu0 %v6491_v18  ;;  %5625 = vmatpush3.bf16.msra.mxu1 %v5622_v4  ;;  %v467_v4 = vmax.f32 %v413_v47, 0.0  ;;  %v417_v47 = vadd.f32 %v6319_v34, %v357_v5  ;;  %v4363_v5 = vld [vmem:[%s8088_s1 + $0x2c8] sm:$0xff] }
  0x32   : > { %5753 = vmatpush3.bf16.msra.mxu0 %v5750_v12  ;;  %4905 = vmatprep.mubr.msk.f32.mxu1 %vm508_vm0, %v6355_v56  ;;  %v6583_v12 = vsel %vm997_vm1, %v1013_v31, %v1014_v53  ;;  %v5630_v31 = vpack.c.bf16 %v4279_v25, %v4278_v17  ;;  %v6609_v53 = vsel %vm997_vm1, %v1018_v61, %v8097_v63  ;;  %v4281_v17 = vld [vmem:[%s8088_s1 + $0xb8] sm:$0xff]  ;;  %v299_v25 = vld [vmem:[%s6289_s18 + $0xc8] sm:$0xff]  ;;  %v6626_v61 = vmax.f32 %v415_v38, 0.0  ;;  %v300_v63 = vld [vmem:[%s6289_s18 + $0xd0] sm:$0x3] }
  0x33   : > { %5225 = vmatprep.mubr.f32.mxu0 %v6508_v29  ;;  %5755 = vmatprep.subr.bf16.mxu0 %v6484_v16  ;;  %v6615_v6 = vsel %vm519_vm2, %v467_v4, 0.0  ;;  %v360_v4 = vmul.f32 %v6314_v33, %v298_v49  ;;  %v5766_v37 = vpack.c.bf16 %v4363_v5, %v4362_v3  ;;  %v419_v38 = vadd.f32 %v6319_v34, %v359_v48 }
  0x34   : > { %4906 = vmatmul.mubr.f32.gmra.mrb[2].mxu1 %v6357_v57  ;;  %5627 = vmatprep.subr.bf16.mxu1 %v6510_v30  ;;  %8236 = vst [vmem:[#allocation23_spill] sm:$0xff] %v6626_v61  ;;  %v5634_v39 = vpack.c.bf16 %v4281_v17, %v4280_v11  ;;  %v361_v44 = vmul.f32 %v6314_v33, %v299_v25  ;;  %v1026_v3 = vrot.slane %v6615_v6, 1  ;;  %v4282_v11 = vld [vmem:[%s8088_s1 + $0xc0] sm:$0xff]  ;;  %v4283_v17 = vld [vmem:[%s8088_s1 + $0xc8] sm:$0xff]  ;;  %v6670_v25 = vsel %vm519_vm2, %v470_v26, 0.0 }
  0x35   : > { %5226 = vmatmul.mubr.f32.gmra.mrb[2].mxu0 %v6531_v50  ;;  %4908 = vmatprep.mubr.msk.f32.mxu1 %vm508_vm0, %v6394_v14  ;;  %v420_v49 = vadd.f32 %v6319_v34, %v360_v4  ;;  %v6654_v48 = vsel %vm997_vm1, %v1023_v54, %v1024_v0  ;;  %v362_v5 = vmul.f32 %v6314_v33, %v300_v63  ;;  %v1029_v54 = vrot.slane %v6626_v61, 1  ;;  %v4364_v63 = vld [vmem:[%s8088_s1 + $0x2d0] sm:$0xff]  ;;  %v4365_v4 = vld [vmem:[%s8088_s1 + $0x2d8] sm:$0xff] }
  0x36   : > { %5757 = vmatpush3.bf16.msra.mxu0 %v6484_v16  ;;  %5228 = vmatprep.mubr.f32.mxu0 %v6583_v12  ;;  %v6638_v16 = vmax.f32 %v417_v47, 0.0  ;;  %v473_v62 = vmax.f32 %v419_v38, 0.0  ;;  %v421_v26 = vadd.f32 %v6319_v34, %v361_v44  ;;  %v5638_v19 = vpack.c.bf16 %v4283_v17, %v4282_v11 }
  0x37   : > { %5759 = vmatprep.subr.bf16.mxu0 %v6534_v51  ;;  %5629 = vmatpush3.bf16.msra.mxu1 %v6510_v30  ;;  %v8238_v30 = vrot.slane %v6516_v36, 1  ;;  %v422_v43 = vadd.f32 %v6319_v34, %v362_v5  ;;  %v6688_v28 = vmax.f32 %v420_v49, 0.0  ;;  %v1031_v38 = vrot.slane %v6670_v25, 1  ;;  %v4366_v5 = vld [vmem:[%s8088_s1 + $0x2e0] sm:$0xff] }
  0x38   : > { %8237 = vst [vmem:[#allocation24_spill] sm:$0xff] %v6638_v16  ;;  %4909 = vmatmul.mubr.f32.gmra.mrb[4].mxu1 %v6422_v32  ;;  %5631 = vmatprep.subr.bf16.mxu1 %v5630_v31 }
  0x39   : > { %5229 = vmatmul.mubr.f32.gmra.mrb[4].mxu0 %v6593_v58  ;;  %4911 = vmatprep.mubr.msk.f32.mxu1 %vm508_vm0, %v6464_v55  ;;  %v6651_v47 = vsel %vm997_vm1, %v8238_v30, %v1021_v59  ;;  %v1028_v59 = vrot.slane %v6636_v24, 1  ;;  %v6678_v30 = vmax.f32 %v418_v7, 0.0  ;;  %8240 = vst [vmem:[#allocation26_spill] sm:$0xff] %v6688_v28  ;;  %v5770_v7 = vpack.c.bf16 %v4365_v4, %v4364_v63  ;;  %v4284_v63 = vld [vmem:[%s8088_s1 + $0xd0] sm:$0xff] }
  0x3a   : > { %5761 = vmatpush3.bf16.msra.mxu0 %v6534_v51  ;;  %5231 = vmatprep.mubr.f32.mxu0 %v6609_v53  ;;  %v6683_v51 = vsel %vm508_vm0, %v6638_v16, 0.0  ;;  %v476_v17 = vmax.f32 %v422_v43, 0.0  ;;  %v6734_v43 = vsel %vm997_vm1, %v1029_v54, %v1031_v38  ;;  %v4369_v38 = vld [vmem:[%s8088_s1 + $0x2f8] sm:$0xff]  ;;  %v1455_v55 = vrot.slane %v6357_v57, 2 }
  0x3b   : > { %8239 = vst [vmem:[#allocation25_spill] sm:$0xff] %v6678_v30  ;;  %5763 = vmatprep.subr.bf16.mxu0 %v5762_v60  ;;  %5633 = vmatpush3.bf16.msra.mxu1 %v5630_v31  ;;  %v6696_v31 = vsel %vm997_vm1, %v1024_v0, %v1026_v3  ;;  %v1033_v44 = vrot.slane %v6683_v51, 1  ;;  %v1034_v49 = vrot.slane %v6678_v30, 1  ;;  %v6705_v11 = vsel %vm997_vm1, %v1028_v59, %v1029_v54  ;;  %v4367_v0 = vld [vmem:[%s8088_s1 + $0x2e8] sm:$0xff]  ;;  %v4285_v59 = vld [vmem:[%s8088_s1 + $0xd8] sm:$0xff]  ;;  %v4368_v54 = vld [vmem:[%s8088_s1 + $0x2f0] sm:$0xff] }
  0x3c   : > { %4912 = vmatmul.mubr.f32.gmra.mrb[6].mxu1 %v6493_v22  ;;  %5635 = vmatprep.subr.bf16.mxu1 %v5634_v39  ;;  %v6714_v3 = vmax.f32 %v421_v26, 0.0  ;;  %v5774_v4 = vpack.c.bf16 %v4367_v0, %v4366_v5  ;;  %v301_v26 = vld [vmem:[%s6289_s18 + $0xd8] sm:$0xff]  ;;  %v5642_v13 = vpack.c.bf16 %v4285_v59, %v4284_v63  ;;  %v4286_v5 = vld [vmem:[%s8088_s1 + $0xe0] sm:$0xff]  ;;  %v4287_v0 = vld [vmem:[%s8088_s1 + $0xe8] sm:$0xff] }
  0x3d   : > { %5232 = vmatmul.mubr.f32.gmra.mrb[6].mxu0 %v6651_v47  ;;  %4914 = vmatprep.mubr.msk.f32.mxu1 %vm508_vm0, %v6478_v9  ;;  %v6739_v56 = vsel %vm997_vm1, %v1033_v44, %v1034_v49  ;;  %v363_v44 = vmul.f32 %v6314_v33, %v301_v26  ;;  %v304_v59 = vld [vmem:[%s6289_s18 + $0xf0] sm:$0xff]  ;;  %v1454_v9 = vrot.slane %v6375_v1, 2 }
  0x3e   : > { %5765 = vmatpush3.bf16.msra.mxu0 %v5762_v60  ;;  %5234 = vmatprep.mubr.f32.mxu0 %v6654_v48  ;;  %v6709_v60 = vsel %vm519_vm2, %v473_v62, 0.0  ;;  %8241 = vst [vmem:[#allocation27_spill] sm:$0xff] %v6714_v3  ;;  %v6726_v62 = vsel %vm508_vm0, %v6688_v28, 0.0  ;;  %v366_v1 = vmul.f32 %v6314_v33, %v304_v59  ;;  %v1460_v59 = vrot.slane %v6422_v32, 2 }
  0x3f   : > { %5767 = vmatprep.subr.bf16.mxu0 %v5766_v37  ;;  %5637 = vmatpush3.bf16.msra.mxu1 %v5634_v39  ;;  %v1036_v39 = vrot.slane %v6709_v60, 1  ;;  %v1038_v8 = vrot.slane %v6726_v62, 1  ;;  %v1462_v32 = vrot.slane %v6447_v46, 2 }
  0x40   : > { %4915 = vmatmul.mubr.f32.gmra.mrb[8].mxu1 %v6516_v36  ;;  %5639 = vmatprep.subr.bf16.mxu1 %v5638_v19 }
  0x41   : > { %5235 = vmatmul.mubr.f32.gmra.mrb[8].mxu0 %v6696_v31  ;;  %4917 = vmatprep.mubr.msk.f32.mxu1 %vm508_vm0, %v6536_v52  ;;  %v1039_v52 = vrot.slane %v6714_v3, 1 }
  0x42   : > { %5769 = vmatpush3.bf16.msra.mxu0 %v5766_v37  ;;  %5237 = vmatprep.mubr.f32.mxu0 %v6705_v11  ;;  %v6745_v37 = vsel %vm519_vm2, %v476_v17, 0.0  ;;  %v6768_v17 = vsel %vm997_vm1, %v1034_v49, %v1036_v39  ;;  %v4371_v49 = vld [vmem:[%s8088_s1 + $0x308] sm:$0xff]  ;;  %v5646_v39 = vpack.c.bf16 %v4287_v0, %v4286_v5  ;;  %v6799_v5 = vsel %vm1448_vm3, %v1454_v9, %v1455_v55 }
  0x43   : > { %5771 = vmatprep.subr.bf16.mxu0 %v5770_v7  ;;  %5641 = vmatpush3.bf16.msra.mxu1 %v5638_v19  ;;  %v302_v19 = vld [vmem:[%s6289_s18 + $0xe0] sm:$0xff]  ;;  %v1041_v63 = vrot.slane %v6745_v37, 1  ;;  %v6773_v26 = vsel %vm997_vm1, %v1038_v8, %v1039_v52  ;;  %8243 = vst [vmem:[#allocation29_spill] sm:$0xff] %v6799_v5 }
  0x44   : > { %4918 = vmatmul.mubr.f32.gmra.mrb[10].mxu1 %v6560_v15  ;;  %5643 = vmatprep.subr.bf16.mxu1 %v5642_v13  ;;  %v364_v8 = vmul.f32 %v6314_v33, %v302_v19  ;;  %v307_v19 = vld [vmem:[%s6289_s18 + $0x108] sm:$0xff] }
  0x45   : > { %5238 = vmatmul.mubr.f32.gmra.mrb[10].mxu0 %v6734_v43  ;;  %4920 = vmatprep.mubr.msk.f32.mxu1 %vm508_vm0, %v6585_v45  ;;  %v5778_v45 = vpack.c.bf16 %v4369_v38, %v4368_v54  ;;  %v305_v54 = vld [vmem:[%s6289_s18 + $0xf8] sm:$0xff]  ;;  %v1457_v38 = vrot.slane %v6411_v21, 2  ;;  %v6795_v57 = vsel %vm997_vm1, %v1039_v52, %v1041_v63  ;;  %v4288_v21 = vld [vmem:[%s8088_s1 + $0xf0] sm:$0xff] }
  0x46   : > { %5773 = vmatpush3.bf16.msra.mxu0 %v5770_v7  ;;  %5240 = vmatprep.mubr.f32.mxu0 %v6739_v56  ;;  %v4370_v7 = vld [vmem:[%s8088_s1 + $0x300] sm:$0xff]  ;;  %8242 = vst [vmem:[#allocation28_spill] sm:$0xff] %v6795_v57  ;;  %v4289_v52 = vld [vmem:[%s8088_s1 + $0xf8] sm:$0xff]  ;;  %v424_v9 = vadd.f32 %v6319_v34, %v364_v8  ;;  %v369_v8 = vmul.f32 %v6314_v33, %v307_v19 }
  0x47   : > { %5775 = vmatprep.subr.bf16.mxu0 %v5774_v4  ;;  %5645 = vmatpush3.bf16.msra.mxu1 %v5642_v13  ;;  %v423_v13 = vadd.f32 %v6319_v34, %v363_v44  ;;  %v5782_v0 = vpack.c.bf16 %v4371_v49, %v4370_v7  ;;  %v1459_v44 = vrot.slane %v6435_v40, 2  ;;  %v4372_v40 = vld [vmem:[%s8088_s1 + $0x310] sm:$0xff]  ;;  %v4373_v63 = vld [vmem:[%s8088_s1 + $0x318] sm:$0xff]  ;;  %v426_v49 = vadd.f32 %v6319_v34, %v366_v1 }
  0x48   : > { %4921 = vmatmul.mubr.f32.gmra.mrb[12].mxu1 %v6626_v61  ;;  %5647 = vmatprep.subr.bf16.mxu1 %v5646_v39  ;;  %v5650_v14 = vpack.c.bf16 %v4289_v52, %v4288_v21  ;;  %v1465_v1 = vrot.slane %v6493_v22, 2  ;;  %v5786_v19 = vpack.c.bf16 %v4373_v63, %v4372_v40  ;;  %v311_v52 = vld [vmem:[%s6289_s18 + $0x128] sm:$0xff]  ;;  %v6866_v40 = vsel %vm1448_vm3, %v1460_v59, %v1462_v32 }
  0x49   : > { %5241 = vmatmul.mubr.f32.gmra.mrb[12].mxu0 %v6768_v17  ;;  %4923 = vmatprep.mubr.msk.f32.mxu1 %vm508_vm0, %v6638_v16  ;;  %v6822_v7 = vmax.f32 %v423_v13, 0.0  ;;  %v6829_v16 = vsel %vm1448_vm3, %v1455_v55, %v1457_v38  ;;  %v1464_v13 = vrot.slane %v6498_v23, 2  ;;  %v4374_v38 = vld [vmem:[%s8088_s1 + $0x320] sm:$0xff]  ;;  %v4375_v23 = vld [vmem:[%s8088_s1 + $0x328] sm:$0xff]  ;;  %8249 = vst [vmem:[#allocation35_spill] sm:$0xff] %v6866_v40  ;;  %v1467_v63 = vrot.slane %v6514_v35, 2 }
  0x4a   : > { %5777 = vmatpush3.bf16.msra.mxu0 %v5774_v4  ;;  %5243 = vmatprep.mubr.f32.mxu0 %v6773_v26  ;;  %v367_v4 = vmul.f32 %v6314_v33, %v305_v54  ;;  %v308_v54 = vld [vmem:[%s6289_s18 + $0x110] sm:$0xff]  ;;  %8245 = vst [vmem:[#allocation31_spill] sm:$0xff] %v6829_v16  ;;  %v373_v35 = vmul.f32 %v6314_v33, %v311_v52  ;;  %v1472_v52 = vrot.slane %v6555_v10, 2 }
  0x4b   : > { %5779 = vmatprep.subr.bf16.mxu0 %v5778_v45  ;;  %8244 = vst [vmem:[#allocation30_spill] sm:$0xff] %v6822_v7  ;;  %5649 = vmatpush3.bf16.msra.mxu1 %v5646_v39  ;;  %v370_v46 = vmul.f32 %v6314_v33, %v308_v54  ;;  %v6853_v39 = vmax.f32 %v426_v49, 0.0  ;;  %v313_v49 = vld [vmem:[%s6289_s18 + $0x138] sm:$0xff]  ;;  %v1470_v54 = vrot.slane %v6516_v36, 2 }
  0x4c   : > { %4924 = vmatmul.mubr.f32.gmra.mrb[14].mxu1 %v6678_v30  ;;  %v427_v55 = vadd.f32 %v6319_v34, %v367_v4  ;;  %5651 = vmatprep.subr.bf16.mxu1 %v5650_v14  ;;  %v4291_v4 = vld [vmem:[%s8088_s1 + $0x108] sm:$0xff] }
  0x4d   : > { %5244 = vmatmul.mubr.f32.gmra.mrb[14].mxu0 %v6795_v57  ;;  %4926 = vmatprep.mubr.msk.f32.mxu1 %vm508_vm0, %v6688_v28  ;;  %v310_v57 = vld [vmem:[%s6289_s18 + $0x120] sm:$0xff]  ;;  %v6834_v28 = vsel %vm1448_vm3, %v1459_v44, %v1460_v59  ;;  %8248 = vst [vmem:[#allocation34_spill] sm:$0xff] %v6853_v39  ;;  %v429_v44 = vadd.f32 %v6319_v34, %v369_v8  ;;  %v1469_v8 = vrot.slane %v6523_v42, 2  ;;  %v4376_v59 = vld [vmem:[%s8088_s1 + $0x330] sm:$0xff]  ;;  %v4377_v42 = vld [vmem:[%s8088_s1 + $0x338] sm:$0xff] }
  0x4e   : > { %5781 = vmatpush3.bf16.msra.mxu0 %v5778_v45  ;;  %5302 = vmatprep.mubr.f32.mxu0 %v6799_v5  ;;  %8246 = vst [vmem:[#allocation32_spill] sm:$0xff] %v6834_v28  ;;  %v6839_v45 = vmax.f32 %v424_v9, 0.0  ;;  %v372_v21 = vmul.f32 %v6314_v33, %v310_v57  ;;  %v4290_v9 = vld [vmem:[%s8088_s1 + $0x100] sm:$0xff]  ;;  %v6871_v57 = vsel %vm1448_vm3, %v1464_v13, %v1465_v1 }
  0x4f   : > { %5783 = vmatprep.subr.bf16.mxu0 %v5782_v0  ;;  %8250 = vst [vmem:[#allocation36_spill] sm:$0xff] %v6871_v57  ;;  %5653 = vmatpush3.bf16.msra.mxu1 %v5650_v14  ;;  %v430_v32 = vadd.f32 %v6319_v34, %v370_v46  ;;  %v6886_v13 = vpack.c.bf16 %v4291_v4, %v4290_v9  ;;  %v6892_v14 = vmax.f32 %v429_v44, 0.0  ;;  %v316_v9 = vld [vmem:[%s6289_s18 + $0x150] sm:$0xff]  ;;  %v1474_v44 = vrot.slane %v6575_v2, 2  ;;  %v4378_v2 = vld [vmem:[%s8088_s1 + $0x340] sm:$0xff] }
  0x50   : > { %4927 = vmatmul.mubr.f32.gmra.mrb[16].mxu1 %v6714_v3  ;;  %8247 = vst [vmem:[#allocation33_spill] sm:$0xff] %v6839_v45  ;;  %v375_v46 = vmul.f32 %v6314_v33, %v313_v49  ;;  %v6904_v4 = vsel %vm1448_vm3, %v1469_v8, %v1470_v54  ;;  %v5794_v49 = vpack.c.bf16 %v4377_v42, %v4376_v59  ;;  %v4379_v8 = vld [vmem:[%s8088_s1 + $0x348] sm:$0xff]  ;;  %v317_v42 = vld [vmem:[%s6289_s18 + $0x158] sm:$0xff] }
  0x51   : > { %5303 = vmatmul.mubr.f32.vlgmr.msra.gmra.mrb[0].mxu0 %v6829_v16  ;;  %4929 = vmatprep.mubr.msk.f32.mxu1 %vm508_vm0, %v6822_v7  ;;  %v5790_v16 = vpack.c.bf16 %v4375_v23, %v4374_v38  ;;  %8252 = vst [vmem:[#allocation38_spill] sm:$0xff] %v6892_v14  ;;  %v314_v38 = vld [vmem:[%s6289_s18 + $0x140] sm:$0xff]  ;;  %v6899_v23 = vsel %vm1448_vm3, %v1465_v1, %v1467_v63  ;;  %8254 = vst [vmem:[#allocation40_spill] sm:$0xff] %v6904_v4  ;;  %v6910_v1 = vmax.f32 %v430_v32, 0.0  ;;  %v303_v63 = vld [vmem:[%s6289_s18 + $0xe8] sm:$0x3] }
  0x52   : > { %5785 = vmatpush3.bf16.msra.mxu0 %v5782_v0  ;;  %5305 = vmatprep.mubr.f32.mxu0 %v6834_v28  ;;  %v6876_v0 = vmax.f32 %v427_v55, 0.0  ;;  %v432_v55 = vadd.f32 %v6319_v34, %v372_v21  ;;  %8253 = vst [vmem:[#allocation39_spill] sm:$0xff] %v6899_v23  ;;  %v1475_v21 = vrot.slane %v6560_v15, 2  ;;  %v376_v10 = vmul.f32 %v6314_v33, %v314_v38 }
  0x53   : > { %5787 = vmatprep.subr.bf16.mxu0 %v5786_v19  ;;  %5655 = vmatprep.subr.bf16.mxu1 %v6886_v13  ;;  %8255 = vst [vmem:[#allocation41_spill] sm:$0xff] %v6910_v1  ;;  %v378_v59 = vmul.f32 %v6314_v33, %v316_v9  ;;  %v6932_v38 = vsel %vm1448_vm3, %v1470_v54, %v1472_v52  ;;  %v4380_v52 = vld [vmem:[%s8088_s1 + $0x350] sm:$0xff] }
  0x54   : > { %4930 = vmatmul.mubr.f32.gmra.mrb[18].mxu1 %v6839_v45  ;;  %8251 = vst [vmem:[#allocation37_spill] sm:$0xff] %v6876_v0  ;;  %v6925_v32 = vmax.f32 %v432_v55, 0.0  ;;  %8257 = vst [vmem:[#allocation43_spill] sm:$0xff] %v6932_v38  ;;  %v319_v55 = vld [vmem:[%s6289_s18 + $0x168] sm:$0xff]  ;;  %v6939_v28 = vsel %vm1448_vm3, %v1474_v44, %v1475_v21  ;;  %v5798_v9 = vpack.c.bf16 %v4379_v8, %v4378_v2  ;;  %v4381_v44 = vld [vmem:[%s8088_s1 + $0x358] sm:$0xff] }
  0x55   : > { %5306 = vmatmul.mubr.f32.gmra.mrb[2].mxu0 %v6866_v40  ;;  %4932 = vmatprep.mubr.msk.f32.mxu1 %vm508_vm0, %v6853_v39  ;;  %v1480_v40 = vrot.slane %v6626_v61, 2  ;;  %8258 = vst [vmem:[#allocation44_spill] sm:$0xff] %v6939_v28  ;;  %v381_v2 = vmul.f32 %v6314_v33, %v319_v55  ;;  %v320_v8 = vld [vmem:[%s6289_s18 + $0x170] sm:$0xff]  ;;  %v309_v55 = vld [vmem:[%s6289_s18 + $0x118] sm:$0x3]  ;;  %v5802_v5 = vpack.c.bf16 %v4381_v44, %v4380_v52  ;;  %v1490_v52 = vrot.slane %v6714_v3, 2 }
  0x56   : > { %5308 = vmatprep.mubr.f32.mxu0 %v6871_v57  ;;  %5789 = vmatpush3.bf16.msra.mxu0 %v5786_v19  ;;  %v433_v19 = vadd.f32 %v6319_v34, %v373_v35  ;;  %8256 = vst [vmem:[#allocation42_spill] sm:$0xff] %v6925_v32  ;;  %v435_v35 = vadd.f32 %v6319_v34, %v375_v46  ;;  %v1477_v57 = vrot.slane %v6615_v6, 2  ;;  %v7004_v44 = vsel %vm508_vm0, %v6822_v7, 0.0 }
  0x57   : > { %5791 = vmatprep.subr.bf16.mxu0 %v5790_v16  ;;  %v365_v46 = vmul.f32 %v6314_v33, %v303_v63  ;;  %v436_v6 = vadd.f32 %v6319_v34, %v376_v10  ;;  %v1482_v10 = vrot.slane %v6670_v25, 2  ;;  %v438_v63 = vadd.f32 %v6319_v34, %v378_v59 }
  0x58   : > { %4933 = vmatmul.mubr.f32.gmra.mrb[20].mxu1 %v6876_v0  ;;  %v6943_v54 = vmax.f32 %v433_v19, 0.0  ;;  %v6958_v19 = vmax.f32 %v435_v35, 0.0  ;;  %v1485_v35 = vrot.slane %v6678_v30, 2 }
  0x59   : > { %5309 = vmatmul.mubr.f32.gmra.mrb[4].mxu0 %v6899_v23  ;;  %4935 = vmatprep.mubr.msk.f32.mxu1 %vm508_vm0, %v6892_v14  ;;  %v1479_v23 = vrot.slane %v6636_v24, 2  ;;  %v306_v24 = vld [vmem:[%s6289_s18 + $0x100] sm:$0x3]  ;;  %v425_v25 = vadd.f32 %v6319_v34, %v365_v46  ;;  %v6994_v46 = vmax.f32 %v438_v63, 0.0 }
  0x5a   : > { %5311 = vmatprep.mubr.f32.mxu0 %v6904_v4  ;;  %5793 = vmatpush3.bf16.msra.mxu0 %v5790_v16  ;;  %8259 = vst [vmem:[#allocation45_spill] sm:$0xff] %v6943_v54  ;;  %v379_v16 = vmul.f32 %v6314_v33, %v317_v42  ;;  %8260 = vst [vmem:[#allocation46_spill] sm:$0xff] %v6958_v19  ;;  %v6966_v42 = vsel %vm1448_vm3, %v1475_v21, %v1477_v57  ;;  %v1484_v4 = vrot.slane %v6683_v51, 2  ;;  %v4382_v51 = vld [vmem:[%s8088_s1 + $0x360] sm:$0xff]  ;;  %v4383_v21 = vld [vmem:[%s8088_s1 + $0x368] sm:$0xff] }
  0x5b   : > { %5795 = vmatprep.subr.bf16.mxu0 %v5794_v49  ;;  %8261 = vst [vmem:[#allocation47_spill] sm:$0xff] %v6966_v42  ;;  %v368_v59 = vmul.f32 %v6314_v33, %v306_v24  ;;  %8265 = vst [vmem:[#allocation51_spill] sm:$0xff] %v6994_v46  ;;  %v1489_v24 = vrot.slane %v6726_v62, 2 }
  0x5c   : > { %4936 = vmatmul.mubr.f32.gmra.mrb[22].mxu1 %v6910_v1  ;;  %v439_v57 = vadd.f32 %v6319_v34, %v379_v16  ;;  %v441_v16 = vadd.f32 %v6319_v34, %v381_v2  ;;  %v5806_v2 = vpack.c.bf16 %v4383_v21, %v4382_v51  ;;  %v7041_v21 = vsel %vm508_vm0, %v6853_v39, 0.0 }
  0x5d   : > { %5312 = vmatmul.mubr.f32.gmra.mrb[6].mxu0 %v6932_v38  ;;  %4938 = vmatprep.mubr.msk.f32.mxu1 %vm508_vm0, %v6925_v32  ;;  %v6969_v38 = vsel %vm1448_vm3, %v1479_v23, %v1480_v40  ;;  %v382_v23 = vmul.f32 %v6314_v33, %v320_v8  ;;  %v428_v63 = vadd.f32 %v6319_v34, %v368_v59  ;;  %v1492_v59 = vrot.slane %v6745_v37, 2 }
  0x5e   : > { %5314 = vmatprep.mubr.f32.mxu0 %v6939_v28  ;;  %8262 = vst [vmem:[#allocation48_spill] sm:$0xff] %v6969_v38  ;;  %5797 = vmatpush3.bf16.msra.mxu0 %v5794_v49  ;;  %v6977_v28 = vmax.f32 %v436_v6, 0.0  ;;  %v6992_v49 = vsel %vm1448_vm3, %v1480_v40, %v1482_v10  ;;  %v1487_v6 = vrot.slane %v6709_v60, 2  ;;  %v371_v40 = vmul.f32 %v6314_v33, %v309_v55 }
  0x5f   : > { %5799 = vmatprep.subr.bf16.mxu0 %v5798_v9  ;;  %8264 = vst [vmem:[#allocation50_spill] sm:$0xff] %v6992_v49  ;;  %v7008_v10 = vsel %vm1448_vm3, %v1484_v4, %v1485_v35  ;;  %v479_v60 = vmax.f32 %v425_v25, 0.0  ;;  %v7012_v62 = vmax.f32 %v439_v57, 0.0  ;;  %v442_v8 = vadd.f32 %v6319_v34, %v382_v23  ;;  %v4385_v4 = vld [vmem:[%s8088_s1 + $0x378] sm:$0xff] }
  0x60   : > { %4939 = vmatmul.mubr.f32.gmra.mrb[24].mxu1 %v6943_v54  ;;  %8263 = vst [vmem:[#allocation49_spill] sm:$0xff] %v6977_v28  ;;  %8266 = vst [vmem:[#allocation52_spill] sm:$0xff] %v7008_v10  ;;  %v7026_v25 = vmax.f32 %v441_v16, 0.0  ;;  %v1494_v55 = vrot.slane %v7004_v44, 2  ;;  %v1495_v57 = vrot.slane %v6839_v45, 2  ;;  %v7033_v23 = vsel %vm1448_vm3, %v1485_v35, %v1487_v6 }
  0x61   : > { %5315 = vmatmul.mubr.f32.gmra.mrb[8].mxu0 %v6966_v42  ;;  %4941 = vmatprep.mubr.msk.f32.mxu1 %vm508_vm0, %v6958_v19  ;;  %8267 = vst [vmem:[#allocation53_spill] sm:$0xff] %v7012_v62  ;;  %8269 = vst [vmem:[#allocation55_spill] sm:$0xff] %v7033_v23  ;;  %v7036_v51 = vsel %vm1448_vm3, %v1489_v24, %v1490_v52  ;;  %v431_v37 = vadd.f32 %v6319_v34, %v371_v40  ;;  %v7046_v16 = vsel %vm519_vm2, %v479_v60, 0.0  ;;  %v315_v24 = vld [vmem:[%s6289_s18 + $0x148] sm:$0x3]  ;;  %v4401_v42 = vld [vmem:[%s8088_s1 + $0x380] sm:$0xff] }
  0x62   : > { %5317 = vmatprep.mubr.f32.mxu0 %v6969_v38  ;;  %5801 = vmatpush3.bf16.msra.mxu0 %v5798_v9  ;;  %v312_v38 = vld [vmem:[%s6289_s18 + $0x130] sm:$0x3]  ;;  %8268 = vst [vmem:[#allocation54_spill] sm:$0xff] %v7026_v25  ;;  %8270 = vst [vmem:[#allocation56_spill] sm:$0xff] %v7036_v51  ;;  %v7050_v6 = vmax.f32 %v442_v8, 0.0  ;;  %v8273_v40 = vmov 0.0   ;;  %v377_v7 = vmul.f32 %v6314_v33, %v315_v24 }
  0x63   : > { %5803 = vmatprep.subr.bf16.mxu0 %v5802_v5  ;;  %v4384_v9 = vld [vmem:[%s8088_s1 + $0x370] sm:$0xff]  ;;  %v7067_v60 = vrot.slane %v8273_v40, 1  ;;  %v1500_v8 = vrot.slane %v6876_v0, 2  ;;  %v318_v40 = vld [vmem:[%s6289_s18 + $0x160] sm:$0x3] }
  0x64   : > { %4942 = vmatmul.mubr.f32.gmra.mrb[26].mxu1 %v6977_v28  ;;  %v5810_v35 = vpack.c.bf16 %v4385_v4, %v4384_v9  ;;  %8271 = vst [vmem:[#allocation57_spill] sm:$0xff] %v7050_v6  ;;  %v1497_v9 = vrot.slane %v7046_v16, 2  ;;  %v1499_v4 = vrot.slane %v7041_v21, 2 }
  0x65   : > { %5318 = vmatmul.mubr.f32.gmra.mrb[10].mxu0 %v6992_v49  ;;  %4944 = vmatprep.mubr.msk.f32.mxu1 %vm508_vm0, %v6994_v46  ;;  %v482_v49 = vmax.f32 %v428_v63, 0.0  ;;  %8274 = vst [vmem:[#allocation59_spill] sm:$0xff] %v7067_v60  ;;  %v7070_v63 = vsel %vm1448_vm3, %v1494_v55, %v1495_v57  ;;  %v4293_v55 = vld [vmem:[%s8088_s1 + $0x118] sm:$0xff] }
  0x66   : > { %5320 = vmatprep.mubr.f32.mxu0 %v7008_v10  ;;  %5805 = vmatpush3.bf16.msra.mxu0 %v5802_v5  ;;  %v374_v10 = vmul.f32 %v6314_v33, %v312_v38  ;;  %v4402_v5 = vld [vmem:[%s8088_s1 + $0x388] sm:$0xff]  ;;  %v7064_v38 = vsel %vm1448_vm3, %v1490_v52, %v1492_v59  ;;  %8275 = vst [vmem:[#allocation60_spill] sm:$0xff] %v7070_v63  ;;  %v7079_v52 = vsel %vm508_vm0, %v6892_v14, 0.0  ;;  %v4292_v59 = vld [vmem:[%s8088_s1 + $0x110] sm:$0xff] }
  0x67   : > { %5807 = vmatprep.subr.bf16.mxu0 %v5806_v2  ;;  %8272 = vst [vmem:[#allocation58_spill] sm:$0xff] %v7064_v38  ;;  %v7093_v14 = vpack.c.bf16 %v4402_v5, %v4401_v42  ;;  %v7103_v33 = vsel %vm1448_vm3, %v1495_v57, %v1497_v9  ;;  %v4294_v57 = vld [vmem:[%s8088_s1 + $0x120] sm:$0xff]  ;;  %v4295_v9 = vld [vmem:[%s8088_s1 + $0x128] sm:$0xff] }
  0x68   : > { %4945 = vmatmul.mubr.f32.gmra.mrb[28].mxu1 %v7012_v62  ;;  %v434_v39 = vadd.f32 %v6319_v34, %v374_v10  ;;  %8276 = vst [vmem:[#allocation61_spill] sm:$0xff] %v7103_v33  ;;  %v7106_v34 = vsel %vm1448_vm3, %v1499_v4, %v1500_v8  ;;  %v7112_v10 = vsel %vm508_vm0, %v6925_v32, 0.0  ;;  %v7127_v4 = vld [vmem:[%s8091_s4] ss:$0 sm:$0xff] }
  0x69   : > { %5321 = vmatmul.mubr.f32.gmra.mrb[12].mxu0 %v7033_v23  ;;  %4947 = vmatprep.mubr.msk.f32.mxu1 %vm508_vm0, %v7026_v25  ;;  %v485_v23 = vmax.f32 %v431_v37, 0.0  ;;  %v1505_v37 = vrot.slane %v6910_v1, 2  ;;  %8277 = vst [vmem:[#allocation62_spill] sm:$0xff] %v7106_v34 }
  0x6a   : > { %5323 = vmatprep.mubr.f32.mxu0 %v7036_v51  ;;  %5809 = vmatpush3.bf16.msra.mxu0 %v5806_v2  ;;  %v7089_v51 = vsel %vm519_vm2, %v482_v49, 0.0  ;;  %v1504_v2 = vrot.slane %v7079_v52, 2  ;;  %v5658_v49 = vpack.c.bf16 %v4293_v55, %v4292_v59  ;;  %v488_v5 = vmax.f32 %v434_v39, 0.0  ;;  %v321_v59 = vld [vmem:[%s6289_s18 + $0x178] sm:$0x3] }
  0x6b   : > { %5811 = vmatprep.subr.bf16.mxu0 %v5810_v35  ;;  %v1502_v42 = vrot.slane %v7089_v51, 2  ;;  %v7116_v24 = vsel %vm519_vm2, %v485_v23, 0.0  ;;  %v6162_v23 = vld [vmem:[%s8090_s3] ss:$0 sm:$0xff] }
  0x6c   : > { %4948 = vmatmul.mubr.f32.gmra.mrb[30].mxu1 %v7050_v6  ;;  %v380_v39 = vmul.f32 %v6162_v23, %v318_v40  ;;  %v7139_v55 = vsel %vm1448_vm3, %v1504_v2, %v1505_v37  ;;  %v5662_v2 = vpack.c.bf16 %v4295_v9, %v4294_v57  ;;  %v324_v9 = vld [vmem:[%s6289_s18 + $0x190] sm:$0x3] }
  0x6d   : > { %5324 = vmatmul.mubr.f32.gmra.mrb[14].mxu0 %v7064_v38  ;;  %4982 = vmatprep.mubr.f32.mxu1 %v7067_v60  ;;  %8278 = vst [vmem:[#allocation63_spill] sm:$0xff] %v7139_v55  ;;  %v322_v38 = vld [vmem:[%s6289_s18 + $0x180] sm:$0xff]  ;;  %v7147_v40 = vsel %vm1448_vm3, %v1500_v8, %v1502_v42  ;;  %v4296_v8 = vld [vmem:[%s8088_s1 + $0x130] sm:$0xff]  ;;  %v4297_v42 = vld [vmem:[%s8088_s1 + $0x138] sm:$0xff] }
  0x6e   : > { %5326 = vmatprep.mubr.f32.mxu0 %v7070_v63  ;;  %5813 = vmatpush3.bf16.msra.mxu0 %v5810_v35  ;;  %v437_v35 = vadd.f32 %v7127_v4, %v377_v7  ;;  %v1509_v63 = vrot.slane %v7112_v10, 2  ;;  %v1510_v7 = vrot.slane %v6943_v54, 2  ;;  %8279 = vst [vmem:[#allocation64_spill] sm:$0xff] %v7147_v40  ;;  %v440_v32 = vadd.f32 %v7127_v4, %v380_v39 }
  0x6f   : > { %5815 = vmatprep.subr.bf16.mxu0 %v7093_v14  ;;  %v384_v57 = vmul.f32 %v6162_v23, %v322_v38  ;;  %v1515_v39 = vrot.slane %v6977_v28, 2 }
  0x70   : > { %4983 = vmatmul.mubr.f32.vlgmr.msra.gmra.mrb[0].mxu1 %v7067_v60  ;;  %v1507_v60 = vrot.slane %v7116_v24, 2  ;;  %v494_v3 = vmax.f32 %v440_v32, 0.0 }
  0x71   : > { %5327 = vmatmul.mubr.f32.gmra.mrb[16].mxu0 %v7103_v33  ;;  %5657 = vmatpush3.bf16.msra.mxu1 %v6886_v13  ;;  %v7153_v13 = vsel %vm508_vm0, %v6958_v19, 0.0  ;;  %v7157_v33 = vsel %vm519_vm2, %v488_v5, 0.0  ;;  %v323_v19 = vld [vmem:[%s6289_s18 + $0x188] sm:$0xff]  ;;  %v7172_v5 = vsel %vm1448_vm3, %v1509_v63, %v1510_v7 }
  0x72   : > { %4985 = vmatprep.mubr.f32.mxu1 %v6407_v20  ;;  %5329 = vmatprep.mubr.f32.mxu0 %v7106_v34  ;;  %v491_v20 = vmax.f32 %v437_v35, 0.0  ;;  %v383_v34 = vmul.f32 %v6162_v23, %v321_v59  ;;  %v1514_v35 = vrot.slane %v7153_v13, 2  ;;  %v7179_v59 = vsel %vm508_vm0, %v6994_v46, 0.0 }
  0x73   : > { %5659 = vmatprep.subr.bf16.mxu1 %v5658_v49  ;;  %v1512_v38 = vrot.slane %v7157_v33, 2  ;;  %v385_v63 = vmul.f32 %v6162_v23, %v323_v19  ;;  %v386_v46 = vmul.f32 %v6162_v23, %v324_v9  ;;  %v4299_v19 = vld [vmem:[%s8088_s1 + $0x148] sm:$0xff] }
  0x74   : > { %4986 = vmatmul.mubr.f32.gmra.mrb[2].mxu1 %v6491_v18  ;;  %v7183_v18 = vsel %vm1448_vm3, %v1505_v37, %v1507_v60  ;;  %v443_v30 = vadd.f32 %v7127_v4, %v383_v34  ;;  %v4298_v60 = vld [vmem:[%s8088_s1 + $0x140] sm:$0xff]  ;;  %v7202_v32 = vsel %vm1448_vm3, %v1514_v35, %v1515_v39  ;;  %v1519_v37 = vrot.slane %v7179_v59, 2 }
  0x75   : > { %5330 = vmatmul.mubr.f32.gmra.mrb[18].mxu0 %v7147_v40  ;;  %4988 = vmatprep.mubr.f32.mxu1 %v6508_v29  ;;  %v5666_v40 = vpack.c.bf16 %v4297_v42, %v4296_v8  ;;  %v7188_v29 = vsel %vm519_vm2, %v491_v20, 0.0  ;;  %8280 = vst [vmem:[#allocation65_spill] sm:$0xff] %v7202_v32  ;;  %v7208_v34 = vsel %vm1448_vm3, %v1510_v7, %v1512_v38  ;;  %v7214_v20 = vsel %vm508_vm0, %v7026_v25, 0.0  ;;  %v4301_v38 = vld [vmem:[%s8088_s1 + $0x158] sm:$0xff] }
  0x76   : > { %5332 = vmatprep.mubr.f32.mxu0 %v7139_v55  ;;  %5661 = vmatpush3.bf16.msra.mxu1 %v5658_v49  ;;  %v444_v55 = vadd.f32 %v7127_v4, %v384_v57  ;;  %v1520_v49 = vrot.slane %v7012_v62, 2  ;;  %v1517_v23 = vrot.slane %v7188_v29, 2  ;;  %v445_v8 = vadd.f32 %v7127_v4, %v385_v63 }
  0x77   : > { %5663 = vmatprep.subr.bf16.mxu1 %v5662_v2  ;;  %v7219_v42 = vsel %vm519_vm2, %v494_v3, 0.0  ;;  %v497_v57 = vmax.f32 %v443_v30, 0.0  ;;  %v446_v9 = vadd.f32 %v7127_v4, %v386_v46  ;;  %v5670_v7 = vpack.c.bf16 %v4299_v19, %v4298_v60 }
  0x78   : > { %4989 = vmatmul.mubr.f32.gmra.mrb[4].mxu1 %v6531_v50  ;;  %v7223_v35 = vmax.f32 %v444_v55, 0.0  ;;  %v1525_v30 = vrot.slane %v7050_v6, 2  ;;  %v7236_v3 = vsel %vm1448_vm3, %v1515_v39, %v1517_v23  ;;  %v7239_v46 = vsel %vm1448_vm3, %v1519_v37, %v1520_v49  ;;  %v4303_v37 = vld [vmem:[%s8088_s1 + $0x168] sm:$0xff] }
  0x79   : > { %5333 = vmatmul.mubr.f32.gmra.mrb[20].mxu0 %v7183_v18  ;;  %4991 = vmatprep.mubr.f32.mxu1 %v6583_v12  ;;  %8282 = vst [vmem:[#allocation67_spill] sm:$0xff] %v7236_v3  ;;  %v1522_v4 = vrot.slane %v7219_v42, 2  ;;  %v1524_v55 = vrot.slane %v7214_v20, 2  ;;  %v7245_v63 = vsel %vm519_vm2, %v497_v57, 0.0  ;;  %v7247_v60 = vmax.f32 %v445_v8, 0.0 }
  0x7a   : > { %5335 = vmatprep.mubr.f32.mxu0 %v7172_v5  ;;  %5665 = vmatpush3.bf16.msra.mxu1 %v5662_v2  ;;  %8281 = vst [vmem:[#allocation66_spill] sm:$0xff] %v7223_v35  ;;  %v4300_v2 = vld [vmem:[%s8088_s1 + $0x150] sm:$0xff]  ;;  %v500_v19 = vmax.f32 %v446_v9, 0.0  ;;  %v7253_v39 = vsel %vm508_vm0, %v7223_v35, 0.0  ;;  %v1527_v57 = vrot.slane %v7245_v63, 2 }
  0x7b   : > { %5667 = vmatprep.subr.bf16.mxu1 %v5666_v40  ;;  %8283 = vst [vmem:[#allocation68_spill] sm:$0xff] %v7253_v39  ;;  %v7265_v23 = vsel %vm1448_vm3, %v1520_v49, %v1522_v4  ;;  %v7268_v8 = vsel %vm1448_vm3, %v1524_v55, %v1525_v30  ;;  %v2585_v9 = vrot.slane %v7253_v39, 2  ;;  %v4304_v49 = vld [vmem:[%s8088_s1 + $0x170] sm:$0xff]  ;;  %v1054_v39 = vrot.slane %v6910_v1, 1 }
  0x7c   : > { %4992 = vmatmul.mubr.f32.gmra.mrb[6].mxu1 %v6593_v58  ;;  %v7288_v41 = vsel %vm1448_vm3, %v1525_v30, %v1527_v57  ;;  %v1043_v30 = vrot.slane %v7004_v44, 1  ;;  %v1044_v57 = vrot.slane %v6839_v45, 1  ;;  %v1046_v44 = vrot.slane %v7046_v16, 1  ;;  %v4405_v16 = vld [vmem:[%s8088_s1 + $0x3a0] sm:$0xff] }
  0x7d   : > { %5336 = vmatmul.mubr.f32.gmra.mrb[22].mxu0 %v7208_v34  ;;  %4994 = vmatprep.mubr.f32.mxu1 %v6609_v53 }
  0x7e   : > { %5338 = vmatprep.mubr.f32.mxu0 %v7202_v32  ;;  %5669 = vmatpush3.bf16.msra.mxu1 %v5666_v40  ;;  %v5674_v32 = vpack.c.bf16 %v4301_v38, %v4300_v2  ;;  %v4302_v40 = vld [vmem:[%s8088_s1 + $0x160] sm:$0xff]  ;;  %v2586_v2 = vrot.slane %v7247_v60, 2  ;;  %v7275_v38 = vsel %vm519_vm2, %v500_v19, 0.0 }
  0x7f   : > { %5671 = vmatprep.subr.bf16.mxu1 %v5670_v7  ;;  %8284 = vst [vmem:[#allocation69_spill] sm:$0xff] %v7275_v38  ;;  %v2588_v4 = vrot.slane %v7275_v38, 2  ;;  %v1053_v38 = vrot.slane %v7079_v52, 1 }
  0x80   : > { %4995 = vmatmul.mubr.f32.gmra.mrb[8].mxu1 %v6651_v47  ;;  %v7292_v55 = vsel %vm1448_vm3, %v2585_v9, %v2586_v2 }
  0x81   : > { %5339 = vmatmul.mubr.f32.gmra.mrb[24].mxu0 %v7236_v3  ;;  %4997 = vmatprep.mubr.f32.mxu1 %v6654_v48  ;;  %v5678_v3 = vpack.c.bf16 %v4303_v37, %v4302_v40  ;;  %8285 = vst [vmem:[#allocation70_spill] sm:$0xff] %v7292_v55  ;;  %v4306_v40 = vld [vmem:[%s8088_s1 + $0x180] sm:$0xff]  ;;  %v4307_v37 = vld [vmem:[%s8088_s1 + $0x188] sm:$0xff] }
  0x82   : > { %5341 = vmatprep.mubr.f32.mxu0 %v7239_v46  ;;  %5673 = vmatpush3.bf16.msra.mxu1 %v5670_v7  ;;  %v4305_v7 = vld [vmem:[%s8088_s1 + $0x178] sm:$0xff]  ;;  %v7309_v9 = vpack.c.bf16 %v4307_v37, %v4306_v40  ;;  %v1049_v40 = vrot.slane %v6876_v0, 1 }
  0x83   : > { %5675 = vmatprep.subr.bf16.mxu1 %v5674_v32  ;;  %v5682_v19 = vpack.c.bf16 %v4305_v7, %v4304_v49  ;;  %v4403_v49 = vld [vmem:[%s8088_s1 + $0x390] sm:$0xff]  ;;  %v4404_v7 = vld [vmem:[%s8088_s1 + $0x398] sm:$0xff] }
  0x84   : > { %4998 = vmatmul.mubr.f32.gmra.mrb[10].mxu1 %v6696_v31  ;;  %v5818_v37 = vpack.c.bf16 %v4404_v7, %v4403_v49  ;;  %v8290_v49 = vld [vmem:[#allocation15_spill] sm:$0xff] }
  0x85   : > { %5342 = vmatmul.mubr.f32.gmra.mrb[26].mxu0 %v7265_v23  ;;  %5000 = vmatprep.mubr.f32.mxu1 %v6705_v11 }
  0x86   : > { %5344 = vmatprep.mubr.f32.mxu0 %v7268_v8  ;;  %5677 = vmatpush3.bf16.msra.mxu1 %v5674_v32  ;;  %v7305_v32 = vsel %vm1448_vm3, %v2586_v2, %v2588_v4  ;;  %v7325_v2 = vsel %vm997_vm1, %v1043_v30, %v1044_v57  ;;  %v1048_v4 = vrot.slane %v7041_v21, 1  ;;  %v8289_v30 = vld [vmem:[#allocation13_spill] sm:$0xff]  ;;  %v7340_v21 = vsel %vm997_vm1, %v1044_v57, %v1046_v44 }
  0x87   : > { %5679 = vmatprep.subr.bf16.mxu1 %v5678_v3  ;;  %8286 = vst [vmem:[#allocation71_spill] sm:$0xff] %v7305_v32  ;;  %v1056_v57 = vrot.slane %v7116_v24, 1  ;;  %v7369_v44 = vsel %vm997_vm1, %v1053_v38, %v1054_v39  ;;  %v4409_v24 = vld [vmem:[%s8088_s1 + $0x3c0] sm:$0xff]  ;;  %v1061_v38 = vrot.slane %v7157_v33, 1  ;;  %v4411_v33 = vld [vmem:[%s8088_s1 + $0x3d0] sm:$0xff] }
  0x88   : > { %5001 = vmatmul.mubr.f32.gmra.mrb[12].mxu1 %v6734_v43  ;;  %v7348_v7 = vsel %vm997_vm1, %v1048_v4, %v1049_v40  ;;  %v1058_v4 = vrot.slane %v7112_v10, 1  ;;  %v8368_v27 = vld [vmem:[#allocation70_spill] sm:$0xff] }
  0x89   : > { %5345 = vmatmul.mubr.f32.gmra.mrb[28].mxu0 %v7288_v41  ;;  %5003 = vmatprep.mubr.f32.mxu1 %v6739_v56  ;;  %v7383_v10 = vsel %vm997_vm1, %v1054_v39, %v1056_v57  ;;  %v4412_v39 = vld [vmem:[%s8088_s1 + $0x3d8] sm:$0xff] }
  0x8a   : > { %5347 = vmatprep.mubr.f32.mxu0 %v7292_v55  ;;  %5681 = vmatpush3.bf16.msra.mxu1 %v5678_v3  ;;  %v8287_v3 = vld [vmem:[#allocation11_spill] sm:$0xff]  ;;  %v4406_v55 = vld [vmem:[%s8088_s1 + $0x3a8] sm:$0xff]  ;;  %v8293_v57 = vld [vmem:[#allocation22_spill] sm:$0xff] }
  0x8b   : > { %5683 = vmatprep.subr.bf16.mxu1 %v5682_v19 }
  0x8c   : > { %5004 = vmatmul.mubr.f32.gmra.mrb[14].mxu1 %v6768_v17 }
  0x8d   : > { %5348 = vmatmul.mubr.f32.gmra.mrb[30].mxu0 %v7305_v32  ;;  %5006 = vmatprep.mubr.f32.mxu1 %v6773_v26  ;;  %v8288_v32 = vld [vmem:[#allocation28_spill] sm:$0xff] }
  0x8e   : > { %5382 = vmatprep.mubr.msk.f32.mxu0 %vm508_vm0, %v8287_v3  ;;  %5685 = vmatpush3.bf16.msra.mxu1 %v5682_v19  ;;  %v1051_v19 = vrot.slane %v7089_v51, 1  ;;  %v4407_v51 = vld [vmem:[%s8088_s1 + $0x3b0] sm:$0xff] }
  0x8f   : > { %5687 = vmatprep.subr.bf16.mxu1 %v7309_v9 }
  0x90   : > { %5007 = vmatmul.mubr.f32.gmra.mrb[16].mxu1 %v8288_v32  ;;  %v7362_v52 = vsel %vm997_vm1, %v1049_v40, %v1051_v19  ;;  %v4410_v40 = vld [vmem:[%s8088_s1 + $0x3c8] sm:$0xff] }
  0x91   : > { %5383 = vmatmul.mubr.f32.vlgmr.msra.gmra.mrb[0].mxu0 %v8289_v30  ;;  %5009 = vmatprep.mubr.f32.mxu1 %v7325_v2  ;;  %v5822_v30 = vpack.c.bf16 %v4406_v55, %v4405_v16  ;;  %v8291_v55 = vld [vmem:[#allocation16_spill] sm:$0xff]  ;;  %v1059_v16 = vrot.slane %v6943_v54, 1 }
  0x92   : > { %5817 = vmatpush3.bf16.msra.mxu0 %v7093_v14  ;;  %5385 = vmatprep.mubr.msk.f32.mxu0 %vm508_vm0, %v8290_v49  ;;  %v4408_v14 = vld [vmem:[%s8088_s1 + $0x3b8] sm:$0xff] }
  0x93   : > { %5819 = vmatprep.subr.bf16.mxu0 %v5818_v37  ;;  %v7390_v19 = vsel %vm997_vm1, %v1058_v4, %v1059_v16 }
  0x94   : > { %5010 = vmatmul.mubr.f32.gmra.mrb[18].mxu1 %v7340_v21 }
  0x95   : > { %5386 = vmatmul.mubr.f32.gmra.mrb[2].mxu0 %v6493_v22  ;;  %5012 = vmatprep.mubr.f32.mxu1 %v7348_v7  ;;  %v5826_v22 = vpack.c.bf16 %v4408_v14, %v4407_v51  ;;  %v1063_v51 = vrot.slane %v7153_v13, 1  ;;  %v1064_v14 = vrot.slane %v6977_v28, 1  ;;  %v7404_v13 = vsel %vm997_vm1, %v1059_v16, %v1061_v38  ;;  %v4414_v16 = vld [vmem:[%s8088_s1 + $0x3e8] sm:$0xff] }
  0x96   : > { %5388 = vmatprep.mubr.msk.f32.mxu0 %vm508_vm0, %v8291_v55  ;;  %5821 = vmatpush3.bf16.msra.mxu0 %v5818_v37  ;;  %v8292_v37 = vld [vmem:[#allocation20_spill] sm:$0xff] }
  0x97   : > { %5823 = vmatprep.subr.bf16.mxu0 %v5822_v30  ;;  %v7411_v4 = vsel %vm997_vm1, %v1063_v51, %v1064_v14  ;;  %v8294_v38 = vld [vmem:[#allocation24_spill] sm:$0xff] }
  0x98   : > { %5013 = vmatmul.mubr.f32.gmra.mrb[20].mxu1 %v7362_v52 }
  0x99   : > { %5389 = vmatmul.mubr.f32.gmra.mrb[4].mxu0 %v6516_v36  ;;  %5015 = vmatprep.mubr.f32.mxu1 %v7369_v44  ;;  %v5830_v36 = vpack.c.bf16 %v4410_v40, %v4409_v24  ;;  %v1068_v24 = vrot.slane %v7179_v59, 1  ;;  %v1069_v40 = vrot.slane %v7012_v62, 1 }
  0x9a   : > { %5391 = vmatprep.mubr.msk.f32.mxu0 %vm508_vm0, %v8292_v37  ;;  %5825 = vmatpush3.bf16.msra.mxu0 %v5822_v30  ;;  %v1066_v30 = vrot.slane %v7188_v29, 1  ;;  %v4413_v29 = vld [vmem:[%s8088_s1 + $0x3e0] sm:$0xff] }
  0x9b   : > { %5827 = vmatprep.subr.bf16.mxu0 %v5826_v22  ;;  %v7432_v51 = vsel %vm997_vm1, %v1068_v24, %v1069_v40  ;;  %v8296_v24 = vld [vmem:[#allocation26_spill] sm:$0xff] }
  0x9c   : > { %5016 = vmatmul.mubr.f32.gmra.mrb[22].mxu1 %v7383_v10  ;;  %v7425_v59 = vsel %vm997_vm1, %v1064_v14, %v1066_v30  ;;  %v4416_v14 = vld [vmem:[%s8088_s1 + $0x3f8] sm:$0xff]  ;;  %v8295_v30 = vld [vmem:[#allocation25_spill] sm:$0xff] }
  0x9d   : > { %5392 = vmatmul.mubr.f32.gmra.mrb[6].mxu0 %v6560_v15  ;;  %5018 = vmatprep.mubr.f32.mxu1 %v7390_v19  ;;  %v5834_v15 = vpack.c.bf16 %v4412_v39, %v4411_v33  ;;  %v1073_v33 = vrot.slane %v7214_v20, 1  ;;  %v1074_v39 = vrot.slane %v7050_v6, 1 }
  0x9e   : > { %5394 = vmatprep.mubr.msk.f32.mxu0 %vm508_vm0, %v8293_v57  ;;  %5829 = vmatpush3.bf16.msra.mxu0 %v5826_v22  ;;  %v1071_v22 = vrot.slane %v7219_v42, 1  ;;  %v4415_v42 = vld [vmem:[%s8088_s1 + $0x3f0] sm:$0xff] }
  0x9f   : > { %5831 = vmatprep.subr.bf16.mxu0 %v5830_v36 }
  0xa0   : > { %5019 = vmatmul.mubr.f32.gmra.mrb[24].mxu1 %v7404_v13  ;;  %v7446_v20 = vsel %vm997_vm1, %v1069_v40, %v1071_v22  ;;  %v8297_v40 = vld [vmem:[#allocation27_spill] sm:$0xff] }
  0xa1   : > { %5395 = vmatmul.mubr.f32.gmra.mrb[8].mxu0 %v6626_v61  ;;  %5021 = vmatprep.mubr.f32.mxu1 %v7411_v4  ;;  %v5838_v61 = vpack.c.bf16 %v4414_v16, %v4413_v29  ;;  %v7453_v29 = vsel %vm997_vm1, %v1073_v33, %v1074_v39  ;;  %v5842_v16 = vpack.c.bf16 %v4416_v14, %v4415_v42  ;;  %v8300_v42 = vld [vmem:[#allocation30_spill] sm:$0xff] }
  0xa2   : > { %5397 = vmatprep.mubr.msk.f32.mxu0 %vm508_vm0, %v8294_v38  ;;  %5833 = vmatpush3.bf16.msra.mxu0 %v5830_v36  ;;  %v1076_v36 = vrot.slane %v7245_v63, 1  ;;  %v4418_v63 = vld [vmem:[%s8088_s1 + $0x408] sm:$0xff] }
  0xa3   : > { %5835 = vmatprep.subr.bf16.mxu0 %v5834_v15 }
  0xa4   : > { %5022 = vmatmul.mubr.f32.gmra.mrb[26].mxu1 %v7425_v59  ;;  %v7465_v22 = vsel %vm997_vm1, %v1074_v39, %v1076_v36  ;;  %v4309_v39 = vld [vmem:[%s8088_s1 + $0x198] sm:$0xff] }
  0xa5   : > { %5398 = vmatmul.mubr.f32.gmra.mrb[10].mxu0 %v8295_v30  ;;  %5024 = vmatprep.mubr.f32.mxu1 %v7432_v51  ;;  %v4417_v30 = vld [vmem:[%s8088_s1 + $0x400] sm:$0xff]  ;;  %v8301_v36 = vld [vmem:[#allocation34_spill] sm:$0xff] }
  0xa6   : > { %5400 = vmatprep.mubr.msk.f32.mxu0 %vm508_vm0, %v8296_v24  ;;  %5837 = vmatpush3.bf16.msra.mxu0 %v5834_v15  ;;  %v8298_v15 = vmov 0.0   ;;  %v7473_v14 = vpack.c.bf16 %v4418_v63, %v4417_v30  ;;  %v4310_v30 = vld [vmem:[%s8088_s1 + $0x1a0] sm:$0xff]  ;;  %v4311_v63 = vld [vmem:[%s8088_s1 + $0x1a8] sm:$0xff] }
  0xa7   : > { %5839 = vmatprep.subr.bf16.mxu0 %v5838_v61  ;;  %v7468_v33 = vrot.slane %v8298_v15, 2 }
  0xa8   : > { %5025 = vmatmul.mubr.f32.gmra.mrb[28].mxu1 %v7446_v20 }
  0xa9   : > { %5401 = vmatmul.mubr.f32.gmra.mrb[12].mxu0 %v8297_v40  ;;  %5027 = vmatprep.mubr.f32.mxu1 %v7453_v29  ;;  %8299 = vst [vmem:[#allocation11_spill] sm:$0xff] %v7468_v33  ;;  %v4308_v40 = vld [vmem:[%s8088_s1 + $0x190] sm:$0xff] }
  0xaa   : > { %5403 = vmatprep.mubr.msk.f32.mxu0 %vm508_vm0, %v8300_v42  ;;  %5841 = vmatpush3.bf16.msra.mxu0 %v5838_v61  ;;  %v5690_v61 = vpack.c.bf16 %v4309_v39, %v4308_v40  ;;  %v5694_v40 = vpack.c.bf16 %v4311_v63, %v4310_v30  ;;  %v8304_v39 = vld [vmem:[#allocation31_spill] sm:$0xff] }
  0xab   : > { %5843 = vmatprep.subr.bf16.mxu0 %v5842_v16  ;;  %v8307_v63 = vld [vmem:[#allocation35_spill] sm:$0xff] }
  0xac   : > { %5028 = vmatmul.mubr.f32.gmra.mrb[30].mxu1 %v7465_v22 }
  0xad   : > { %5404 = vmatmul.mubr.f32.gmra.mrb[14].mxu0 %v6839_v45  ;;  %5062 = vmatprep.mubr.f32.mxu1 %v7468_v33  ;;  %v8302_v45 = vld [vmem:[#allocation29_spill] sm:$0xff] }
  0xae   : > { %5406 = vmatprep.mubr.msk.f32.mxu0 %vm508_vm0, %v8301_v36  ;;  %5845 = vmatpush3.bf16.msra.mxu0 %v5842_v16  ;;  %v8303_v16 = vld [vmem:[#allocation38_spill] sm:$0xff] }
  0xaf   : > { %5847 = vmatprep.subr.bf16.mxu0 %v7473_v14  ;;  %v8309_v36 = vld [vmem:[#allocation46_spill] sm:$0xff] }
  0xb0   : > { %5063 = vmatmul.mubr.f32.vlgmr.msra.gmra.mrb[0].mxu1 %v7468_v33  ;;  %v4312_v33 = vld [vmem:[%s8088_s1 + $0x1b0] sm:$0xff] }
  0xb1   : > { %5407 = vmatmul.mubr.f32.gmra.mrb[16].mxu0 %v6876_v0  ;;  %5689 = vmatpush3.bf16.msra.mxu1 %v7309_v9  ;;  %v4313_v0 = vld [vmem:[%s8088_s1 + $0x1b8] sm:$0xff]  ;;  %v8305_v9 = vld [vmem:[#allocation32_spill] sm:$0xff] }
  0xb2   : > { %5065 = vmatprep.mubr.f32.mxu1 %v8302_v45  ;;  %5409 = vmatprep.mubr.msk.f32.mxu0 %vm508_vm0, %v8303_v16  ;;  %v8306_v45 = vld [vmem:[#allocation42_spill] sm:$0xff]  ;;  %v5698_v30 = vpack.c.bf16 %v4313_v0, %v4312_v33  ;;  %v4315_v16 = vld [vmem:[%s8088_s1 + $0x1c8] sm:$0xff]  ;;  %v8310_v33 = vld [vmem:[#allocation39_spill] sm:$0xff] }
  0xb3   : > { %5691 = vmatprep.subr.bf16.mxu1 %v5690_v61 }
  0xb4   : > { %5066 = vmatmul.mubr.f32.gmra.mrb[2].mxu1 %v8304_v39  ;;  %v4314_v39 = vld [vmem:[%s8088_s1 + $0x1c0] sm:$0xff] }
  0xb5   : > { %5410 = vmatmul.mubr.f32.gmra.mrb[18].mxu0 %v6910_v1  ;;  %5068 = vmatprep.mubr.f32.mxu1 %v8305_v9  ;;  %v8308_v1 = vld [vmem:[#allocation36_spill] sm:$0xff]  ;;  %v5702_v0 = vpack.c.bf16 %v4315_v16, %v4314_v39  ;;  %v4318_v39 = vld [vmem:[%s8088_s1 + $0x1e0] sm:$0xff] }
  0xb6   : > { %5412 = vmatprep.mubr.msk.f32.mxu0 %vm508_vm0, %v8306_v45  ;;  %5693 = vmatpush3.bf16.msra.mxu1 %v5690_v61  ;;  %v4316_v61 = vld [vmem:[%s8088_s1 + $0x1d0] sm:$0xff]  ;;  %v4317_v45 = vld [vmem:[%s8088_s1 + $0x1d8] sm:$0xff] }
  0xb7   : > { %5695 = vmatprep.subr.bf16.mxu1 %v5694_v40  ;;  %v5706_v16 = vpack.c.bf16 %v4317_v45, %v4316_v61  ;;  %v4320_v61 = vld [vmem:[%s8088_s1 + $0x1f0] sm:$0xff] }
  0xb8   : > { %5069 = vmatmul.mubr.f32.gmra.mrb[4].mxu1 %v8307_v63 }
  0xb9   : > { %5413 = vmatmul.mubr.f32.gmra.mrb[20].mxu0 %v6943_v54  ;;  %5071 = vmatprep.mubr.f32.mxu1 %v8308_v1  ;;  %v8311_v54 = vld [vmem:[#allocation40_spill] sm:$0xff]  ;;  %v8312_v1 = vld [vmem:[#allocation51_spill] sm:$0xff] }
  0xba   : > { %5415 = vmatprep.mubr.msk.f32.mxu0 %vm508_vm0, %v8309_v36  ;;  %5697 = vmatpush3.bf16.msra.mxu1 %v5694_v40  ;;  %v8313_v40 = vld [vmem:[#allocation43_spill] sm:$0xff]  ;;  %v4319_v36 = vld [vmem:[%s8088_s1 + $0x1e8] sm:$0xff] }
  0xbb   : > { %5699 = vmatprep.subr.bf16.mxu1 %v5698_v30  ;;  %v5710_v45 = vpack.c.bf16 %v4319_v36, %v4318_v39  ;;  %v8318_v39 = vld [vmem:[#allocation52_spill] sm:$0xff] }
  0xbc   : > { %5072 = vmatmul.mubr.f32.gmra.mrb[6].mxu1 %v8310_v33 }
  0xbd   : > { %5416 = vmatmul.mubr.f32.gmra.mrb[22].mxu0 %v6977_v28  ;;  %5074 = vmatprep.mubr.f32.mxu1 %v8311_v54  ;;  %v8314_v28 = vld [vmem:[#allocation44_spill] sm:$0xff] }
  0xbe   : > { %5418 = vmatprep.mubr.msk.f32.mxu0 %vm508_vm0, %v8312_v1  ;;  %5701 = vmatpush3.bf16.msra.mxu1 %v5698_v30  ;;  %v8315_v30 = vld [vmem:[#allocation47_spill] sm:$0xff]  ;;  %v4321_v1 = vld [vmem:[%s8088_s1 + $0x1f8] sm:$0xff] }
  0xbf   : > { %5703 = vmatprep.subr.bf16.mxu1 %v5702_v0  ;;  %v5714_v36 = vpack.c.bf16 %v4321_v1, %v4320_v61  ;;  %v4420_v1 = vld [vmem:[%s8088_s1 + $0x418] sm:$0xff] }
  0xc0   : > { %5075 = vmatmul.mubr.f32.gmra.mrb[8].mxu1 %v8313_v40  ;;  %v8321_v61 = vld [vmem:[#allocation18_spill] sm:$0xff] }
  0xc1   : > { %5419 = vmatmul.mubr.f32.gmra.mrb[24].mxu0 %v7012_v62  ;;  %5077 = vmatprep.mubr.f32.mxu1 %v8314_v28  ;;  %v8316_v62 = vld [vmem:[#allocation48_spill] sm:$0xff] }
  0xc2   : > { %5421 = vmatprep.mubr.msk.f32.mxu0 %vm508_vm0, %v7026_v25  ;;  %5705 = vmatpush3.bf16.msra.mxu1 %v5702_v0  ;;  %v8317_v0 = vld [vmem:[#allocation50_spill] sm:$0xff]  ;;  %v4419_v25 = vld [vmem:[%s8088_s1 + $0x410] sm:$0xff] }
  0xc3   : > { %5707 = vmatprep.subr.bf16.mxu1 %v5706_v16 }
  0xc4   : > { %5078 = vmatmul.mubr.f32.gmra.mrb[10].mxu1 %v8315_v30 }
  0xc5   : > { %5422 = vmatmul.mubr.f32.gmra.mrb[26].mxu0 %v7050_v6  ;;  %5080 = vmatprep.mubr.f32.mxu1 %v8316_v62  ;;  %v8319_v6 = vld [vmem:[#allocation55_spill] sm:$0xff] }
  0xc6   : > { %5424 = vmatprep.mubr.msk.f32.mxu0 %vm508_vm0, %v7223_v35  ;;  %5709 = vmatpush3.bf16.msra.mxu1 %v5706_v16  ;;  %v8320_v16 = vld [vmem:[#allocation56_spill] sm:$0xff]  ;;  %v5850_v35 = vpack.c.bf16 %v4420_v1, %v4419_v25  ;;  %v4423_v1 = vld [vmem:[%s8088_s1 + $0x430] sm:$0xff] }
  0xc7   : > { %5711 = vmatprep.subr.bf16.mxu1 %v5710_v45 }
  0xc8   : > { %5081 = vmatmul.mubr.f32.gmra.mrb[12].mxu1 %v8317_v0  ;;  %v4422_v0 = vld [vmem:[%s8088_s1 + $0x428] sm:$0xff] }
  0xc9   : > { %5425 = vmatmul.mubr.f32.gmra.mrb[28].mxu0 %v7247_v60  ;;  %5083 = vmatprep.mubr.f32.mxu1 %v8318_v39  ;;  %v8323_v39 = vld [vmem:[#allocation58_spill] sm:$0xff] }
  0xca   : > { %5427 = vmatprep.mubr.f32.mxu0 %v8298_v15  ;;  %5713 = vmatpush3.bf16.msra.mxu1 %v5710_v45  ;;  %v8322_v45 = vld [vmem:[#allocation3_spill] sm:$0xff] }
  0xcb   : > { %5715 = vmatprep.subr.bf16.mxu1 %v5714_v36 }
  0xcc   : > { %5084 = vmatmul.mubr.f32.gmra.mrb[14].mxu1 %v8319_v6  ;;  %v4421_v6 = vld [vmem:[%s8088_s1 + $0x420] sm:$0xff] }
  0xcd   : > { %5428 = vmatmul.mubr.f32.gmra.mrb[30].mxu0 %v8298_v15  ;;  %5086 = vmatprep.mubr.f32.mxu1 %v8320_v16  ;;  %v8324_v15 = vld [vmem:[#allocation60_spill] sm:$0xff]  ;;  %v5854_v25 = vpack.c.bf16 %v4422_v0, %v4421_v6 }
  0xce   : > { %5462 = vmatprep.mubr.f32.mxu0 %v8321_v61  ;;  %5717 = vmatpush3.bf16.msra.mxu1 %v5714_v36  ;;  %v8325_v36 = vld [vmem:[#allocation61_spill] sm:$0xff]  ;;  %v4424_v61 = vld [vmem:[%s8088_s1 + $0x438] sm:$0xff]  ;;  %v8327_v6 = vld [vmem:[#allocation64_spill] sm:$0xff] }
  0xcf   : > { %5878 = vmatprep.subr.bf16.mxu1 %v8322_v45  ;;  %v4426_v0 = vld [vmem:[%s8088_s1 + $0x448] sm:$0xff] }
  0xd0   : > { %5087 = vmatmul.mubr.f32.gmra.mrb[16].mxu1 %v8323_v39 }
  0xd1   : > { %5463 = vmatmul.mubr.f32.vlgmr.msra.gmra.mrb[0].mxu0 %v6531_v50  ;;  %5089 = vmatprep.mubr.f32.mxu1 %v8324_v15  ;;  %v8326_v50 = vld [vmem:[#allocation62_spill] sm:$0xff] }
  0xd2   : > { %5849 = vmatpush3.bf16.msra.mxu0 %v7473_v14  ;;  %5465 = vmatprep.mubr.f32.mxu0 %v6583_v12  ;;  %v5858_v12 = vpack.c.bf16 %v4424_v61, %v4423_v1  ;;  %v4425_v14 = vld [vmem:[%s8088_s1 + $0x440] sm:$0xff]  ;;  %v4428_v1 = vld [vmem:[%s8088_s1 + $0x458] sm:$0xff] }
  0xd3   : > { %5851 = vmatprep.subr.bf16.mxu0 %v5850_v35  ;;  %v8330_v61 = vld [vmem:[#allocation67_spill] sm:$0xff] }
  0xd4   : > { %5090 = vmatmul.mubr.f32.gmra.mrb[18].mxu1 %v8325_v36 }
  0xd5   : > { %5466 = vmatmul.mubr.f32.gmra.mrb[2].mxu0 %v6593_v58  ;;  %5092 = vmatprep.mubr.f32.mxu1 %v8326_v50  ;;  %v8328_v58 = vld [vmem:[#allocation63_spill] sm:$0xff] }
  0xd6   : > { %5468 = vmatprep.mubr.f32.mxu0 %v6609_v53  ;;  %5853 = vmatpush3.bf16.msra.mxu0 %v5850_v35  ;;  %v5862_v53 = vpack.c.bf16 %v4426_v0, %v4425_v14  ;;  %v4427_v35 = vld [vmem:[%s8088_s1 + $0x450] sm:$0xff]  ;;  %v4432_v14 = vld [vmem:[%s8088_s1 + $0x478] sm:$0xff] }
  0xd7   : > { %5855 = vmatprep.subr.bf16.mxu0 %v5854_v25  ;;  %v8336_v0 = vld [vmem:[#allocation17_spill] sm:$0xff] }
  0xd8   : > { %5093 = vmatmul.mubr.f32.gmra.mrb[20].mxu1 %v8327_v6 }
  0xd9   : > { %5469 = vmatmul.mubr.f32.gmra.mrb[4].mxu0 %v6651_v47  ;;  %5095 = vmatprep.mubr.f32.mxu1 %v8328_v58  ;;  %v5866_v47 = vpack.c.bf16 %v4428_v1, %v4427_v35  ;;  %v2241_v35 = vrot.slane %v7247_v60, 1  ;;  %v8340_v1 = vld [vmem:[#allocation7_spill] sm:$0xff] }
  0xda   : > { %5471 = vmatprep.mubr.f32.mxu0 %v6654_v48  ;;  %5857 = vmatpush3.bf16.msra.mxu0 %v5854_v25  ;;  %v4429_v48 = vld [vmem:[%s8088_s1 + $0x460] sm:$0xff]  ;;  %v4430_v25 = vld [vmem:[%s8088_s1 + $0x468] sm:$0xff] }
  0xdb   : > { %5859 = vmatprep.subr.bf16.mxu0 %v5858_v12 }
  0xdc   : > { %5096 = vmatmul.mubr.f32.gmra.mrb[22].mxu1 %v7183_v18 }
  0xdd   : > { %5472 = vmatmul.mubr.f32.gmra.mrb[6].mxu0 %v6696_v31  ;;  %5098 = vmatprep.mubr.f32.mxu1 %v7172_v5  ;;  %v8329_v31 = vld [vmem:[#allocation65_spill] sm:$0xff] }
  0xde   : > { %5474 = vmatprep.mubr.f32.mxu0 %v6705_v11  ;;  %5861 = vmatpush3.bf16.msra.mxu0 %v5858_v12  ;;  %v5870_v11 = vpack.c.bf16 %v4430_v25, %v4429_v48  ;;  %v4431_v12 = vld [vmem:[%s8088_s1 + $0x470] sm:$0xff] }
  0xdf   : > { %5863 = vmatprep.subr.bf16.mxu0 %v5862_v53 }
  0xe0   : > { %5099 = vmatmul.mubr.f32.gmra.mrb[24].mxu1 %v7208_v34 }
  0xe1   : > { %5475 = vmatmul.mubr.f32.gmra.mrb[8].mxu0 %v6734_v43  ;;  %5101 = vmatprep.mubr.f32.mxu1 %v8329_v31  ;;  %v8331_v43 = vld [vmem:[#allocation8_spill] sm:$0xff] }
  0xe2   : > { %5477 = vmatprep.mubr.f32.mxu0 %v6739_v56  ;;  %5865 = vmatpush3.bf16.msra.mxu0 %v5862_v53  ;;  %v5874_v56 = vpack.c.bf16 %v4432_v14, %v4431_v12  ;;  %v8339_v53 = vld [vmem:[#allocation68_spill] sm:$0xff]  ;;  %v8344_v12 = vld [vmem:[#allocation23_spill] sm:$0xff] }
  0xe3   : > { %5867 = vmatprep.subr.bf16.mxu0 %v5866_v47  ;;  %v8345_v14 = vld [vmem:[#allocation12_spill] sm:$0xff] }
  0xe4   : > { %5102 = vmatmul.mubr.f32.gmra.mrb[26].mxu1 %v8330_v61 }
  0xe5   : > { %5478 = vmatmul.mubr.f32.gmra.mrb[10].mxu0 %v6768_v17  ;;  %5104 = vmatprep.mubr.f32.mxu1 %v7239_v46  ;;  %v8332_v17 = vld [vmem:[#allocation9_spill] sm:$0xff] }
  0xe6   : > { %5480 = vmatprep.mubr.f32.mxu0 %v6773_v26  ;;  %5869 = vmatpush3.bf16.msra.mxu0 %v5866_v47  ;;  %v8333_v26 = vld [vmem:[#allocation4_spill] sm:$0xff]  ;;  %v8341_v47 = vld [vmem:[#allocation21_spill] sm:$0xff] }
  0xe7   : > { %5871 = vmatprep.subr.bf16.mxu0 %v5870_v11 }
  0xe8   : > { %5105 = vmatmul.mubr.f32.gmra.mrb[28].mxu1 %v7265_v23 }
  0xe9   : > { %5481 = vmatmul.mubr.f32.gmra.mrb[12].mxu0 %v8288_v32  ;;  %5107 = vmatprep.mubr.f32.mxu1 %v7268_v8  ;;  %v8334_v32 = vld [vmem:[#allocation13_spill] sm:$0xff] }
  0xea   : > { %5483 = vmatprep.mubr.f32.mxu0 %v7325_v2  ;;  %5873 = vmatpush3.bf16.msra.mxu0 %v5870_v11  ;;  %v8343_v11 = vld [vmem:[#allocation10_spill] sm:$0xff] }
  0xeb   : > { %5875 = vmatprep.subr.bf16.mxu0 %v5874_v56 }
  0xec   : > { %5108 = vmatmul.mubr.f32.gmra.mrb[30].mxu1 %v7288_v41 }
  0xed   : > { %5484 = vmatmul.mubr.f32.gmra.mrb[14].mxu0 %v7340_v21  ;;  %5142 = vmatprep.mubr.msk.f32.mxu1 %vm508_vm0, %v8331_v43  ;;  %v8347_v43 = vld [vmem:[#allocation59_spill] sm:$0xff] }
  0xee   : > { %5486 = vmatprep.mubr.f32.mxu0 %v7348_v7  ;;  %5877 = vmatpush3.bf16.msra.mxu0 %v5874_v56  ;;  %v8346_v56 = vld [vmem:[#allocation25_spill] sm:$0xff] }
  0xf0   : > { %5143 = vmatmul.mubr.f32.vlgmr.msra.gmra.mrb[0].mxu1 %v8332_v17  ;;  %v8349_v17 = vld [vmem:[#allocation27_spill] sm:$0xff] }
  0xf1   : > { %5487 = vmatmul.mubr.f32.gmra.mrb[16].mxu0 %v7362_v52  ;;  %5886 = vmatpush3.bf16.msra.mxu1 %v8322_v45  ;;  %v8335_v45 = vld [vmem:[#allocation5_spill] sm:$0xff] }
  0xf2   : > { %5145 = vmatprep.mubr.msk.f32.mxu1 %vm508_vm0, %v8287_v3  ;;  %5489 = vmatprep.mubr.f32.mxu0 %v7369_v44  ;;  %v8337_v3 = vld [vmem:[#allocation6_spill] sm:$0xff] }
  0xf3   : > { %5879 = vmatprep.subr.bf16.mxu1 %v8333_v26 }
  0xf4   : > { %5146 = vmatmul.mubr.f32.gmra.mrb[2].mxu1 %v8334_v32  ;;  %v8352_v32 = vld [vmem:[#allocation36_spill] sm:$0xff] }
  0xf5   : > { %5490 = vmatmul.mubr.f32.gmra.mrb[18].mxu0 %v7383_v10  ;;  %5148 = vmatprep.mubr.msk.f32.mxu1 %vm508_vm0, %v8290_v49  ;;  %v8338_v49 = vld [vmem:[#allocation19_spill] sm:$0xff] }
  0xf6   : > { %5492 = vmatprep.mubr.f32.mxu0 %v7390_v19  ;;  %5887 = vmatpush3.bf16.msra.mxu1 %v8333_v26  ;;  %v8350_v26 = vld [vmem:[#allocation33_spill] sm:$0xff] }
  0xf7   : > { %5880 = vmatprep.subr.bf16.mxu1 %v8335_v45 }
  0xf8   : > { %5149 = vmatmul.mubr.f32.gmra.mrb[4].mxu1 %v8336_v0  ;;  %v8354_v0 = vld [vmem:[#allocation38_spill] sm:$0xff] }
  0xf9   : > { %5493 = vmatmul.mubr.f32.gmra.mrb[20].mxu0 %v7404_v13  ;;  %5151 = vmatprep.mubr.msk.f32.mxu1 %vm508_vm0, %v8291_v55  ;;  %v2240_v55 = vrot.slane %v8339_v53, 1  ;;  %v8364_v53 = vld [vmem:[#allocation55_spill] sm:$0xff] }
  0xfa   : > { %5495 = vmatprep.mubr.f32.mxu0 %v7411_v4  ;;  %5888 = vmatpush3.bf16.msra.mxu1 %v8335_v45  ;;  %v8353_v45 = vld [vmem:[#allocation37_spill] sm:$0xff] }
  0xfb   : > { %5881 = vmatprep.subr.bf16.mxu1 %v8337_v3  ;;  %v7690_v25 = vsel %vm997_vm1, %v2240_v55, %v2241_v35  ;;  %v8367_v55 = vld [vmem:[#allocation66_spill] sm:$0xff] }
  0xfc   : > { %5152 = vmatmul.mubr.f32.gmra.mrb[6].mxu1 %v8338_v49  ;;  %v8362_v49 = vld [vmem:[#allocation52_spill] sm:$0xff] }
  0xfd   : > { %5496 = vmatmul.mubr.f32.gmra.mrb[22].mxu0 %v7425_v59  ;;  %5154 = vmatprep.mubr.msk.f32.mxu1 %vm508_vm0, %v8292_v37  ;;  %v8342_v37 = vld [vmem:[#allocation69_spill] sm:$0xff] }
  0xfe   : > { %5498 = vmatprep.mubr.f32.mxu0 %v7432_v51  ;;  %5889 = vmatpush3.bf16.msra.mxu1 %v8337_v3  ;;  %v2243_v48 = vrot.slane %v8342_v37, 1  ;;  %v8360_v3 = vld [vmem:[#allocation50_spill] sm:$0xff] }
  0xff   : > { %5882 = vmatprep.subr.bf16.mxu1 %v8340_v1 }
 0x100   : > { %5155 = vmatmul.mubr.f32.gmra.mrb[8].mxu1 %v8341_v47 }
 0x101   : > { %5499 = vmatmul.mubr.f32.gmra.mrb[24].mxu0 %v7446_v20  ;;  %5157 = vmatprep.mubr.msk.f32.mxu1 %vm508_vm0, %v8293_v57  ;;  %v7700_v57 = vsel %vm997_vm1, %v2241_v35, %v2243_v48 }
 0x102   : > { %5501 = vmatprep.mubr.f32.mxu0 %v7453_v29  ;;  %5890 = vmatpush3.bf16.msra.mxu1 %v8340_v1 }
 0x103   : > { %5883 = vmatprep.subr.bf16.mxu1 %v8343_v11 }
 0x104   : > { %5158 = vmatmul.mubr.f32.gmra.mrb[10].mxu1 %v8344_v12 }
 0x105   : > { %5502 = vmatmul.mubr.f32.gmra.mrb[26].mxu0 %v7465_v22  ;;  %5160 = vmatprep.mubr.msk.f32.mxu1 %vm508_vm0, %v8294_v38  ;;  %v8348_v38 = vld [vmem:[#allocation14_spill] sm:$0xff] }
 0x106   : > { %5504 = vmatprep.mubr.f32.mxu0 %v7690_v25  ;;  %5891 = vmatpush3.bf16.msra.mxu1 %v8343_v11 }
 0x107   : > { %5884 = vmatprep.subr.bf16.mxu1 %v8345_v14 }
 0x108   : > { %5161 = vmatmul.mubr.f32.gmra.mrb[12].mxu1 %v8346_v56 }
 0x109   : > { %5505 = vmatmul.mubr.f32.gmra.mrb[28].mxu0 %v7700_v57  ;;  %5163 = vmatprep.mubr.msk.f32.mxu1 %vm508_vm0, %v8296_v24  ;;  %v8351_v24 = vld [vmem:[#allocation34_spill] sm:$0xff] }
 0x10a   : > { %5507 = vmatprep.mubr.f32.mxu0 %v8347_v43  ;;  %5892 = vmatpush3.bf16.msra.mxu1 %v8345_v14 }
 0x10b   : > { %5885 = vmatprep.subr.bf16.mxu1 %v8348_v38 }
 0x10c   : > { %5164 = vmatmul.mubr.f32.gmra.mrb[14].mxu1 %v8349_v17 }
 0x10d   : > { %5508 = vmatmul.mubr.f32.gmra.mrb[30].mxu0 %v8347_v43  ;;  %5166 = vmatprep.mubr.msk.f32.mxu1 %vm508_vm0, %v8300_v42  ;;  %v8355_v42 = vld [vmem:[#allocation41_spill] sm:$0xff] }
 0x10e   : > { %5542 = vmatprep.mubr.f32.mxu0 %v8305_v9  ;;  %5893 = vmatpush3.bf16.msra.mxu1 %v8348_v38  ;;  %v8356_v9 = vld [vmem:[#allocation42_spill] sm:$0xff] }
 0x110   : > { %5167 = vmatmul.mubr.f32.gmra.mrb[16].mxu1 %v8350_v26 }
 0x111   : > { %5543 = vmatmul.mubr.f32.vlgmr.msra.gmra.mrb[0].mxu0 %v8307_v63  ;;  %5169 = vmatprep.mubr.msk.f32.mxu1 %vm508_vm0, %v8351_v24  ;;  %v8357_v63 = vld [vmem:[#allocation45_spill] sm:$0xff] }
 0x112   : > { %5545 = vmatprep.mubr.f32.mxu0 %v8352_v32 }
 0x114   : > { %5170 = vmatmul.mubr.f32.gmra.mrb[18].mxu1 %v8353_v45 }
 0x115   : > { %5546 = vmatmul.mubr.f32.gmra.mrb[2].mxu0 %v8310_v33  ;;  %5172 = vmatprep.mubr.msk.f32.mxu1 %vm508_vm0, %v8354_v0  ;;  %v8358_v33 = vld [vmem:[#allocation46_spill] sm:$0xff] }
 0x116   : > { %5548 = vmatprep.mubr.f32.mxu0 %v8311_v54  ;;  %v8359_v54 = vld [vmem:[#allocation49_spill] sm:$0xff] }
 0x118   : > { %5173 = vmatmul.mubr.f32.gmra.mrb[20].mxu1 %v8355_v42 }
 0x119   : > { %5549 = vmatmul.mubr.f32.gmra.mrb[4].mxu0 %v8313_v40  ;;  %5175 = vmatprep.mubr.msk.f32.mxu1 %vm508_vm0, %v8356_v9  ;;  %v8361_v40 = vld [vmem:[#allocation51_spill] sm:$0xff] }
 0x11a   : > { %5551 = vmatprep.mubr.f32.mxu0 %v8314_v28  ;;  %v8363_v28 = vld [vmem:[#allocation53_spill] sm:$0xff] }
 0x11c   : > { %5176 = vmatmul.mubr.f32.gmra.mrb[22].mxu1 %v8357_v63 }
 0x11d   : > { %5552 = vmatmul.mubr.f32.gmra.mrb[6].mxu0 %v8315_v30  ;;  %5178 = vmatprep.mubr.msk.f32.mxu1 %vm508_vm0, %v8358_v33  ;;  %v8365_v30 = vld [vmem:[#allocation54_spill] sm:$0xff] }
 0x11e   : > { %5554 = vmatprep.mubr.f32.mxu0 %v8316_v62  ;;  %v8366_v62 = vld [vmem:[#allocation57_spill] sm:$0xff] }
 0x120   : > { %5179 = vmatmul.mubr.f32.gmra.mrb[24].mxu1 %v8359_v54 }
 0x121   : > { %5555 = vmatmul.mubr.f32.gmra.mrb[8].mxu0 %v8360_v3  ;;  %5181 = vmatprep.mubr.msk.f32.mxu1 %vm508_vm0, %v8361_v40 }
 0x122   : > { %5557 = vmatprep.mubr.f32.mxu0 %v8362_v49 }
 0x124   : > { %5182 = vmatmul.mubr.f32.gmra.mrb[26].mxu1 %v8363_v28 }
 0x125   : > { %5558 = vmatmul.mubr.f32.gmra.mrb[10].mxu0 %v8364_v53  ;;  %5184 = vmatprep.mubr.msk.f32.mxu1 %vm508_vm0, %v8365_v30 }
 0x126   : > { %5560 = vmatprep.mubr.f32.mxu0 %v8320_v16 }
 0x128   : > { %5185 = vmatmul.mubr.f32.gmra.mrb[28].mxu1 %v8366_v62 }
 0x129   : > { %5561 = vmatmul.mubr.f32.gmra.mrb[12].mxu0 %v8323_v39  ;;  %5187 = vmatprep.mubr.msk.f32.mxu1 %vm508_vm0, %v8367_v55 }
 0x12a   : > { %5563 = vmatprep.mubr.f32.mxu0 %v8324_v15 }
 0x12c   : > { %5188 = vmatmul.mubr.f32.gmra.mrb[30].mxu1 %v7247_v60 }
 0x12d   : > { %5564 = vmatmul.mubr.f32.gmra.mrb[14].mxu0 %v8325_v36  ;;  %5246 = vmatprep.mubr.f32.mxu1 %v7325_v2 }
 0x12e   : > { %5566 = vmatprep.mubr.f32.mxu0 %v8326_v50 }
 0x130   : > { %5247 = vmatmul.mubr.f32.vlgmr.msra.gmra.mrb[16].mxu1 %v7340_v21 }
 0x131   : > { %5567 = vmatmul.mubr.f32.gmra.mrb[16].mxu0 %v8327_v6  ;;  %5249 = vmatprep.mubr.f32.mxu1 %v7348_v7 }
 0x132   : > { %5569 = vmatprep.mubr.f32.mxu0 %v8328_v58 }
 0x134   : > { %5250 = vmatmul.mubr.f32.gmra.mrb[18].mxu1 %v7362_v52 }
 0x135   : > { %5570 = vmatmul.mubr.f32.gmra.mrb[18].mxu0 %v7183_v18  ;;  %5252 = vmatprep.mubr.f32.mxu1 %v7369_v44  ;;  %v8370_v18 = vld [vmem:[#allocation11_spill] sm:$0xff] }
 0x136   : > { %5572 = vmatprep.mubr.f32.mxu0 %v7172_v5  ;;  %v8369_v5 = vld [vmem:[#allocation71_spill] sm:$0xff] }
 0x138   : > { %5253 = vmatmul.mubr.f32.gmra.mrb[20].mxu1 %v7383_v10 }
 0x139   : > { %5573 = vmatmul.mubr.f32.gmra.mrb[20].mxu0 %v7208_v34  ;;  %5255 = vmatprep.mubr.f32.mxu1 %v7390_v19 }
 0x13a   : > { %5575 = vmatprep.mubr.f32.mxu0 %v8329_v31 }
 0x13c   : > { %5256 = vmatmul.mubr.f32.gmra.mrb[22].mxu1 %v7404_v13 }
 0x13d   : > { %5576 = vmatmul.mubr.f32.gmra.mrb[22].mxu0 %v8330_v61  ;;  %5258 = vmatprep.mubr.f32.mxu1 %v7411_v4 }
 0x13e   : > { %5578 = vmatprep.mubr.f32.mxu0 %v7239_v46 }
 0x140   : > { %5259 = vmatmul.mubr.f32.gmra.mrb[24].mxu1 %v7425_v59 }
 0x141   : > { %5579 = vmatmul.mubr.f32.gmra.mrb[24].mxu0 %v7265_v23  ;;  %5261 = vmatprep.mubr.f32.mxu1 %v7432_v51 }
 0x142   : > { %5581 = vmatprep.mubr.f32.mxu0 %v7268_v8 }
 0x144   : > { %5262 = vmatmul.mubr.f32.gmra.mrb[26].mxu1 %v7446_v20  ;;  %v7801_v20 = vld [vmem:[%s8089_s2] ss:$0 sm:$0xff] }
 0x145   : > { %5582 = vmatmul.mubr.f32.gmra.mrb[26].mxu0 %v7288_v41  ;;  %5264 = vmatprep.mubr.f32.mxu1 %v7453_v29 }
 0x146   : > { %5584 = vmatprep.mubr.f32.mxu0 %v8368_v27 }
 0x148   : > { %5265 = vmatmul.mubr.f32.gmra.mrb[28].mxu1 %v7465_v22 }
 0x149   : > { %5585 = vmatmul.mubr.f32.gmra.mrb[28].mxu0 %v8369_v5  ;;  %5267 = vmatprep.mubr.f32.mxu1 %v7690_v25 }
 0x14a   : > { %5587 = vmatprep.mubr.f32.mxu0 %v8370_v18 }
 0x14c   : > { %5268 = vmatmul.mubr.f32.gmra.mrb[30].mxu1 %v7700_v57 }
 0x14d   : > { %5588 = vmatmul.mubr.f32.gmra.mrb[30].mxu0 %v8370_v18 }
 0x1c3   : > { %v5144_v34 = vpop.f32.mrb[0].mxu1 }
 0x1c4   : > { %v2014_v46 = vpop.f32.mrb[1].mxu1 }
 0x1c7   : > { %v5147_v60 = vpop.f32.mrb[2].mxu1 }
 0x1c8   : > { %v2024_v23 = vpop.f32.mrb[3].mxu1 }
 0x1cb   : > { %v5150_v8 = vpop.f32.mrb[4].mxu1 }
 0x1cc   : > { %v2034_v41 = vpop.f32.mrb[5].mxu1 }
 0x1cf   : > { %v5153_v2 = vpop.f32.mrb[6].mxu1 }
 0x1d0   : > { %v2044_v21 = vpop.f32.mrb[7].mxu1 }
 0x1d3   : > { %v5156_v7 = vpop.f32.mrb[8].mxu1 }
 0x1d4   : > { %v2054_v52 = vpop.f32.mrb[9].mxu1 }
 0x1d7   : > { %v5159_v44 = vpop.f32.mrb[10].mxu1 }
 0x1d8   : > { %v2064_v10 = vpop.f32.mrb[11].mxu1 }
 0x1db   : > { %v5162_v19 = vpop.f32.mrb[12].mxu1 }
 0x1dc   : > { %v2074_v13 = vpop.f32.mrb[13].mxu1 }
 0x1df   : > { %v5165_v4 = vpop.f32.mrb[14].mxu1 }
 0x1e0   : > { %v7795_v59 = vpop.f32.mrb[15].mxu1 }
 0x1e4   : > { %v5544_v51 = vpop.f32.mrb[0].mxu0 }
 0x1e5   : > { %v5894_v29 = vadd.f32 %v5544_v51, %v5144_v34  ;;  %v3738_v22 = vpop.f32.mrb[1].mxu0 }
 0x1e6   : > { %v5895_v39 = vadd.f32 %v3738_v22, %v2014_v46 }
 0x1e7   : > { %v7809_v16 = vadd.f32 %v5894_v29, %v7801_v20 }
 0x1e8   : > { %v7812_v15 = vadd.f32 %v5895_v39, %v7801_v20  ;;  %v5547_v36 = vpop.f32.mrb[2].mxu0 }
 0x1e9   : > { %4033 = vst [vmem:[%s7806_s15 + $0x8] sm:$0xff] %v7809_v16  ;;  %v5896_v50 = vadd.f32 %v5547_v36, %v5147_v60  ;;  %v3748_v6 = vpop.f32.mrb[3].mxu0 }
 0x1ea   : > { %4032 = vst [vmem:[%s7806_s15] sm:$0xff] %v7812_v15  ;;  %v5897_v58 = vadd.f32 %v3748_v6, %v2024_v23 }
 0x1eb   : > { %v7819_v31 = vadd.f32 %v5896_v50, %v7801_v20 }
 0x1ec   : > { %v7822_v61 = vadd.f32 %v5897_v58, %v7801_v20  ;;  %v5550_v35 = vpop.f32.mrb[4].mxu0 }
 0x1ed   : > { %4035 = vst [vmem:[%s7806_s15 + $0x18] sm:$0xff] %v7819_v31  ;;  %v5898_v1 = vadd.f32 %v5550_v35, %v5150_v8  ;;  %v3758_v47 = vpop.f32.mrb[5].mxu0 }
 0x1ee   : > { %4034 = vst [vmem:[%s7806_s15 + $0x10] sm:$0xff] %v7822_v61  ;;  %v5899_v37 = vadd.f32 %v3758_v47, %v2034_v41 }
 0x1ef   : > { %v7829_v48 = vadd.f32 %v5898_v1, %v7801_v20 }
 0x1f0   : > { %v7832_v25 = vadd.f32 %v5899_v37, %v7801_v20  ;;  %v5553_v11 = vpop.f32.mrb[6].mxu0 }
 0x1f1   : > { %4037 = vst [vmem:[%s7806_s15 + $0x28] sm:$0xff] %v7829_v48  ;;  %v5900_v12 = vadd.f32 %v5553_v11, %v5153_v2  ;;  %v3768_v57 = vpop.f32.mrb[7].mxu0 }
 0x1f2   : > { %4036 = vst [vmem:[%s7806_s15 + $0x20] sm:$0xff] %v7832_v25  ;;  %v5901_v14 = vadd.f32 %v3768_v57, %v2044_v21 }
 0x1f3   : > { %v7839_v56 = vadd.f32 %v5900_v12, %v7801_v20 }
 0x1f4   : > { %v7842_v43 = vadd.f32 %v5901_v14, %v7801_v20  ;;  %v5556_v38 = vpop.f32.mrb[8].mxu0 }
 0x1f5   : > { %4039 = vst [vmem:[%s7806_s15 + $0x38] sm:$0xff] %v7839_v56  ;;  %v5902_v17 = vadd.f32 %v5556_v38, %v5156_v7  ;;  %v3778_v26 = vpop.f32.mrb[9].mxu0 }
 0x1f6   : > { %4038 = vst [vmem:[%s7806_s15 + $0x30] sm:$0xff] %v7842_v43  ;;  %v5903_v24 = vadd.f32 %v3778_v26, %v2054_v52 }
 0x1f7   : > { %v7849_v32 = vadd.f32 %v5902_v17, %v7801_v20 }
 0x1f8   : > { %v7852_v45 = vadd.f32 %v5903_v24, %v7801_v20  ;;  %v5559_v0 = vpop.f32.mrb[10].mxu0 }
 0x1f9   : > { %4041 = vst [vmem:[%s7806_s15 + $0x48] sm:$0xff] %v7849_v32  ;;  %v5904_v42 = vadd.f32 %v5559_v0, %v5159_v44  ;;  %v3788_v9 = vpop.f32.mrb[11].mxu0 }
 0x1fa   : > { %4040 = vst [vmem:[%s7806_s15 + $0x40] sm:$0xff] %v7852_v45  ;;  %v5905_v63 = vadd.f32 %v3788_v9, %v2064_v10 }
 0x1fb   : > { %v7859_v33 = vadd.f32 %v5904_v42, %v7801_v20 }
 0x1fc   : > { %v7862_v54 = vadd.f32 %v5905_v63, %v7801_v20  ;;  %v5562_v3 = vpop.f32.mrb[12].mxu0 }
 0x1fd   : > { %4043 = vst [vmem:[%s7806_s15 + $0x58] sm:$0xff] %v7859_v33  ;;  %v5906_v40 = vadd.f32 %v5562_v3, %v5162_v19  ;;  %v3798_v49 = vpop.f32.mrb[13].mxu0 }
 0x1fe   : > { %4042 = vst [vmem:[%s7806_s15 + $0x50] sm:$0xff] %v7862_v54  ;;  %v5907_v28 = vadd.f32 %v3798_v49, %v2074_v13 }
 0x1ff   : > { %v7869_v53 = vadd.f32 %v5906_v40, %v7801_v20 }
 0x200   : > { %v7872_v30 = vadd.f32 %v5907_v28, %v7801_v20  ;;  %v5565_v62 = vpop.f32.mrb[14].mxu0 }
 0x201   : > { %4045 = vst [vmem:[%s7806_s15 + $0x68] sm:$0xff] %v7869_v53  ;;  %v5908_v55 = vadd.f32 %v5565_v62, %v5165_v4  ;;  %v3808_v27 = vpop.f32.mrb[15].mxu0 }
 0x202   : > { %4044 = vst [vmem:[%s7806_s15 + $0x60] sm:$0xff] %v7872_v30  ;;  %v5909_v5 = vadd.f32 %v3808_v27, %v7795_v59 }
 0x203   : > { %v7880_v18 = vadd.f32 %v5908_v55, %v7801_v20  ;;  %v5248_v34 = vpop.f32.mrb[16].mxu1 }
 0x204   : > { %v7883_v46 = vadd.f32 %v5909_v5, %v7801_v20  ;;  %v5568_v60 = vpop.f32.mrb[16].mxu0  ;;  %v2442_v23 = vpop.f32.mrb[17].mxu1 }
 0x205   : > { %4047 = vst [vmem:[%s7806_s15 + $0x78] sm:$0xff] %v7880_v18  ;;  %v5910_v8 = vadd.f32 %v5568_v60, %v5248_v34  ;;  %v3818_v41 = vpop.f32.mrb[17].mxu0 }
 0x206   : > { %4046 = vst [vmem:[%s7806_s15 + $0x70] sm:$0xff] %v7883_v46  ;;  %v5911_v2 = vadd.f32 %v3818_v41, %v2442_v23 }
 0x207   : > { %v7890_v21 = vadd.f32 %v5910_v8, %v7801_v20  ;;  %v5251_v7 = vpop.f32.mrb[18].mxu1 }
 0x208   : > { %v7893_v52 = vadd.f32 %v5911_v2, %v7801_v20  ;;  %v5571_v44 = vpop.f32.mrb[18].mxu0  ;;  %v2452_v10 = vpop.f32.mrb[19].mxu1 }
 0x209   : > { %4049 = vst [vmem:[%s7806_s15 + $0x88] sm:$0xff] %v7890_v21  ;;  %v5912_v19 = vadd.f32 %v5571_v44, %v5251_v7  ;;  %v3828_v13 = vpop.f32.mrb[19].mxu0 }
 0x20a   : > { %4048 = vst [vmem:[%s7806_s15 + $0x80] sm:$0xff] %v7893_v52  ;;  %v5913_v4 = vadd.f32 %v3828_v13, %v2452_v10 }
 0x20b   : > { %v7900_v59 = vadd.f32 %v5912_v19, %v7801_v20  ;;  %v5254_v51 = vpop.f32.mrb[20].mxu1 }
 0x20c   : > { %v7903_v29 = vadd.f32 %v5913_v4, %v7801_v20  ;;  %v5574_v22 = vpop.f32.mrb[20].mxu0  ;;  %v2462_v39 = vpop.f32.mrb[21].mxu1 }
 0x20d   : > { %4051 = vst [vmem:[%s7806_s15 + $0x98] sm:$0xff] %v7900_v59  ;;  %v5914_v36 = vadd.f32 %v5574_v22, %v5254_v51  ;;  %v3838_v50 = vpop.f32.mrb[21].mxu0 }
 0x20e   : > { %4050 = vst [vmem:[%s7806_s15 + $0x90] sm:$0xff] %v7903_v29  ;;  %v5915_v6 = vadd.f32 %v3838_v50, %v2462_v39 }
 0x20f   : > { %v7910_v58 = vadd.f32 %v5914_v36, %v7801_v20  ;;  %v5257_v35 = vpop.f32.mrb[22].mxu1 }
 0x210   : > { %v7913_v1 = vadd.f32 %v5915_v6, %v7801_v20  ;;  %v5577_v47 = vpop.f32.mrb[22].mxu0  ;;  %v2472_v37 = vpop.f32.mrb[23].mxu1  ;;  %v6172_v6 = vmov (!%p4434_p4), 0.0  }
 0x211   : > { %4053 = vst [vmem:[%s7806_s15 + $0xa8] sm:$0xff] %v7910_v58  ;;  %v5916_v11 = vadd.f32 %v5577_v47, %v5257_v35  ;;  %v3848_v12 = vpop.f32.mrb[23].mxu0  ;;  %4068 = vst [vmem:[%s8093_s6] sm:$0x1] (!%p4434_p4), %v6172_v6 }
 0x212   : > { %4052 = vst [vmem:[%s7806_s15 + $0xa0] sm:$0xff] %v7913_v1  ;;  %v5917_v57 = vadd.f32 %v3848_v12, %v2472_v37  ;;  %4069 = vst [vmem:[%s8094_s7] sm:$0x1] (!%p4434_p4), %v6172_v6 }
 0x213   : > { %v7920_v14 = vadd.f32 %v5916_v11, %v7801_v20  ;;  %v5260_v38 = vpop.f32.mrb[24].mxu1 }
 0x214   : > { %v7923_v17 = vadd.f32 %v5917_v57, %v7801_v20  ;;  %v5580_v26 = vpop.f32.mrb[24].mxu0  ;;  %v2482_v24 = vpop.f32.mrb[25].mxu1 }
 0x215   : > { %4055 = vst [vmem:[%s7806_s15 + $0xb8] sm:$0xff] %v7920_v14  ;;  %v5918_v0 = vadd.f32 %v5580_v26, %v5260_v38  ;;  %v3858_v42 = vpop.f32.mrb[25].mxu0 }
 0x216   : > { %4054 = vst [vmem:[%s7806_s15 + $0xb0] sm:$0xff] %v7923_v17  ;;  %v5919_v9 = vadd.f32 %v3858_v42, %v2482_v24 }
 0x217   : > { %v7930_v63 = vadd.f32 %v5918_v0, %v7801_v20  ;;  %v5263_v3 = vpop.f32.mrb[26].mxu1 }
 0x218   : > { %v7933_v40 = vadd.f32 %v5919_v9, %v7801_v20  ;;  %v5583_v49 = vpop.f32.mrb[26].mxu0  ;;  %v2492_v28 = vpop.f32.mrb[27].mxu1 }
 0x219   : > { %4057 = vst [vmem:[%s7806_s15 + $0xc8] sm:$0xff] %v7930_v63  ;;  %v5920_v62 = vadd.f32 %v5583_v49, %v5263_v3  ;;  %v3868_v55 = vpop.f32.mrb[27].mxu0 }
 0x21a   : > { %4056 = vst [vmem:[%s7806_s15 + $0xc0] sm:$0xff] %v7933_v40  ;;  %v5921_v27 = vadd.f32 %v3868_v55, %v2492_v28 }
 0x21b   : > { %v7940_v5 = vadd.f32 %v5920_v62, %v7801_v20  ;;  %v5266_v34 = vpop.f32.mrb[28].mxu1 }
 0x21c   : > { %v7943_v60 = vadd.f32 %v5921_v27, %v7801_v20  ;;  %v5586_v23 = vpop.f32.mrb[28].mxu0  ;;  %v2502_v8 = vpop.f32.mrb[29].mxu1 }
 0x21d   : > { %4059 = vst [vmem:[%s7806_s15 + $0xd8] sm:$0xff] %v7940_v5  ;;  %v5922_v41 = vadd.f32 %v5586_v23, %v5266_v34  ;;  %v3878_v2 = vpop.f32.mrb[29].mxu0 }
 0x21e   : > { %4058 = vst [vmem:[%s7806_s15 + $0xd0] sm:$0xff] %v7943_v60  ;;  %v5923_v7 = vadd.f32 %v3878_v2, %v2502_v8 }
 0x21f   : > { %v7950_v44 = vadd.f32 %v5922_v41, %v7801_v20  ;;  %v5269_v10 = vpop.f32.mrb[30].mxu1 }
 0x220   : > { %v7953_v19 = vadd.f32 %v5923_v7, %v7801_v20  ;;  %v5589_v13 = vpop.f32.mrb[30].mxu0  ;;  %v2512_v4 = vpop.f32.mrb[31].mxu1  ;;  %4067 = sbr.rel (%p4434_p4) target bundleno = 551 (0x227), region = 44 }
 0x221   : > { %4061 = vst [vmem:[%s7806_s15 + $0xe8] sm:$0xff] %v7950_v44  ;;  %v5924_v51 = vadd.f32 %v5589_v13, %v5269_v10  ;;  %v3888_v22 = vpop.f32.mrb[31].mxu0 }
 0x222   : > { %4060 = vst [vmem:[%s7806_s15 + $0xe0] sm:$0xff] %v7953_v19  ;;  %v5925_v39 = vadd.f32 %v3888_v22, %v2512_v4 }
 0x223   : > { %v7960_v36 = vadd.f32 %v5924_v51, %v7801_v20 }
 0x224   : > { %v7963_v50 = vadd.f32 %v5925_v39, %v7801_v20 }
 0x225   : > { %4063 = vst [vmem:[%s7806_s15 + $0xf8] sm:$0xff] %v7960_v36 }
 0x226   : > { %4062 = vst [vmem:[%s7806_s15 + $0xf0] sm:$0xff] %v7963_v50 }
 0x227 PF: > { %v4071_v20 = vadd.f32 %v7809_v16, %v7812_v15  ;;  %v4111_v37 = vmul.f32 %v7812_v15, %v7812_v15  ;;  %v4112_v11 = vmul.f32 %v7809_v16, %v7809_v16  ;;  %v4113_v57 = vmul.f32 %v7822_v61, %v7822_v61 }
 0x228   : > { %v4114_v26 = vmul.f32 %v7819_v31, %v7819_v31  ;;  %v4115_v42 = vmul.f32 %v7832_v25, %v7832_v25  ;;  %v4116_v16 = vmul.f32 %v7829_v48, %v7829_v48  ;;  %v4117_v49 = vmul.f32 %v7842_v43, %v7842_v43 }
 0x229   : > { %v4072_v35 = vadd.f32 %v4071_v20, %v7822_v61  ;;  %v4143_v24 = vadd.f32 %v4112_v11, %v4111_v37  ;;  %v4118_v62 = vmul.f32 %v7839_v56, %v7839_v56  ;;  %v4119_v27 = vmul.f32 %v7852_v45, %v7852_v45 }
 0x22a   : > { %v4120_v23 = vmul.f32 %v7849_v32, %v7849_v32  ;;  %v4121_v41 = vmul.f32 %v7862_v54, %v7862_v54  ;;  %v4122_v7 = vmul.f32 %v7859_v33, %v7859_v33  ;;  %v4123_v13 = vmul.f32 %v7872_v30, %v7872_v30 }
 0x22b   : > { %v4073_v47 = vadd.f32 %v4072_v35, %v7819_v31  ;;  %v4144_v15 = vadd.f32 %v4143_v24, %v4113_v57  ;;  %v4124_v51 = vmul.f32 %v7869_v53, %v7869_v53  ;;  %v4125_v39 = vmul.f32 %v7883_v46, %v7883_v46 }
 0x22c   : > { %v4126_v20 = vmul.f32 %v7880_v18, %v7880_v18  ;;  %v4128_v11 = vmul.f32 %v7890_v21, %v7890_v21  ;;  %v4129_v57 = vmul.f32 %v7903_v29, %v7903_v29 }
 0x22d   : > { %v4074_v12 = vadd.f32 %v4073_v47, %v7832_v25  ;;  %v4145_v3 = vadd.f32 %v4144_v15, %v4114_v26  ;;  %v4127_v47 = vmul.f32 %v7893_v52, %v7893_v52  ;;  %v4130_v26 = vmul.f32 %v7900_v59, %v7900_v59 }
 0x22e   : > { %v4132_v15 = vmul.f32 %v7910_v58, %v7910_v58 }
 0x22f   : > { %v4075_v38 = vadd.f32 %v4074_v12, %v7829_v48  ;;  %v4146_v28 = vadd.f32 %v4145_v3, %v4115_v42 }
 0x231   : > { %v4076_v0 = vadd.f32 %v4075_v38, %v7842_v43  ;;  %v4147_v55 = vadd.f32 %v4146_v28, %v4116_v16  ;;  %v4133_v16 = vmul.f32 %v7923_v17, %v7923_v17  ;;  %v4135_v28 = vmul.f32 %v7933_v40, %v7933_v40 }
 0x233   : > { %v4077_v9 = vadd.f32 %v4076_v0, %v7839_v56  ;;  %v4148_v34 = vadd.f32 %v4147_v55, %v4117_v49  ;;  %v4131_v0 = vmul.f32 %v7913_v1, %v7913_v1 }
 0x235   : > { %v4078_v61 = vadd.f32 %v4077_v9, %v7852_v45  ;;  %v4149_v8 = vadd.f32 %v4148_v34, %v4118_v62  ;;  %v4136_v62 = vmul.f32 %v7930_v63, %v7930_v63  ;;  %v4138_v34 = vmul.f32 %v7940_v5, %v7940_v5 }
 0x237   : > { %v4079_v31 = vadd.f32 %v4078_v61, %v7849_v32  ;;  %v4150_v2 = vadd.f32 %v4149_v8, %v4119_v27  ;;  %v4134_v61 = vmul.f32 %v7920_v14, %v7920_v14 }
 0x239   : > { %v4080_v25 = vadd.f32 %v4079_v31, %v7862_v54  ;;  %v4151_v10 = vadd.f32 %v4150_v2, %v4120_v23  ;;  %v4139_v23 = vmul.f32 %v7953_v19, %v7953_v19  ;;  %v4141_v2 = vmul.f32 %v7963_v50, %v7963_v50 }
 0x23b   : > { %v4081_v48 = vadd.f32 %v4080_v25, %v7859_v33  ;;  %v4152_v4 = vadd.f32 %v4151_v10, %v4121_v41  ;;  %v4137_v25 = vmul.f32 %v7943_v60, %v7943_v60 }
 0x23d   : > { %v4082_v43 = vadd.f32 %v4081_v48, %v7872_v30  ;;  %v4153_v22 = vadd.f32 %v4152_v4, %v4122_v7 }
 0x23f   : > { %v4083_v56 = vadd.f32 %v4082_v43, %v7869_v53  ;;  %v4154_v6 = vadd.f32 %v4153_v22, %v4123_v13  ;;  %v4140_v43 = vmul.f32 %v7950_v44, %v7950_v44 }
 0x241   : > { %v4084_v45 = vadd.f32 %v4083_v56, %v7883_v46  ;;  %v4155_v35 = vadd.f32 %v4154_v6, %v4124_v51 }
 0x243   : > { %v4085_v32 = vadd.f32 %v4084_v45, %v7880_v18  ;;  %v4156_v37 = vadd.f32 %v4155_v35, %v4125_v39 }
 0x245   : > { %v4086_v54 = vadd.f32 %v4085_v32, %v7893_v52  ;;  %v4157_v12 = vadd.f32 %v4156_v37, %v4126_v20 }
 0x247   : > { %v4087_v33 = vadd.f32 %v4086_v54, %v7890_v21  ;;  %v4158_v38 = vadd.f32 %v4157_v12, %v4127_v47 }
 0x249   : > { %v4088_v30 = vadd.f32 %v4087_v33, %v7903_v29  ;;  %v4159_v24 = vadd.f32 %v4158_v38, %v4128_v11  ;;  %v4110_v33 = vld [vmem:[%s8094_s7] sm:$0x1] }
 0x24b   : > { %v4089_v53 = vadd.f32 %v4088_v30, %v7900_v59  ;;  %v4160_v42 = vadd.f32 %v4159_v24, %v4129_v57 }
 0x24d   : > { %v4090_v46 = vadd.f32 %v4089_v53, %v7913_v1  ;;  %v4161_v9 = vadd.f32 %v4160_v42, %v4130_v26 }
 0x24f   : > { %v4091_v18 = vadd.f32 %v4090_v46, %v7910_v58  ;;  %v4162_v3 = vadd.f32 %v4161_v9, %v4131_v0 }
 0x251   : > { %v4092_v52 = vadd.f32 %v4091_v18, %v7923_v17  ;;  %v4163_v49 = vadd.f32 %v4162_v3, %v4132_v15 }
 0x253   : > { %v4093_v21 = vadd.f32 %v4092_v52, %v7920_v14  ;;  %v4164_v31 = vadd.f32 %v4163_v49, %v4133_v16 }
 0x255   : > { %v4094_v29 = vadd.f32 %v4093_v21, %v7933_v40  ;;  %v4165_v55 = vadd.f32 %v4164_v31, %v4134_v61 }
 0x257   : > { %v4095_v59 = vadd.f32 %v4094_v29, %v7930_v63  ;;  %v4166_v27 = vadd.f32 %v4165_v55, %v4135_v28 }
 0x259   : > { %v4096_v1 = vadd.f32 %v4095_v59, %v7943_v60  ;;  %v4167_v48 = vadd.f32 %v4166_v27, %v4136_v62 }
 0x25b   : > { %v4097_v58 = vadd.f32 %v4096_v1, %v7940_v5  ;;  %v4168_v8 = vadd.f32 %v4167_v48, %v4137_v25  ;;  %v4142_v5 = vmul.f32 %v7960_v36, %v7960_v36 }
 0x25d   : > { %v4098_v17 = vadd.f32 %v4097_v58, %v7953_v19  ;;  %v4169_v41 = vadd.f32 %v4168_v8, %v4138_v34 }
 0x25f   : > { %v4099_v14 = vadd.f32 %v4098_v17, %v7950_v44  ;;  %v4170_v56 = vadd.f32 %v4169_v41, %v4139_v23  ;;  %v4070_v44 = vld [vmem:[%s8093_s6] sm:$0x1] }
 0x261   : > { %v4100_v40 = vadd.f32 %v4099_v14, %v7963_v50  ;;  %v4171_v10 = vadd.f32 %v4170_v56, %v4140_v43 }
 0x263   : > { %v4101_v63 = vadd.f32 %v4100_v40, %v7960_v36  ;;  %v4172_v13 = vadd.f32 %v4171_v10, %v4141_v2 }
 0x265   : > { %v4102_v60 = vrot.slane %v4101_v63, 4  ;;  %v4173_v4 = vadd.f32 %v4172_v13, %v4142_v5 }
 0x267   : > { %v4103_v7 = vadd.f32 %v4102_v60, %v4101_v63  ;;  %v4174_v51 = vrot.slane %v4173_v4, 4 }
 0x269   : > { %v4104_v45 = vrot.slane %v4103_v7, 2  ;;  %v4175_v54 = vadd.f32 %v4174_v51, %v4173_v4 }
 0x26b   : > { %v4105_v19 = vadd.f32 %v4104_v45, %v4103_v7  ;;  %v4176_v50 = vrot.slane %v4175_v54, 2 }
 0x26d   : > { %v4106_v32 = vrot.slane %v4105_v19, 1  ;;  %v4177_v36 = vadd.f32 %v4176_v50, %v4175_v54 }
 0x26f   : > { %v4107_v22 = vadd.f32 %v4106_v32, %v4105_v19  ;;  %v4178_v6 = vrot.slane %v4177_v36, 1 }
 0x271   : > { %v4108_v39 = vadd.f32 %v4107_v22, %v4070_v44  ;;  %v4179_v20 = vadd.f32 %v4178_v6, %v4177_v36 }
 0x273   : > { %4109 = vst [vmem:[%s8093_s6] sm:$0x1] %v4108_v39  ;;  %v4180_v35 = vadd.f32 %v4179_v20, %v4110_v33 }
 0x275   : > { %4181 = vst [vmem:[%s8094_s7] sm:$0x1] %v4180_v35 }
 0x276 PF: > { %s18_s24 = sadd.s32 1, %s6169_s24  }
 0x277   : > { %p15_p5 = scmp.ge.s32.totalorder %s18_s24, 4  }
 0x279   :  { %17 = sbr.rel (!%p15_p5) target bundleno = 1 (0x1), region = 98 }

</bundles_post_ra>
